<compile_context>
chip_gen: v6e
topology: v6e:2x2x1
jax: 0.10.0
libtpu: 0.0.40
codegen_flags: <defaults>
</compile_context>

<pallas_src>
import functools
import math

import jax
import jax.numpy as jnp
from jax import lax
from jax.experimental import pallas as pl
from jax.experimental.pallas import tpu as pltpu

_VMEM_LIMIT = 32 * 1024 * 1024  # explicit scoped-VMEM budget (safe on v5e/v6e/v7x)


def _round_up(x, m):
    return ((x + m - 1) // m) * m


def _pick_tm(m, tile_m=256):
    """Row tile: multiple of 8 that divides m, <= tile_m; prefer >=2 grid steps so
    both v7x TensorCores get work.  m is padded to a multiple of 8 upstream."""
    if m % 8 != 0 or m <= 8:
        return m                      # full-array block is always legal
    cap = min(tile_m, m)
    start = min(cap, m // 2)
    start -= start % 8
    for tm in range(start, 7, -8):
        if m % tm == 0:
            return tm
    return cap if m % cap == 0 else m


def _cparams():
    return pltpu.CompilerParams(
        dimension_semantics=("parallel",),
        vmem_limit_bytes=_VMEM_LIMIT,
    )


# ---------------------------------------------------------------------------
# Kernel 1: fused Linear   y = (x [+ add]) @ W_T + b      (W pre-transposed)
# ---------------------------------------------------------------------------
def _linear_kernel(x_ref, w_ref, b_ref, o_ref):
    acc = jnp.dot(x_ref[...], w_ref[...], preferred_element_type=jnp.float32)
    o_ref[...] = (acc + b_ref[...]).astype(o_ref.dtype)


def _linear_add_kernel(x_ref, a_ref, w_ref, b_ref, o_ref):
    acc = jnp.dot(x_ref[...] + a_ref[...], w_ref[...],
                  preferred_element_type=jnp.float32)
    o_ref[...] = (acc + b_ref[...]).astype(o_ref.dtype)


def fused_linear(x, w_t, b, *, add=None, tile_m=256):
    """x/add: (M, K); w_t: (K, N) pre-transposed; b: (1, N)."""
    M, K = x.shape
    N = w_t.shape[1]
    tm = _pick_tm(M, tile_m)

    row_spec = pl.BlockSpec((tm, K), lambda i: (i, 0))
    w_spec = pl.BlockSpec((K, N), lambda i: (0, 0))
    b_spec = pl.BlockSpec((1, N), lambda i: (0, 0))
    o_spec = pl.BlockSpec((tm, N), lambda i: (i, 0))

    if add is None:
        kernel, in_specs, operands = _linear_kernel, [row_spec, w_spec, b_spec], (x, w_t, b)
    else:
        kernel = _linear_add_kernel
        in_specs = [row_spec, row_spec, w_spec, b_spec]
        operands = (x, add, w_t, b)

    cost = pl.CostEstimate(
        flops=2 * M * K * N, transcendentals=0,
        bytes_accessed=4 * (M * K * (2 if add is not None else 1) + K * N + M * N))

    return pl.pallas_call(
        kernel,
        out_shape=jax.ShapeDtypeStruct((M, N), x.dtype),
        grid_spec=pltpu.PrefetchScalarGridSpec(
            num_scalar_prefetch=0, grid=(M // tm,),
            in_specs=in_specs, out_specs=o_spec),
        compiler_params=_cparams(),
        cost_estimate=cost,
    )(*operands)


# ---------------------------------------------------------------------------
# Kernel 2: fused pos-add projection with split outputs
#   a = (x + pos) @ Wa + ba  (split into n_a equal C-wide outputs: Q|K or K)
#   b =  x        @ Wb + bb  (V)
# ---------------------------------------------------------------------------
def _posproj_kernel(x_ref, p_ref, wa_ref, ba_ref, wb_ref, bb_ref, *out_refs):
    xp = x_ref[...] + p_ref[...]
    a = jnp.dot(xp, wa_ref[...], preferred_element_type=jnp.float32) + ba_ref[...]
    b = jnp.dot(x_ref[...], wb_ref[...], preferred_element_type=jnp.float32) + bb_ref[...]
    off = 0
    for r in out_refs[:-1]:
        w = r.shape[-1]
        r[...] = a[:, off:off + w].astype(r.dtype)
        off += w
    out_refs[-1][...] = b.astype(out_refs[-1].dtype)


def fused_pos_proj(x, pos, wa_t, ba, wb_t, bb, *, n_a, tile_m=256):
    """Self-attn QKV (n_a=2 -> Q, K, V) or cross-attn KV (n_a=1 -> K, V) in one kernel."""
    M, K = x.shape
    Na, Nb = wa_t.shape[1], wb_t.shape[1]
    c = Na // n_a
    tm = _pick_tm(M, tile_m)

    row_spec = pl.BlockSpec((tm, K), lambda i: (i, 0))
    in_specs = [row_spec, row_spec,
                pl.BlockSpec((K, Na), lambda i: (0, 0)),
                pl.BlockSpec((1, Na), lambda i: (0, 0)),
                pl.BlockSpec((K, Nb), lambda i: (0, 0)),
                pl.BlockSpec((1, Nb), lambda i: (0, 0))]
    out_shape = tuple([jax.ShapeDtypeStruct((M, c), x.dtype)] * n_a
                      + [jax.ShapeDtypeStruct((M, Nb), x.dtype)])
    out_specs = tuple([pl.BlockSpec((tm, c), lambda i: (i, 0))] * n_a
                      + [pl.BlockSpec((tm, Nb), lambda i: (i, 0))])

    cost = pl.CostEstimate(
        flops=2 * M * K * (Na + Nb), transcendentals=0,
        bytes_accessed=4 * (2 * M * K + K * (Na + Nb) + M * (Na + Nb)))

    return pl.pallas_call(
        _posproj_kernel,
        out_shape=out_shape,
        grid_spec=pltpu.PrefetchScalarGridSpec(
            num_scalar_prefetch=0, grid=(M // tm,),
            in_specs=in_specs, out_specs=out_specs),
        compiler_params=_cparams(),
        cost_estimate=cost,
    )(x, pos, wa_t, ba, wb_t, bb)


# ---------------------------------------------------------------------------
# Kernel 3: multi-head attention, per-batch block; heads split in VMEM.
#   Softmax scale already folded into Wq; approx-reciprocal normalisation.
# ---------------------------------------------------------------------------
def _mha_kernel(q_ref, k_ref, v_ref, o_ref, *, heads, dh, kv_valid):
    q = q_ref[0].astype(jnp.float32)      # (Sq, C)
    k = k_ref[0].astype(jnp.float32)      # (Skv, C)
    v = v_ref[0].astype(jnp.float32)
    skv = k.shape[0]
    kmask = None
    if kv_valid < skv:                    # static: only generated when S_kv was padded
        kmask = lax.broadcasted_iota(jnp.int32, (1, skv), 1) < kv_valid

    outs = []
    for h in range(heads):                # per-head loop keeps live vregs small
        sl = slice(h * dh, (h + 1) * dh)
        s = lax.dot_general(q[:, sl], k[:, sl], (((1,), (1,)), ((), ())),
                            preferred_element_type=jnp.float32)      # (Sq, Skv)
        if kmask is not None:
            s = jnp.where(kmask, s, -1e30)
        m = jnp.max(s, axis=-1, keepdims=True)
        p = jnp.exp(s - m)
        l = jnp.sum(p, axis=-1, keepdims=True)
        o = jnp.dot(p, v[:, sl], preferred_element_type=jnp.float32)
        outs.append(o * pl.reciprocal(l, approx=True))
    o_ref[0] = jnp.concatenate(outs, axis=-1).astype(o_ref.dtype)     # lane-dense store


def multihead_attention(q, k, v, *, heads, kv_valid):
    """q: (B, Sq, C), k/v: (B, Skv, C) -> (B, Sq, C).  No HBM head transposes."""
    B, Sq, C = q.shape
    Skv = k.shape[1]
    dh = C // heads
    return pl.pallas_call(
        functools.partial(_mha_kernel, heads=heads, dh=dh, kv_valid=kv_valid),
        out_shape=jax.ShapeDtypeStruct((B, Sq, C), q.dtype),
        grid_spec=pltpu.PrefetchScalarGridSpec(
            num_scalar_prefetch=0, grid=(B,),
            in_specs=[pl.BlockSpec((1, Sq, C), lambda b: (b, 0, 0)),
                      pl.BlockSpec((1, Skv, C), lambda b: (b, 0, 0)),
                      pl.BlockSpec((1, Skv, C), lambda b: (b, 0, 0))],
            out_specs=pl.BlockSpec((1, Sq, C), lambda b: (b, 0, 0))),
        compiler_params=_cparams(),
    )(q, k, v)


# ---------------------------------------------------------------------------
# Kernel 4: out-projection + residual-add + LayerNorm (fused epilogue)
# ---------------------------------------------------------------------------
def _proj_add_ln_kernel(x_ref, r_ref, w_ref, b_ref, g_ref, beta_ref, o_ref, *, eps):
    y = jnp.dot(x_ref[...], w_ref[...], preferred_element_type=jnp.float32) + b_ref[...]
    y = y + r_ref[...].astype(jnp.float32)
    mean = jnp.mean(y, axis=-1, keepdims=True)
    yc = y - mean
    var = jnp.mean(yc * yc, axis=-1, keepdims=True)
    o_ref[...] = (yc * lax.rsqrt(var + eps) * g_ref[...] + beta_ref[...]).astype(o_ref.dtype)


def proj_add_layernorm(x, residual, w_t, b, gamma, beta, *, eps=1e-5, tile_m=256):
    M, K = x.shape
    N = w_t.shape[1]
    tm = _pick_tm(M, tile_m)
    cost = pl.CostEstimate(flops=2 * M * K * N + 8 * M * N, transcendentals=0,
                           bytes_accessed=4 * (M * K + 2 * M * N + K * N))
    return pl.pallas_call(
        functools.partial(_proj_add_ln_kernel, eps=eps),
        out_shape=jax.ShapeDtypeStruct((M, N), x.dtype),
        grid_spec=pltpu.PrefetchScalarGridSpec(
            num_scalar_prefetch=0, grid=(M // tm,),
            in_specs=[pl.BlockSpec((tm, K), lambda i: (i, 0)),
                      pl.BlockSpec((tm, N), lambda i: (i, 0)),
                      pl.BlockSpec((K, N), lambda i: (0, 0)),
                      pl.BlockSpec((1, N), lambda i: (0, 0)),
                      pl.BlockSpec((1, N), lambda i: (0, 0)),
                      pl.BlockSpec((1, N), lambda i: (0, 0))],
            out_specs=pl.BlockSpec((tm, N), lambda i: (i, 0))),
        compiler_params=_cparams(),
        cost_estimate=cost,
    )(x, residual, w_t, b, gamma, beta)


# ---------------------------------------------------------------------------
# Kernel 5: fused FFN  LayerNorm(x + W2(GELU(W1 x)))  -- 4C intermediate stays on-chip
# ---------------------------------------------------------------------------
def _ffn_ln_kernel(x_ref, w1_ref, b1_ref, w2_ref, b2_ref, g_ref, beta_ref, o_ref, *, eps):
    x = x_ref[...].astype(jnp.float32)
    h = jnp.dot(x, w1_ref[...], preferred_element_type=jnp.float32) + b1_ref[...]
    h = jax.nn.gelu(h, approximate=True)   # TODO(synk): PyTorch default GELU is exact erf
    y = jnp.dot(h, w2_ref[...], preferred_element_type=jnp.float32) + b2_ref[...]
    y = y + x                              # residual = FFN input
    mean = jnp.mean(y, axis=-1, keepdims=True)
    yc = y - mean
    var = jnp.mean(yc * yc, axis=-1, keepdims=True)
    o_ref[...] = (yc * lax.rsqrt(var + eps) * g_ref[...] + beta_ref[...]).astype(o_ref.dtype)


def ffn_layernorm(x, w1_t, b1, w2_t, b2, gamma, beta, *, eps=1e-5, tile_m=256):
    M, C = x.shape
    H = w1_t.shape[1]
    tm = _pick_tm(M, tile_m)
    cost = pl.CostEstimate(flops=4 * M * C * H + 8 * M * C, transcendentals=M * H,
                           bytes_accessed=4 * (2 * M * C + 2 * C * H))
    return pl.pallas_call(
        functools.partial(_ffn_ln_kernel, eps=eps),
        out_shape=jax.ShapeDtypeStruct((M, C), x.dtype),
        grid_spec=pltpu.PrefetchScalarGridSpec(
            num_scalar_prefetch=0, grid=(M // tm,),
            in_specs=[pl.BlockSpec((tm, C), lambda i: (i, 0)),
                      pl.BlockSpec((C, H), lambda i: (0, 0)),
                      pl.BlockSpec((1, H), lambda i: (0, 0)),
                      pl.BlockSpec((H, C), lambda i: (0, 0)),
                      pl.BlockSpec((1, C), lambda i: (0, 0)),
                      pl.BlockSpec((1, C), lambda i: (0, 0)),
                      pl.BlockSpec((1, C), lambda i: (0, 0))],
            out_specs=pl.BlockSpec((tm, C), lambda i: (i, 0))),
        compiler_params=_cparams(),
        cost_estimate=cost,
    )(x, w1_t, b1, w2_t, b2, gamma, beta)


# ---------------------------------------------------------------------------
# One-time weight prep (hoisted out of the per-forward path)
# ---------------------------------------------------------------------------
def prepare_params(params, *, nheads, dtype=jnp.float32):
    """Transpose to MXU-ready (K, N), concat self-attn Wq|Wk, fold 1/sqrt(dh) into
    Wq/bq, reshape biases and LN params to (1, N).  Call once per model."""
    def wt(w):
        return jnp.asarray(w, dtype).T

    def rb(b):
        return jnp.asarray(b, dtype).reshape(1, -1)

    c = params["sa_wq"].shape[0]
    scale = 1.0 / math.sqrt(c // nheads)

    p = {}
    if "proj_w" in params:
        p["proj_wT"], p["proj_b"] = wt(params["proj_w"]), rb(params["proj_b"])

    p["sa_wqkT"] = jnp.concatenate([wt(params["sa_wq"]) * scale, wt(params["sa_wk"])], axis=1)
    p["sa_bqk"] = jnp.concatenate([rb(params["sa_bq"]) * scale, rb(params["sa_bk"])], axis=1)
    p["sa_wvT"], p["sa_bv"] = wt(params["sa_wv"]), rb(params["sa_bv"])
    p["sa_woT"], p["sa_bo"] = wt(params["sa_wo"]), rb(params["sa_bo"])

    p["ca_wqT"], p["ca_bq"] = wt(params["ca_wq"]) * scale, rb(params["ca_bq"]) * scale
    p["ca_wkT"], p["ca_bk"] = wt(params["ca_wk"]), rb(params["ca_bk"])
    p["ca_wvT"], p["ca_bv"] = wt(params["ca_wv"]), rb(params["ca_bv"])
    p["ca_woT"], p["ca_bo"] = wt(params["ca_wo"]), rb(params["ca_bo"])

    p["ff_w1T"], p["ff_b1"] = wt(params["ff_w1"]), rb(params["ff_b1"])
    p["ff_w2T"], p["ff_b2"] = wt(params["ff_w2"]), rb(params["ff_b2"])

    for i in (1, 2, 3):
        p[f"ln{i}_g"], p[f"ln{i}_b"] = rb(params[f"ln{i}_g"]), rb(params[f"ln{i}_b"])
    return p


# ---------------------------------------------------------------------------
# CrossBlock forward (9 fused pallas_calls)
# ---------------------------------------------------------------------------
def cross_block_forward(q, kv, pos_embed_q, pos_embed_kv, prepped, *, nheads):
    """q, pos_embed_q: (S_q, B, C); kv: (S_kv, B, kv_dim); pos_embed_kv: (S_kv, B, C)."""
    s_q, batch, c = q.shape
    s_kv = kv.shape[0]
    s_qp = _round_up(s_q, 8)
    s_kvp = _round_up(s_kv, 8)
    m_q = batch * s_qp

    def to_rows(x, s, s_pad):
        # (S, B, D) -> batch-major rows (B*S_pad, D); one small boundary transpose.
        xt = jnp.transpose(x, (1, 0, 2))
        if s_pad != s:
            xt = jnp.pad(xt, ((0, 0), (0, s_pad - s), (0, 0)))
        return xt.reshape(batch * s_pad, x.shape[2])

    tgt = to_rows(q, s_q, s_qp)
    pos_q = (to_rows(pos_embed_q, s_q, s_qp) if pos_embed_q is not None
             else jnp.zeros_like(tgt))
    kv_rows = to_rows(kv, s_kv, s_kvp)

    # optional kv_dim -> q_dim projection
    if "proj_wT" in prepped:
        memory = fused_linear(kv_rows, prepped["proj_wT"], prepped["proj_b"])
    else:
        memory = kv_rows
    pos_kv = (to_rows(pos_embed_kv, s_kv, s_kvp) if pos_embed_kv is not None
              else jnp.zeros_like(memory))

    # ---- self-attention: Q = K = tgt + pos_q, V = tgt ----
    qp, kp, vp = fused_pos_proj(tgt, pos_q, prepped["sa_wqkT"], prepped["sa_bqk"],
                                prepped["sa_wvT"], prepped["sa_bv"], n_a=2)
    att = multihead_attention(qp.reshape(batch, s_qp, c),
                              kp.reshape(batch, s_qp, c),
                              vp.reshape(batch, s_qp, c),
                              heads=nheads, kv_valid=s_q)
    tgt = proj_add_layernorm(att.reshape(m_q, c), tgt,
                             prepped["sa_woT"], prepped["sa_bo"],
                             prepped["ln1_g"], prepped["ln1_b"])

    # ---- cross-attention: Q = tgt + pos_q, K = memory + pos_kv, V = memory ----
    qp = fused_linear(tgt, prepped["ca_wqT"], prepped["ca_bq"], add=pos_q)
    kp, vp = fused_pos_proj(memory, pos_kv, prepped["ca_wkT"], prepped["ca_bk"],
                            prepped["ca_wvT"], prepped["ca_bv"], n_a=1)
    att = multihead_attention(qp.reshape(batch, s_qp, c),
                              kp.reshape(batch, s_kvp, c),
                              vp.reshape(batch, s_kvp, c),
                              heads=nheads, kv_valid=s_kv)
    tgt = proj_add_layernorm(att.reshape(m_q, c), tgt,
                             prepped["ca_woT"], prepped["ca_bo"],
                             prepped["ln2_g"], prepped["ln2_b"])

    # ---- FFN (GELU) + residual + LN; 4C intermediate never leaves VMEM ----
    tgt = ffn_layernorm(tgt, prepped["ff_w1T"], prepped["ff_b1"],
                        prepped["ff_w2T"], prepped["ff_b2"],
                        prepped["ln3_g"], prepped["ln3_b"])

    out = tgt.reshape(batch, s_qp, c)[:, :s_q, :]
    return jnp.transpose(out, (1, 0, 2))


# ---------------------------------------------------------------------------
# Pure-JAX reference (same math, no Pallas)
# ---------------------------------------------------------------------------
def cross_block_reference(q, kv, pos_embed_q, pos_embed_kv, params, *, nheads):
    def linear(x, w, b):
        return x @ w.T + b

    def ln(x, g, b, eps=1e-5):
        m = jnp.mean(x, axis=-1, keepdims=True)
        xc = x - m
        v = jnp.mean(xc * xc, axis=-1, keepdims=True)
        return xc * lax.rsqrt(v + eps) * g + b

    def mha(qx, kx, vx, wq, bq, wk, bk, wv, bv, wo, bo, heads):
        s_q, batch, c = qx.shape
        s_k = kx.shape[0]
        dh = c // heads
        Q = linear(qx, wq, bq).reshape(s_q, batch, heads, dh).transpose(1, 2, 0, 3)
        K = linear(kx, wk, bk).reshape(s_k, batch, heads, dh).transpose(1, 2, 0, 3)
        V = linear(vx, wv, bv).reshape(s_k, batch, heads, dh).transpose(1, 2, 0, 3)
        s = jnp.einsum("bhqd,bhkd->bhqk", Q, K) / math.sqrt(dh)
        p = jax.nn.softmax(s, axis=-1)
        o = jnp.einsum("bhqk,bhkd->bhqd", p, V)
        o = o.transpose(2, 0, 1, 3).reshape(s_q, batch, c)
        return linear(o, wo, bo)

    wp = lambda t, pe: t if pe is None else t + pe

    memory = linear(kv, params["proj_w"], params["proj_b"]) if "proj_w" in params else kv

    tgt = q
    sa = mha(wp(tgt, pos_embed_q), wp(tgt, pos_embed_q), tgt,
             params["sa_wq"], params["sa_bq"], params["sa_wk"], params["sa_bk"],
             params["sa_wv"], params["sa_bv"], params["sa_wo"], params["sa_bo"], nheads)
    tgt = ln(tgt + sa, params["ln1_g"], params["ln1_b"])

    ca = mha(wp(tgt, pos_embed_q), wp(memory, pos_embed_kv), memory,
             params["ca_wq"], params["ca_bq"], params["ca_wk"], params["ca_bk"],
             params["ca_wv"], params["ca_bv"], params["ca_wo"], params["ca_bo"], nheads)
    tgt = ln(tgt + ca, params["ln2_g"], params["ln2_b"])

    ff = linear(jax.nn.gelu(linear(tgt, params["ff_w1"], params["ff_b1"]), approximate=True),
                params["ff_w2"], params["ff_b2"])
    tgt = ln(tgt + ff, params["ln3_g"], params["ln3_b"])
    return tgt


if __name__ == "__main__":
    # Small shapes consistent with the module: q_dim=128, kv_dim=256 (so proj is used),
    # nheads=4 (head_dim=32), 64 query tokens, 64 memory tokens, batch=2.
    S_Q, S_KV, B = 64, 64, 2
    Q_DIM, KV_DIM, NHEADS = 128, 256, 4

    key = jax.random.PRNGKey(0)
    keys = jax.random.split(key, 40)
    kit = iter(keys)

    def lin_init(kw, kb, out_d, in_d):
        bound = 1.0 / math.sqrt(in_d)
        w = jax.random.uniform(kw, (out_d, in_d), minval=-bound, maxval=bound, dtype=jnp.float32)
        b = jax.random.uniform(kb, (out_d,), minval=-bound, maxval=bound, dtype=jnp.float32)
        return w, b

    params = {}
    params["proj_w"], params["proj_b"] = lin_init(next(kit), next(kit), Q_DIM, KV_DIM)
    for pre in ("sa", "ca"):
        for nm in ("q", "k", "v", "o"):
            params[f"{pre}_w{nm}"], params[f"{pre}_b{nm}"] = lin_init(
                next(kit), next(kit), Q_DIM, Q_DIM)
    params["ff_w1"], params["ff_b1"] = lin_init(next(kit), next(kit), 4 * Q_DIM, Q_DIM)
    params["ff_w2"], params["ff_b2"] = lin_init(next(kit), next(kit), Q_DIM, 4 * Q_DIM)
    for i in (1, 2, 3):
        params[f"ln{i}_g"] = 1.0 + 0.05 * jax.random.normal(next(kit), (Q_DIM,), dtype=jnp.float32)
        params[f"ln{i}_b"] = 0.05 * jax.random.normal(next(kit), (Q_DIM,), dtype=jnp.float32)

    kq, kkv, kpq, kpkv = jax.random.split(next(kit), 4)
    q = jax.random.normal(kq, (S_Q, B, Q_DIM), dtype=jnp.float32)
    kv = jax.random.normal(kkv, (S_KV, B, KV_DIM), dtype=jnp.float32)
    pos_q = jax.random.normal(kpq, (S_Q, B, Q_DIM), dtype=jnp.float32)
    pos_kv = jax.random.normal(kpkv, (S_KV, B, Q_DIM), dtype=jnp.float32)

    # one-time weight prep (hoisted out of the forward path)
    prepped = prepare_params(params, nheads=NHEADS)

    fwd = jax.jit(functools.partial(cross_block_forward, nheads=NHEADS))
    out = fwd(q, kv, pos_q, pos_kv, prepped)
    out = jax.block_until_ready(out)

    ref = cross_block_reference(q, kv, pos_q, pos_kv, params, nheads=NHEADS)
    assert out.shape == (S_Q, B, Q_DIM), out.shape
    max_diff = float(jnp.max(jnp.abs(out - ref)))
    assert jnp.allclose(out, ref, atol=3e-2, rtol=3e-2), \
        f"mismatch vs reference, max|diff|={max_diff}"

    print("KERNEL_OK")
</pallas_src>

<mosaic_0001>
module attributes {stable_mosaic.version = 11 : i64} {
  func.func @_mha_kernel(%arg0: i32, %arg1: memref<1x64x128xf32, #tpu.memory_space<vmem>>, %arg2: memref<1x64x128xf32, #tpu.memory_space<vmem>>, %arg3: memref<1x64x128xf32, #tpu.memory_space<vmem>>, %arg4: memref<1x64x128xf32, #tpu.memory_space<vmem>>) attributes {dimension_semantics = [#tpu.dimension_semantics<parallel>], iteration_bounds = array<i64: 2>, scalar_prefetch = 0 : i64, scratch_operands = 0 : i64, tpu.core_type = #tpu.core_type<tc>, window_params = [{transform_indices = @transform_0, window_bounds = array<i64: 1, 64, 128>}, {transform_indices = @transform_1, window_bounds = array<i64: 1, 64, 128>}, {transform_indices = @transform_2, window_bounds = array<i64: 1, 64, 128>}, {transform_indices = @transform_3, window_bounds = array<i64: 1, 64, 128>}]} {
    %c0 = arith.constant 0 : index
    %c0_0 = arith.constant 0 : index
    %c0_1 = arith.constant 0 : index
    %0 = vector.load %arg1[%c0, %c0_0, %c0_1] : memref<1x64x128xf32, #tpu.memory_space<vmem>>, vector<1x64x128xf32>
    %1 = vector.shape_cast %0 : vector<1x64x128xf32> to vector<64x128xf32>
    %c0_2 = arith.constant 0 : index
    %c0_3 = arith.constant 0 : index
    %c0_4 = arith.constant 0 : index
    %2 = vector.load %arg2[%c0_2, %c0_3, %c0_4] : memref<1x64x128xf32, #tpu.memory_space<vmem>>, vector<1x64x128xf32>
    %3 = vector.shape_cast %2 : vector<1x64x128xf32> to vector<64x128xf32>
    %c0_5 = arith.constant 0 : index
    %c0_6 = arith.constant 0 : index
    %c0_7 = arith.constant 0 : index
    %4 = vector.load %arg3[%c0_5, %c0_6, %c0_7] : memref<1x64x128xf32, #tpu.memory_space<vmem>>, vector<1x64x128xf32>
    %5 = vector.shape_cast %4 : vector<1x64x128xf32> to vector<64x128xf32>
    %6 = vector.extract_strided_slice %1 {offsets = [0, 0], sizes = [64, 32], strides = [1, 1]} : vector<64x128xf32> to vector<64x32xf32>
    %7 = vector.extract_strided_slice %3 {offsets = [0, 0], sizes = [64, 32], strides = [1, 1]} : vector<64x128xf32> to vector<64x32xf32>
    %cst = arith.constant dense<0.000000e+00> : vector<64x64xf32>
    %8 = tpu.matmul %6, %7, %cst {dimension_numbers = #tpu.dot_dimension_numbers<[1], [1], [0], [0], [0, 0, 1, 0], [], []>} : vector<64x32xf32>, vector<64x32xf32>, vector<64x64xf32> -> vector<64x64xf32>
    %cst_8 = arith.constant dense<0xFF800000> : vector<64xf32>
    %9 = vector.multi_reduction <maximumf>, %8, %cst_8 [1] : vector<64x64xf32> to vector<64xf32>
    %10 = vector.shape_cast %9 : vector<64xf32> to vector<64x1xf32>
    %11 = vector.broadcast %10 : vector<64x1xf32> to vector<64x64xf32>
    %12 = arith.subf %8, %11 : vector<64x64xf32>
    %13 = math.exp %12 : vector<64x64xf32>
    %cst_9 = arith.constant dense<0.000000e+00> : vector<64xf32>
    %14 = vector.multi_reduction <add>, %13, %cst_9 [1] : vector<64x64xf32> to vector<64xf32>
    %15 = vector.shape_cast %14 : vector<64xf32> to vector<64x1xf32>
    %16 = vector.extract_strided_slice %5 {offsets = [0, 0], sizes = [64, 32], strides = [1, 1]} : vector<64x128xf32> to vector<64x32xf32>
    %cst_10 = arith.constant dense<0.000000e+00> : vector<64x32xf32>
    %17 = tpu.matmul %13, %16, %cst_10 {dimension_numbers = #tpu.dot_dimension_numbers<[1], [0], [0], [1], [0, 0, 1, 1], [], []>} : vector<64x64xf32>, vector<64x32xf32>, vector<64x32xf32> -> vector<64x32xf32>
    %18 = tpu.reciprocal %15 {approx = true} : vector<64x1xf32> -> vector<64x1xf32>
    %19 = vector.broadcast %18 : vector<64x1xf32> to vector<64x32xf32>
    %20 = arith.mulf %17, %19 : vector<64x32xf32>
    %21 = vector.extract_strided_slice %1 {offsets = [0, 32], sizes = [64, 32], strides = [1, 1]} : vector<64x128xf32> to vector<64x32xf32>
    %22 = vector.extract_strided_slice %3 {offsets = [0, 32], sizes = [64, 32], strides = [1, 1]} : vector<64x128xf32> to vector<64x32xf32>
    %cst_11 = arith.constant dense<0.000000e+00> : vector<64x64xf32>
    %23 = tpu.matmul %21, %22, %cst_11 {dimension_numbers = #tpu.dot_dimension_numbers<[1], [1], [0], [0], [0, 0, 1, 0], [], []>} : vector<64x32xf32>, vector<64x32xf32>, vector<64x64xf32> -> vector<64x64xf32>
    %cst_12 = arith.constant dense<0xFF800000> : vector<64xf32>
    %24 = vector.multi_reduction <maximumf>, %23, %cst_12 [1] : vector<64x64xf32> to vector<64xf32>
    %25 = vector.shape_cast %24 : vector<64xf32> to vector<64x1xf32>
    %26 = vector.broadcast %25 : vector<64x1xf32> to vector<64x64xf32>
    %27 = arith.subf %23, %26 : vector<64x64xf32>
    %28 = math.exp %27 : vector<64x64xf32>
    %cst_13 = arith.constant dense<0.000000e+00> : vector<64xf32>
    %29 = vector.multi_reduction <add>, %28, %cst_13 [1] : vector<64x64xf32> to vector<64xf32>
    %30 = vector.shape_cast %29 : vector<64xf32> to vector<64x1xf32>
    %31 = vector.extract_strided_slice %5 {offsets = [0, 32], sizes = [64, 32], strides = [1, 1]} : vector<64x128xf32> to vector<64x32xf32>
    %cst_14 = arith.constant dense<0.000000e+00> : vector<64x32xf32>
    %32 = tpu.matmul %28, %31, %cst_14 {dimension_numbers = #tpu.dot_dimension_numbers<[1], [0], [0], [1], [0, 0, 1, 1], [], []>} : vector<64x64xf32>, vector<64x32xf32>, vector<64x32xf32> -> vector<64x32xf32>
    %33 = tpu.reciprocal %30 {approx = true} : vector<64x1xf32> -> vector<64x1xf32>
    %34 = vector.broadcast %33 : vector<64x1xf32> to vector<64x32xf32>
    %35 = arith.mulf %32, %34 : vector<64x32xf32>
    %36 = vector.extract_strided_slice %1 {offsets = [0, 64], sizes = [64, 32], strides = [1, 1]} : vector<64x128xf32> to vector<64x32xf32>
    %37 = vector.extract_strided_slice %3 {offsets = [0, 64], sizes = [64, 32], strides = [1, 1]} : vector<64x128xf32> to vector<64x32xf32>
    %cst_15 = arith.constant dense<0.000000e+00> : vector<64x64xf32>
    %38 = tpu.matmul %36, %37, %cst_15 {dimension_numbers = #tpu.dot_dimension_numbers<[1], [1], [0], [0], [0, 0, 1, 0], [], []>} : vector<64x32xf32>, vector<64x32xf32>, vector<64x64xf32> -> vector<64x64xf32>
    %cst_16 = arith.constant dense<0xFF800000> : vector<64xf32>
    %39 = vector.multi_reduction <maximumf>, %38, %cst_16 [1] : vector<64x64xf32> to vector<64xf32>
    %40 = vector.shape_cast %39 : vector<64xf32> to vector<64x1xf32>
    %41 = vector.broadcast %40 : vector<64x1xf32> to vector<64x64xf32>
    %42 = arith.subf %38, %41 : vector<64x64xf32>
    %43 = math.exp %42 : vector<64x64xf32>
    %cst_17 = arith.constant dense<0.000000e+00> : vector<64xf32>
    %44 = vector.multi_reduction <add>, %43, %cst_17 [1] : vector<64x64xf32> to vector<64xf32>
    %45 = vector.shape_cast %44 : vector<64xf32> to vector<64x1xf32>
    %46 = vector.extract_strided_slice %5 {offsets = [0, 64], sizes = [64, 32], strides = [1, 1]} : vector<64x128xf32> to vector<64x32xf32>
    %cst_18 = arith.constant dense<0.000000e+00> : vector<64x32xf32>
    %47 = tpu.matmul %43, %46, %cst_18 {dimension_numbers = #tpu.dot_dimension_numbers<[1], [0], [0], [1], [0, 0, 1, 1], [], []>} : vector<64x64xf32>, vector<64x32xf32>, vector<64x32xf32> -> vector<64x32xf32>
    %48 = tpu.reciprocal %45 {approx = true} : vector<64x1xf32> -> vector<64x1xf32>
    %49 = vector.broadcast %48 : vector<64x1xf32> to vector<64x32xf32>
    %50 = arith.mulf %47, %49 : vector<64x32xf32>
    %51 = vector.extract_strided_slice %1 {offsets = [0, 96], sizes = [64, 32], strides = [1, 1]} : vector<64x128xf32> to vector<64x32xf32>
    %52 = vector.extract_strided_slice %3 {offsets = [0, 96], sizes = [64, 32], strides = [1, 1]} : vector<64x128xf32> to vector<64x32xf32>
    %cst_19 = arith.constant dense<0.000000e+00> : vector<64x64xf32>
    %53 = tpu.matmul %51, %52, %cst_19 {dimension_numbers = #tpu.dot_dimension_numbers<[1], [1], [0], [0], [0, 0, 1, 0], [], []>} : vector<64x32xf32>, vector<64x32xf32>, vector<64x64xf32> -> vector<64x64xf32>
    %cst_20 = arith.constant dense<0xFF800000> : vector<64xf32>
    %54 = vector.multi_reduction <maximumf>, %53, %cst_20 [1] : vector<64x64xf32> to vector<64xf32>
    %55 = vector.shape_cast %54 : vector<64xf32> to vector<64x1xf32>
    %56 = vector.broadcast %55 : vector<64x1xf32> to vector<64x64xf32>
    %57 = arith.subf %53, %56 : vector<64x64xf32>
    %58 = math.exp %57 : vector<64x64xf32>
    %cst_21 = arith.constant dense<0.000000e+00> : vector<64xf32>
    %59 = vector.multi_reduction <add>, %58, %cst_21 [1] : vector<64x64xf32> to vector<64xf32>
    %60 = vector.shape_cast %59 : vector<64xf32> to vector<64x1xf32>
    %61 = vector.extract_strided_slice %5 {offsets = [0, 96], sizes = [64, 32], strides = [1, 1]} : vector<64x128xf32> to vector<64x32xf32>
    %cst_22 = arith.constant dense<0.000000e+00> : vector<64x32xf32>
    %62 = tpu.matmul %58, %61, %cst_22 {dimension_numbers = #tpu.dot_dimension_numbers<[1], [0], [0], [1], [0, 0, 1, 1], [], []>} : vector<64x64xf32>, vector<64x32xf32>, vector<64x32xf32> -> vector<64x32xf32>
    %63 = tpu.reciprocal %60 {approx = true} : vector<64x1xf32> -> vector<64x1xf32>
    %64 = vector.broadcast %63 : vector<64x1xf32> to vector<64x32xf32>
    %65 = arith.mulf %62, %64 : vector<64x32xf32>
    %66 = tpu.concatenate %20, %35, %50, %65 in 1 : vector<64x32xf32>, vector<64x32xf32>, vector<64x32xf32>, vector<64x32xf32> -> vector<64x128xf32>
    %c0_23 = arith.constant 0 : index
    %c0_24 = arith.constant 0 : index
    %c0_25 = arith.constant 0 : index
    %67 = vector.load %arg4[%c0_23, %c0_24, %c0_25] : memref<1x64x128xf32, #tpu.memory_space<vmem>>, vector<1x64x128xf32>
    %68 = vector.shape_cast %67 : vector<1x64x128xf32> to vector<64x128xf32>
    %69 = vector.shape_cast %66 : vector<64x128xf32> to vector<1x64x128xf32>
    tpu.vector_store %arg4[%c0_23, %c0_24, %c0_25], %69 {strides = array<i32>} : memref<1x64x128xf32, #tpu.memory_space<vmem>>, vector<1x64x128xf32>,
    return
  }
  func.func @transform_0(%arg0: i32) -> (i32, i32, i32) {
    %c0_i32 = arith.constant 0 : i32
    %c0_i32_0 = arith.constant 0 : i32
    %c0_i32_1 = arith.constant 0 : i32
    return %arg0, %c0_i32, %c0_i32_0 : i32, i32, i32
  }
  func.func @transform_1(%arg0: i32) -> (i32, i32, i32) {
    %c0_i32 = arith.constant 0 : i32
    %c0_i32_0 = arith.constant 0 : i32
    %c0_i32_1 = arith.constant 0 : i32
    return %arg0, %c0_i32, %c0_i32_0 : i32, i32, i32
  }
  func.func @transform_2(%arg0: i32) -> (i32, i32, i32) {
    %c0_i32 = arith.constant 0 : i32
    %c0_i32_0 = arith.constant 0 : i32
    %c0_i32_1 = arith.constant 0 : i32
    return %arg0, %c0_i32, %c0_i32_0 : i32, i32, i32
  }
  func.func @transform_3(%arg0: i32) -> (i32, i32, i32) {
    %c0_i32 = arith.constant 0 : i32
    %c0_i32_0 = arith.constant 0 : i32
    %c0_i32_1 = arith.constant 0 : i32
    return %arg0, %c0_i32, %c0_i32_0 : i32, i32, i32
  }
}

module attributes {stable_mosaic.version = 11 : i64} {
  func.func @_posproj_kernel(%arg0: i32, %arg1: memref<64x128xf32, #tpu.memory_space<vmem>>, %arg2: memref<64x128xf32, #tpu.memory_space<vmem>>, %arg3: memref<128x256xf32, #tpu.memory_space<vmem>>, %arg4: memref<1x256xf32, #tpu.memory_space<vmem>>, %arg5: memref<128x128xf32, #tpu.memory_space<vmem>>, %arg6: memref<1x128xf32, #tpu.memory_space<vmem>>, %arg7: memref<64x128xf32, #tpu.memory_space<vmem>>, %arg8: memref<64x128xf32, #tpu.memory_space<vmem>>, %arg9: memref<64x128xf32, #tpu.memory_space<vmem>>) attributes {dimension_semantics = [#tpu.dimension_semantics<parallel>], iteration_bounds = array<i64: 2>, scalar_prefetch = 0 : i64, scratch_operands = 0 : i64, tpu.core_type = #tpu.core_type<tc>, window_params = [{transform_indices = @transform_0, window_bounds = array<i64: 64, 128>}, {transform_indices = @transform_1, window_bounds = array<i64: 64, 128>}, {pipeline_mode = #tpu.pipeline_mode<synchronous>, transform_indices = @transform_2, window_bounds = array<i64: 128, 256>}, {pipeline_mode = #tpu.pipeline_mode<synchronous>, transform_indices = @transform_3, window_bounds = array<i64: 1, 256>}, {pipeline_mode = #tpu.pipeline_mode<synchronous>, transform_indices = @transform_4, window_bounds = array<i64: 128, 128>}, {pipeline_mode = #tpu.pipeline_mode<synchronous>, transform_indices = @transform_5, window_bounds = array<i64: 1, 128>}, {transform_indices = @transform_6, window_bounds = array<i64: 64, 128>}, {transform_indices = @transform_7, window_bounds = array<i64: 64, 128>}, {transform_indices = @transform_8, window_bounds = array<i64: 64, 128>}]} {
    %c0 = arith.constant 0 : index
    %c0_0 = arith.constant 0 : index
    %0 = vector.load %arg1[%c0, %c0_0] : memref<64x128xf32, #tpu.memory_space<vmem>>, vector<64x128xf32>
    %c0_1 = arith.constant 0 : index
    %c0_2 = arith.constant 0 : index
    %1 = vector.load %arg2[%c0_1, %c0_2] : memref<64x128xf32, #tpu.memory_space<vmem>>, vector<64x128xf32>
    %2 = arith.addf %0, %1 : vector<64x128xf32>
    %c0_3 = arith.constant 0 : index
    %c0_4 = arith.constant 0 : index
    %3 = vector.load %arg3[%c0_3, %c0_4] : memref<128x256xf32, #tpu.memory_space<vmem>>, vector<128x256xf32>
    %cst = arith.constant dense<0.000000e+00> : vector<64x256xf32>
    %4 = tpu.matmul %2, %3, %cst {dimension_numbers = #tpu.dot_dimension_numbers<[1], [0], [0], [1], [0, 0, 1, 1], [], []>} : vector<64x128xf32>, vector<128x256xf32>, vector<64x256xf32> -> vector<64x256xf32>
    %c0_5 = arith.constant 0 : index
    %c0_6 = arith.constant 0 : index
    %5 = vector.load %arg4[%c0_5, %c0_6] : memref<1x256xf32, #tpu.memory_space<vmem>>, vector<1x256xf32>
    %6 = vector.broadcast %5 : vector<1x256xf32> to vector<64x256xf32>
    %7 = arith.addf %4, %6 : vector<64x256xf32>
    %c0_7 = arith.constant 0 : index
    %c0_8 = arith.constant 0 : index
    %8 = vector.load %arg1[%c0_7, %c0_8] : memref<64x128xf32, #tpu.memory_space<vmem>>, vector<64x128xf32>
    %c0_9 = arith.constant 0 : index
    %c0_10 = arith.constant 0 : index
    %9 = vector.load %arg5[%c0_9, %c0_10] : memref<128x128xf32, #tpu.memory_space<vmem>>, vector<128x128xf32>
    %cst_11 = arith.constant dense<0.000000e+00> : vector<64x128xf32>
    %10 = tpu.matmul %8, %9, %cst_11 {dimension_numbers = #tpu.dot_dimension_numbers<[1], [0], [0], [1], [0, 0, 1, 1], [], []>} : vector<64x128xf32>, vector<128x128xf32>, vector<64x128xf32> -> vector<64x128xf32>
    %c0_12 = arith.constant 0 : index
    %c0_13 = arith.constant 0 : index
    %11 = vector.load %arg6[%c0_12, %c0_13] : memref<1x128xf32, #tpu.memory_space<vmem>>, vector<1x128xf32>
    %12 = vector.broadcast %11 : vector<1x128xf32> to vector<64x128xf32>
    %13 = arith.addf %10, %12 : vector<64x128xf32>
    %14 = vector.extract_strided_slice %7 {offsets = [0, 0], sizes = [64, 128], strides = [1, 1]} : vector<64x256xf32> to vector<64x128xf32>
    %c0_14 = arith.constant 0 : index
    %c0_15 = arith.constant 0 : index
    %15 = vector.load %arg7[%c0_14, %c0_15] : memref<64x128xf32, #tpu.memory_space<vmem>>, vector<64x128xf32>
    tpu.vector_store %arg7[%c0_14, %c0_15], %14 {strides = array<i32>} : memref<64x128xf32, #tpu.memory_space<vmem>>, vector<64x128xf32>,
    %16 = vector.extract_strided_slice %7 {offsets = [0, 128], sizes = [64, 128], strides = [1, 1]} : vector<64x256xf32> to vector<64x128xf32>
    %c0_16 = arith.constant 0 : index
    %c0_17 = arith.constant 0 : index
    %17 = vector.load %arg8[%c0_16, %c0_17] : memref<64x128xf32, #tpu.memory_space<vmem>>, vector<64x128xf32>
    tpu.vector_store %arg8[%c0_16, %c0_17], %16 {strides = array<i32>} : memref<64x128xf32, #tpu.memory_space<vmem>>, vector<64x128xf32>,
    %c0_18 = arith.constant 0 : index
    %c0_19 = arith.constant 0 : index
    %18 = vector.load %arg9[%c0_18, %c0_19] : memref<64x128xf32, #tpu.memory_space<vmem>>, vector<64x128xf32>
    tpu.vector_store %arg9[%c0_18, %c0_19], %13 {strides = array<i32>} : memref<64x128xf32, #tpu.memory_space<vmem>>, vector<64x128xf32>,
    return
  }
  func.func @transform_0(%arg0: i32) -> (i32, i32) {
    %c0_i32 = arith.constant 0 : i32
    %c0_i32_0 = arith.constant 0 : i32
    return %arg0, %c0_i32 : i32, i32
  }
  func.func @transform_1(%arg0: i32) -> (i32, i32) {
    %c0_i32 = arith.constant 0 : i32
    %c0_i32_0 = arith.constant 0 : i32
    return %arg0, %c0_i32 : i32, i32
  }
  func.func @transform_2(%arg0: i32) -> (i32, i32) {
    %c0_i32 = arith.constant 0 : i32
    %c0_i32_0 = arith.constant 0 : i32
    %c0_i32_1 = arith.constant 0 : i32
    return %c0_i32, %c0_i32_0 : i32, i32
  }
  func.func @transform_3(%arg0: i32) -> (i32, i32) {
    %c0_i32 = arith.constant 0 : i32
    %c0_i32_0 = arith.constant 0 : i32
    %c0_i32_1 = arith.constant 0 : i32
    return %c0_i32, %c0_i32_0 : i32, i32
  }
  func.func @transform_4(%arg0: i32) -> (i32, i32) {
    %c0_i32 = arith.constant 0 : i32
    %c0_i32_0 = arith.constant 0 : i32
    %c0_i32_1 = arith.constant 0 : i32
    return %c0_i32, %c0_i32_0 : i32, i32
  }
  func.func @transform_5(%arg0: i32) -> (i32, i32) {
    %c0_i32 = arith.constant 0 : i32
    %c0_i32_0 = arith.constant 0 : i32
    %c0_i32_1 = arith.constant 0 : i32
    return %c0_i32, %c0_i32_0 : i32, i32
  }
  func.func @transform_6(%arg0: i32) -> (i32, i32) {
    %c0_i32 = arith.constant 0 : i32
    %c0_i32_0 = arith.constant 0 : i32
    return %arg0, %c0_i32 : i32, i32
  }
  func.func @transform_7(%arg0: i32) -> (i32, i32) {
    %c0_i32 = arith.constant 0 : i32
    %c0_i32_0 = arith.constant 0 : i32
    return %arg0, %c0_i32 : i32, i32
  }
  func.func @transform_8(%arg0: i32) -> (i32, i32) {
    %c0_i32 = arith.constant 0 : i32
    %c0_i32_0 = arith.constant 0 : i32
    return %arg0, %c0_i32 : i32, i32
  }
}

module attributes {stable_mosaic.version = 11 : i64} {
  func.func @_proj_add_ln_kernel(%arg0: i32, %arg1: memref<64x128xf32, #tpu.memory_space<vmem>>, %arg2: memref<64x128xf32, #tpu.memory_space<vmem>>, %arg3: memref<128x128xf32, #tpu.memory_space<vmem>>, %arg4: memref<1x128xf32, #tpu.memory_space<vmem>>, %arg5: memref<1x128xf32, #tpu.memory_space<vmem>>, %arg6: memref<1x128xf32, #tpu.memory_space<vmem>>, %arg7: memref<64x128xf32, #tpu.memory_space<vmem>>) attributes {dimension_semantics = [#tpu.dimension_semantics<parallel>], iteration_bounds = array<i64: 2>, scalar_prefetch = 0 : i64, scratch_operands = 0 : i64, tpu.core_type = #tpu.core_type<tc>, window_params = [{transform_indices = @transform_0, window_bounds = array<i64: 64, 128>}, {transform_indices = @transform_1, window_bounds = array<i64: 64, 128>}, {pipeline_mode = #tpu.pipeline_mode<synchronous>, transform_indices = @transform_2, window_bounds = array<i64: 128, 128>}, {pipeline_mode = #tpu.pipeline_mode<synchronous>, transform_indices = @transform_3, window_bounds = array<i64: 1, 128>}, {pipeline_mode = #tpu.pipeline_mode<synchronous>, transform_indices = @transform_4, window_bounds = array<i64: 1, 128>}, {pipeline_mode = #tpu.pipeline_mode<synchronous>, transform_indices = @transform_5, window_bounds = array<i64: 1, 128>}, {transform_indices = @transform_6, window_bounds = array<i64: 64, 128>}]} {
    %c0 = arith.constant 0 : index
    %c0_0 = arith.constant 0 : index
    %0 = vector.load %arg1[%c0, %c0_0] : memref<64x128xf32, #tpu.memory_space<vmem>>, vector<64x128xf32>
    %c0_1 = arith.constant 0 : index
    %c0_2 = arith.constant 0 : index
    %1 = vector.load %arg3[%c0_1, %c0_2] : memref<128x128xf32, #tpu.memory_space<vmem>>, vector<128x128xf32>
    %cst = arith.constant dense<0.000000e+00> : vector<64x128xf32>
    %2 = tpu.matmul %0, %1, %cst {dimension_numbers = #tpu.dot_dimension_numbers<[1], [0], [0], [1], [0, 0, 1, 1], [], []>} : vector<64x128xf32>, vector<128x128xf32>, vector<64x128xf32> -> vector<64x128xf32>
    %c0_3 = arith.constant 0 : index
    %c0_4 = arith.constant 0 : index
    %3 = vector.load %arg4[%c0_3, %c0_4] : memref<1x128xf32, #tpu.memory_space<vmem>>, vector<1x128xf32>
    %4 = vector.broadcast %3 : vector<1x128xf32> to vector<64x128xf32>
    %5 = arith.addf %2, %4 : vector<64x128xf32>
    %c0_5 = arith.constant 0 : index
    %c0_6 = arith.constant 0 : index
    %6 = vector.load %arg2[%c0_5, %c0_6] : memref<64x128xf32, #tpu.memory_space<vmem>>, vector<64x128xf32>
    %7 = arith.addf %5, %6 : vector<64x128xf32>
    %cst_7 = arith.constant dense<0.000000e+00> : vector<64xf32>
    %8 = vector.multi_reduction <add>, %7, %cst_7 [1] : vector<64x128xf32> to vector<64xf32>
    %9 = vector.shape_cast %8 : vector<64xf32> to vector<64x1xf32>
    %cst_8 = arith.constant 1.280000e+02 : f32
    %10 = vector.broadcast %cst_8 : f32 to vector<64x1xf32>
    %11 = arith.divf %9, %10 : vector<64x1xf32>
    %12 = vector.broadcast %11 : vector<64x1xf32> to vector<64x128xf32>
    %13 = arith.subf %7, %12 : vector<64x128xf32>
    %14 = arith.mulf %13, %13 : vector<64x128xf32>
    %cst_9 = arith.constant dense<0.000000e+00> : vector<64xf32>
    %15 = vector.multi_reduction <add>, %14, %cst_9 [1] : vector<64x128xf32> to vector<64xf32>
    %16 = vector.shape_cast %15 : vector<64xf32> to vector<64x1xf32>
    %cst_10 = arith.constant 1.280000e+02 : f32
    %17 = vector.broadcast %cst_10 : f32 to vector<64x1xf32>
    %18 = arith.divf %16, %17 : vector<64x1xf32>
    %cst_11 = arith.constant 9.99999974E-6 : f32
    %19 = vector.broadcast %cst_11 : f32 to vector<64x1xf32>
    %20 = arith.addf %18, %19 : vector<64x1xf32>
    %21 = math.rsqrt %20 : vector<64x1xf32>
    %22 = vector.broadcast %21 : vector<64x1xf32> to vector<64x128xf32>
    %23 = arith.mulf %13, %22 : vector<64x128xf32>
    %c0_12 = arith.constant 0 : index
    %c0_13 = arith.constant 0 : index
    %24 = vector.load %arg5[%c0_12, %c0_13] : memref<1x128xf32, #tpu.memory_space<vmem>>, vector<1x128xf32>
    %25 = vector.broadcast %24 : vector<1x128xf32> to vector<64x128xf32>
    %26 = arith.mulf %23, %25 : vector<64x128xf32>
    %c0_14 = arith.constant 0 : index
    %c0_15 = arith.constant 0 : index
    %27 = vector.load %arg6[%c0_14, %c0_15] : memref<1x128xf32, #tpu.memory_space<vmem>>, vector<1x128xf32>
    %28 = vector.broadcast %27 : vector<1x128xf32> to vector<64x128xf32>
    %29 = arith.addf %26, %28 : vector<64x128xf32>
    %c0_16 = arith.constant 0 : index
    %c0_17 = arith.constant 0 : index
    %30 = vector.load %arg7[%c0_16, %c0_17] : memref<64x128xf32, #tpu.memory_space<vmem>>, vector<64x128xf32>
    tpu.vector_store %arg7[%c0_16, %c0_17], %29 {strides = array<i32>} : memref<64x128xf32, #tpu.memory_space<vmem>>, vector<64x128xf32>,
    return
  }
  func.func @transform_0(%arg0: i32) -> (i32, i32) {
    %c0_i32 = arith.constant 0 : i32
    %c0_i32_0 = arith.constant 0 : i32
    return %arg0, %c0_i32 : i32, i32
  }
  func.func @transform_1(%arg0: i32) -> (i32, i32) {
    %c0_i32 = arith.constant 0 : i32
    %c0_i32_0 = arith.constant 0 : i32
    return %arg0, %c0_i32 : i32, i32
  }
  func.func @transform_2(%arg0: i32) -> (i32, i32) {
    %c0_i32 = arith.constant 0 : i32
    %c0_i32_0 = arith.constant 0 : i32
    %c0_i32_1 = arith.constant 0 : i32
    return %c0_i32, %c0_i32_0 : i32, i32
  }
  func.func @transform_3(%arg0: i32) -> (i32, i32) {
    %c0_i32 = arith.constant 0 : i32
    %c0_i32_0 = arith.constant 0 : i32
    %c0_i32_1 = arith.constant 0 : i32
    return %c0_i32, %c0_i32_0 : i32, i32
  }
  func.func @transform_4(%arg0: i32) -> (i32, i32) {
    %c0_i32 = arith.constant 0 : i32
    %c0_i32_0 = arith.constant 0 : i32
    %c0_i32_1 = arith.constant 0 : i32
    return %c0_i32, %c0_i32_0 : i32, i32
  }
  func.func @transform_5(%arg0: i32) -> (i32, i32) {
    %c0_i32 = arith.constant 0 : i32
    %c0_i32_0 = arith.constant 0 : i32
    %c0_i32_1 = arith.constant 0 : i32
    return %c0_i32, %c0_i32_0 : i32, i32
  }
  func.func @transform_6(%arg0: i32) -> (i32, i32) {
    %c0_i32 = arith.constant 0 : i32
    %c0_i32_0 = arith.constant 0 : i32
    return %arg0, %c0_i32 : i32, i32
  }
}

module attributes {stable_mosaic.version = 11 : i64} {
  func.func @_linear_add_kernel(%arg0: i32, %arg1: memref<64x128xf32, #tpu.memory_space<vmem>>, %arg2: memref<64x128xf32, #tpu.memory_space<vmem>>, %arg3: memref<128x128xf32, #tpu.memory_space<vmem>>, %arg4: memref<1x128xf32, #tpu.memory_space<vmem>>, %arg5: memref<64x128xf32, #tpu.memory_space<vmem>>) attributes {dimension_semantics = [#tpu.dimension_semantics<parallel>], iteration_bounds = array<i64: 2>, scalar_prefetch = 0 : i64, scratch_operands = 0 : i64, tpu.core_type = #tpu.core_type<tc>, window_params = [{transform_indices = @transform_0, window_bounds = array<i64: 64, 128>}, {transform_indices = @transform_1, window_bounds = array<i64: 64, 128>}, {pipeline_mode = #tpu.pipeline_mode<synchronous>, transform_indices = @transform_2, window_bounds = array<i64: 128, 128>}, {pipeline_mode = #tpu.pipeline_mode<synchronous>, transform_indices = @transform_3, window_bounds = array<i64: 1, 128>}, {transform_indices = @transform_4, window_bounds = array<i64: 64, 128>}]} {
    %c0 = arith.constant 0 : index
    %c0_0 = arith.constant 0 : index
    %0 = vector.load %arg1[%c0, %c0_0] : memref<64x128xf32, #tpu.memory_space<vmem>>, vector<64x128xf32>
    %c0_1 = arith.constant 0 : index
    %c0_2 = arith.constant 0 : index
    %1 = vector.load %arg2[%c0_1, %c0_2] : memref<64x128xf32, #tpu.memory_space<vmem>>, vector<64x128xf32>
    %2 = arith.addf %0, %1 : vector<64x128xf32>
    %c0_3 = arith.constant 0 : index
    %c0_4 = arith.constant 0 : index
    %3 = vector.load %arg3[%c0_3, %c0_4] : memref<128x128xf32, #tpu.memory_space<vmem>>, vector<128x128xf32>
    %cst = arith.constant dense<0.000000e+00> : vector<64x128xf32>
    %4 = tpu.matmul %2, %3, %cst {dimension_numbers = #tpu.dot_dimension_numbers<[1], [0], [0], [1], [0, 0, 1, 1], [], []>} : vector<64x128xf32>, vector<128x128xf32>, vector<64x128xf32> -> vector<64x128xf32>
    %c0_5 = arith.constant 0 : index
    %c0_6 = arith.constant 0 : index
    %5 = vector.load %arg4[%c0_5, %c0_6] : memref<1x128xf32, #tpu.memory_space<vmem>>, vector<1x128xf32>
    %6 = vector.broadcast %5 : vector<1x128xf32> to vector<64x128xf32>
    %7 = arith.addf %4, %6 : vector<64x128xf32>
    %c0_7 = arith.constant 0 : index
    %c0_8 = arith.constant 0 : index
    %8 = vector.load %arg5[%c0_7, %c0_8] : memref<64x128xf32, #tpu.memory_space<vmem>>, vector<64x128xf32>
    tpu.vector_store %arg5[%c0_7, %c0_8], %7 {strides = array<i32>} : memref<64x128xf32, #tpu.memory_space<vmem>>, vector<64x128xf32>,
    return
  }
  func.func @transform_0(%arg0: i32) -> (i32, i32) {
    %c0_i32 = arith.constant 0 : i32
    %c0_i32_0 = arith.constant 0 : i32
    return %arg0, %c0_i32 : i32, i32
  }
  func.func @transform_1(%arg0: i32) -> (i32, i32) {
    %c0_i32 = arith.constant 0 : i32
    %c0_i32_0 = arith.constant 0 : i32
    return %arg0, %c0_i32 : i32, i32
  }
  func.func @transform_2(%arg0: i32) -> (i32, i32) {
    %c0_i32 = arith.constant 0 : i32
    %c0_i32_0 = arith.constant 0 : i32
    %c0_i32_1 = arith.constant 0 : i32
    return %c0_i32, %c0_i32_0 : i32, i32
  }
  func.func @transform_3(%arg0: i32) -> (i32, i32) {
    %c0_i32 = arith.constant 0 : i32
    %c0_i32_0 = arith.constant 0 : i32
    %c0_i32_1 = arith.constant 0 : i32
    return %c0_i32, %c0_i32_0 : i32, i32
  }
  func.func @transform_4(%arg0: i32) -> (i32, i32) {
    %c0_i32 = arith.constant 0 : i32
    %c0_i32_0 = arith.constant 0 : i32
    return %arg0, %c0_i32 : i32, i32
  }
}

module attributes {stable_mosaic.version = 11 : i64} {
  func.func @_linear_kernel(%arg0: i32, %arg1: memref<64x256xf32, #tpu.memory_space<vmem>>, %arg2: memref<256x128xf32, #tpu.memory_space<vmem>>, %arg3: memref<1x128xf32, #tpu.memory_space<vmem>>, %arg4: memref<64x128xf32, #tpu.memory_space<vmem>>) attributes {dimension_semantics = [#tpu.dimension_semantics<parallel>], iteration_bounds = array<i64: 2>, scalar_prefetch = 0 : i64, scratch_operands = 0 : i64, tpu.core_type = #tpu.core_type<tc>, window_params = [{transform_indices = @transform_0, window_bounds = array<i64: 64, 256>}, {pipeline_mode = #tpu.pipeline_mode<synchronous>, transform_indices = @transform_1, window_bounds = array<i64: 256, 128>}, {pipeline_mode = #tpu.pipeline_mode<synchronous>, transform_indices = @transform_2, window_bounds = array<i64: 1, 128>}, {transform_indices = @transform_3, window_bounds = array<i64: 64, 128>}]} {
    %c0 = arith.constant 0 : index
    %c0_0 = arith.constant 0 : index
    %0 = vector.load %arg1[%c0, %c0_0] : memref<64x256xf32, #tpu.memory_space<vmem>>, vector<64x256xf32>
    %c0_1 = arith.constant 0 : index
    %c0_2 = arith.constant 0 : index
    %1 = vector.load %arg2[%c0_1, %c0_2] : memref<256x128xf32, #tpu.memory_space<vmem>>, vector<256x128xf32>
    %cst = arith.constant dense<0.000000e+00> : vector<64x128xf32>
    %2 = tpu.matmul %0, %1, %cst {dimension_numbers = #tpu.dot_dimension_numbers<[1], [0], [0], [1], [0, 0, 1, 1], [], []>} : vector<64x256xf32>, vector<256x128xf32>, vector<64x128xf32> -> vector<64x128xf32>
    %c0_3 = arith.constant 0 : index
    %c0_4 = arith.constant 0 : index
    %3 = vector.load %arg3[%c0_3, %c0_4] : memref<1x128xf32, #tpu.memory_space<vmem>>, vector<1x128xf32>
    %4 = vector.broadcast %3 : vector<1x128xf32> to vector<64x128xf32>
    %5 = arith.addf %2, %4 : vector<64x128xf32>
    %c0_5 = arith.constant 0 : index
    %c0_6 = arith.constant 0 : index
    %6 = vector.load %arg4[%c0_5, %c0_6] : memref<64x128xf32, #tpu.memory_space<vmem>>, vector<64x128xf32>
    tpu.vector_store %arg4[%c0_5, %c0_6], %5 {strides = array<i32>} : memref<64x128xf32, #tpu.memory_space<vmem>>, vector<64x128xf32>,
    return
  }
  func.func @transform_0(%arg0: i32) -> (i32, i32) {
    %c0_i32 = arith.constant 0 : i32
    %c0_i32_0 = arith.constant 0 : i32
    return %arg0, %c0_i32 : i32, i32
  }
  func.func @transform_1(%arg0: i32) -> (i32, i32) {
    %c0_i32 = arith.constant 0 : i32
    %c0_i32_0 = arith.constant 0 : i32
    %c0_i32_1 = arith.constant 0 : i32
    return %c0_i32, %c0_i32_0 : i32, i32
  }
  func.func @transform_2(%arg0: i32) -> (i32, i32) {
    %c0_i32 = arith.constant 0 : i32
    %c0_i32_0 = arith.constant 0 : i32
    %c0_i32_1 = arith.constant 0 : i32
    return %c0_i32, %c0_i32_0 : i32, i32
  }
  func.func @transform_3(%arg0: i32) -> (i32, i32) {
    %c0_i32 = arith.constant 0 : i32
    %c0_i32_0 = arith.constant 0 : i32
    return %arg0, %c0_i32 : i32, i32
  }
}

module attributes {stable_mosaic.version = 11 : i64} {
  func.func @_posproj_kernel(%arg0: i32, %arg1: memref<64x128xf32, #tpu.memory_space<vmem>>, %arg2: memref<64x128xf32, #tpu.memory_space<vmem>>, %arg3: memref<128x128xf32, #tpu.memory_space<vmem>>, %arg4: memref<1x128xf32, #tpu.memory_space<vmem>>, %arg5: memref<128x128xf32, #tpu.memory_space<vmem>>, %arg6: memref<1x128xf32, #tpu.memory_space<vmem>>, %arg7: memref<64x128xf32, #tpu.memory_space<vmem>>, %arg8: memref<64x128xf32, #tpu.memory_space<vmem>>) attributes {dimension_semantics = [#tpu.dimension_semantics<parallel>], iteration_bounds = array<i64: 2>, scalar_prefetch = 0 : i64, scratch_operands = 0 : i64, tpu.core_type = #tpu.core_type<tc>, window_params = [{transform_indices = @transform_0, window_bounds = array<i64: 64, 128>}, {transform_indices = @transform_1, window_bounds = array<i64: 64, 128>}, {pipeline_mode = #tpu.pipeline_mode<synchronous>, transform_indices = @transform_2, window_bounds = array<i64: 128, 128>}, {pipeline_mode = #tpu.pipeline_mode<synchronous>, transform_indices = @transform_3, window_bounds = array<i64: 1, 128>}, {pipeline_mode = #tpu.pipeline_mode<synchronous>, transform_indices = @transform_4, window_bounds = array<i64: 128, 128>}, {pipeline_mode = #tpu.pipeline_mode<synchronous>, transform_indices = @transform_5, window_bounds = array<i64: 1, 128>}, {transform_indices = @transform_6, window_bounds = array<i64: 64, 128>}, {transform_indices = @transform_7, window_bounds = array<i64: 64, 128>}]} {
    %c0 = arith.constant 0 : index
    %c0_0 = arith.constant 0 : index
    %0 = vector.load %arg1[%c0, %c0_0] : memref<64x128xf32, #tpu.memory_space<vmem>>, vector<64x128xf32>
    %c0_1 = arith.constant 0 : index
    %c0_2 = arith.constant 0 : index
    %1 = vector.load %arg2[%c0_1, %c0_2] : memref<64x128xf32, #tpu.memory_space<vmem>>, vector<64x128xf32>
    %2 = arith.addf %0, %1 : vector<64x128xf32>
    %c0_3 = arith.constant 0 : index
    %c0_4 = arith.constant 0 : index
    %3 = vector.load %arg3[%c0_3, %c0_4] : memref<128x128xf32, #tpu.memory_space<vmem>>, vector<128x128xf32>
    %cst = arith.constant dense<0.000000e+00> : vector<64x128xf32>
    %4 = tpu.matmul %2, %3, %cst {dimension_numbers = #tpu.dot_dimension_numbers<[1], [0], [0], [1], [0, 0, 1, 1], [], []>} : vector<64x128xf32>, vector<128x128xf32>, vector<64x128xf32> -> vector<64x128xf32>
    %c0_5 = arith.constant 0 : index
    %c0_6 = arith.constant 0 : index
    %5 = vector.load %arg4[%c0_5, %c0_6] : memref<1x128xf32, #tpu.memory_space<vmem>>, vector<1x128xf32>
    %6 = vector.broadcast %5 : vector<1x128xf32> to vector<64x128xf32>
    %7 = arith.addf %4, %6 : vector<64x128xf32>
    %c0_7 = arith.constant 0 : index
    %c0_8 = arith.constant 0 : index
    %8 = vector.load %arg1[%c0_7, %c0_8] : memref<64x128xf32, #tpu.memory_space<vmem>>, vector<64x128xf32>
    %c0_9 = arith.constant 0 : index
    %c0_10 = arith.constant 0 : index
    %9 = vector.load %arg5[%c0_9, %c0_10] : memref<128x128xf32, #tpu.memory_space<vmem>>, vector<128x128xf32>
    %cst_11 = arith.constant dense<0.000000e+00> : vector<64x128xf32>
    %10 = tpu.matmul %8, %9, %cst_11 {dimension_numbers = #tpu.dot_dimension_numbers<[1], [0], [0], [1], [0, 0, 1, 1], [], []>} : vector<64x128xf32>, vector<128x128xf32>, vector<64x128xf32> -> vector<64x128xf32>
    %c0_12 = arith.constant 0 : index
    %c0_13 = arith.constant 0 : index
    %11 = vector.load %arg6[%c0_12, %c0_13] : memref<1x128xf32, #tpu.memory_space<vmem>>, vector<1x128xf32>
    %12 = vector.broadcast %11 : vector<1x128xf32> to vector<64x128xf32>
    %13 = arith.addf %10, %12 : vector<64x128xf32>
    %c0_14 = arith.constant 0 : index
    %c0_15 = arith.constant 0 : index
    %14 = vector.load %arg7[%c0_14, %c0_15] : memref<64x128xf32, #tpu.memory_space<vmem>>, vector<64x128xf32>
    tpu.vector_store %arg7[%c0_14, %c0_15], %7 {strides = array<i32>} : memref<64x128xf32, #tpu.memory_space<vmem>>, vector<64x128xf32>,
    %c0_16 = arith.constant 0 : index
    %c0_17 = arith.constant 0 : index
    %15 = vector.load %arg8[%c0_16, %c0_17] : memref<64x128xf32, #tpu.memory_space<vmem>>, vector<64x128xf32>
    tpu.vector_store %arg8[%c0_16, %c0_17], %13 {strides = array<i32>} : memref<64x128xf32, #tpu.memory_space<vmem>>, vector<64x128xf32>,
    return
  }
  func.func @transform_0(%arg0: i32) -> (i32, i32) {
    %c0_i32 = arith.constant 0 : i32
    %c0_i32_0 = arith.constant 0 : i32
    return %arg0, %c0_i32 : i32, i32
  }
  func.func @transform_1(%arg0: i32) -> (i32, i32) {
    %c0_i32 = arith.constant 0 : i32
    %c0_i32_0 = arith.constant 0 : i32
    return %arg0, %c0_i32 : i32, i32
  }
  func.func @transform_2(%arg0: i32) -> (i32, i32) {
    %c0_i32 = arith.constant 0 : i32
    %c0_i32_0 = arith.constant 0 : i32
    %c0_i32_1 = arith.constant 0 : i32
    return %c0_i32, %c0_i32_0 : i32, i32
  }
  func.func @transform_3(%arg0: i32) -> (i32, i32) {
    %c0_i32 = arith.constant 0 : i32
    %c0_i32_0 = arith.constant 0 : i32
    %c0_i32_1 = arith.constant 0 : i32
    return %c0_i32, %c0_i32_0 : i32, i32
  }
  func.func @transform_4(%arg0: i32) -> (i32, i32) {
    %c0_i32 = arith.constant 0 : i32
    %c0_i32_0 = arith.constant 0 : i32
    %c0_i32_1 = arith.constant 0 : i32
    return %c0_i32, %c0_i32_0 : i32, i32
  }
  func.func @transform_5(%arg0: i32) -> (i32, i32) {
    %c0_i32 = arith.constant 0 : i32
    %c0_i32_0 = arith.constant 0 : i32
    %c0_i32_1 = arith.constant 0 : i32
    return %c0_i32, %c0_i32_0 : i32, i32
  }
  func.func @transform_6(%arg0: i32) -> (i32, i32) {
    %c0_i32 = arith.constant 0 : i32
    %c0_i32_0 = arith.constant 0 : i32
    return %arg0, %c0_i32 : i32, i32
  }
  func.func @transform_7(%arg0: i32) -> (i32, i32) {
    %c0_i32 = arith.constant 0 : i32
    %c0_i32_0 = arith.constant 0 : i32
    return %arg0, %c0_i32 : i32, i32
  }
}

module attributes {stable_mosaic.version = 11 : i64} {
  func.func @_ffn_ln_kernel(%arg0: i32, %arg1: memref<64x128xf32, #tpu.memory_space<vmem>>, %arg2: memref<128x512xf32, #tpu.memory_space<vmem>>, %arg3: memref<1x512xf32, #tpu.memory_space<vmem>>, %arg4: memref<512x128xf32, #tpu.memory_space<vmem>>, %arg5: memref<1x128xf32, #tpu.memory_space<vmem>>, %arg6: memref<1x128xf32, #tpu.memory_space<vmem>>, %arg7: memref<1x128xf32, #tpu.memory_space<vmem>>, %arg8: memref<64x128xf32, #tpu.memory_space<vmem>>) attributes {dimension_semantics = [#tpu.dimension_semantics<parallel>], iteration_bounds = array<i64: 2>, scalar_prefetch = 0 : i64, scratch_operands = 0 : i64, tpu.core_type = #tpu.core_type<tc>, window_params = [{transform_indices = @transform_0, window_bounds = array<i64: 64, 128>}, {pipeline_mode = #tpu.pipeline_mode<synchronous>, transform_indices = @transform_1, window_bounds = array<i64: 128, 512>}, {pipeline_mode = #tpu.pipeline_mode<synchronous>, transform_indices = @transform_2, window_bounds = array<i64: 1, 512>}, {pipeline_mode = #tpu.pipeline_mode<synchronous>, transform_indices = @transform_3, window_bounds = array<i64: 512, 128>}, {pipeline_mode = #tpu.pipeline_mode<synchronous>, transform_indices = @transform_4, window_bounds = array<i64: 1, 128>}, {pipeline_mode = #tpu.pipeline_mode<synchronous>, transform_indices = @transform_5, window_bounds = array<i64: 1, 128>}, {pipeline_mode = #tpu.pipeline_mode<synchronous>, transform_indices = @transform_6, window_bounds = array<i64: 1, 128>}, {transform_indices = @transform_7, window_bounds = array<i64: 64, 128>}]} {
    %c0 = arith.constant 0 : index
    %c0_0 = arith.constant 0 : index
    %0 = vector.load %arg1[%c0, %c0_0] : memref<64x128xf32, #tpu.memory_space<vmem>>, vector<64x128xf32>
    %c0_1 = arith.constant 0 : index
    %c0_2 = arith.constant 0 : index
    %1 = vector.load %arg2[%c0_1, %c0_2] : memref<128x512xf32, #tpu.memory_space<vmem>>, vector<128x512xf32>
    %cst = arith.constant dense<0.000000e+00> : vector<64x512xf32>
    %2 = tpu.matmul %0, %1, %cst {dimension_numbers = #tpu.dot_dimension_numbers<[1], [0], [0], [1], [0, 0, 1, 1], [], []>} : vector<64x128xf32>, vector<128x512xf32>, vector<64x512xf32> -> vector<64x512xf32>
    %c0_3 = arith.constant 0 : index
    %c0_4 = arith.constant 0 : index
    %3 = vector.load %arg3[%c0_3, %c0_4] : memref<1x512xf32, #tpu.memory_space<vmem>>, vector<1x512xf32>
    %4 = vector.broadcast %3 : vector<1x512xf32> to vector<64x512xf32>
    %5 = arith.addf %2, %4 : vector<64x512xf32>
    %6 = arith.mulf %5, %5 : vector<64x512xf32>
    %7 = arith.mulf %5, %6 : vector<64x512xf32>
    %cst_5 = arith.constant 4.471500e-02 : f32
    %8 = vector.broadcast %cst_5 : f32 to vector<64x512xf32>
    %9 = arith.mulf %8, %7 : vector<64x512xf32>
    %10 = arith.addf %5, %9 : vector<64x512xf32>
    %cst_6 = arith.constant 0.797884583 : f32
    %11 = vector.broadcast %cst_6 : f32 to vector<64x512xf32>
    %12 = arith.mulf %11, %10 : vector<64x512xf32>
    %13 = math.tanh %12 : vector<64x512xf32>
    %cst_7 = arith.constant 1.000000e+00 : f32
    %14 = vector.broadcast %cst_7 : f32 to vector<64x512xf32>
    %15 = arith.addf %14, %13 : vector<64x512xf32>
    %cst_8 = arith.constant 5.000000e-01 : f32
    %16 = vector.broadcast %cst_8 : f32 to vector<64x512xf32>
    %17 = arith.mulf %16, %15 : vector<64x512xf32>
    %18 = arith.mulf %5, %17 : vector<64x512xf32>
    %c0_9 = arith.constant 0 : index
    %c0_10 = arith.constant 0 : index
    %19 = vector.load %arg4[%c0_9, %c0_10] : memref<512x128xf32, #tpu.memory_space<vmem>>, vector<512x128xf32>
    %cst_11 = arith.constant dense<0.000000e+00> : vector<64x128xf32>
    %20 = tpu.matmul %18, %19, %cst_11 {dimension_numbers = #tpu.dot_dimension_numbers<[1], [0], [0], [1], [0, 0, 1, 1], [], []>} : vector<64x512xf32>, vector<512x128xf32>, vector<64x128xf32> -> vector<64x128xf32>
    %c0_12 = arith.constant 0 : index
    %c0_13 = arith.constant 0 : index
    %21 = vector.load %arg5[%c0_12, %c0_13] : memref<1x128xf32, #tpu.memory_space<vmem>>, vector<1x128xf32>
    %22 = vector.broadcast %21 : vector<1x128xf32> to vector<64x128xf32>
    %23 = arith.addf %20, %22 : vector<64x128xf32>
    %24 = arith.addf %23, %0 : vector<64x128xf32>
    %cst_14 = arith.constant dense<0.000000e+00> : vector<64xf32>
    %25 = vector.multi_reduction <add>, %24, %cst_14 [1] : vector<64x128xf32> to vector<64xf32>
    %26 = vector.shape_cast %25 : vector<64xf32> to vector<64x1xf32>
    %cst_15 = arith.constant 1.280000e+02 : f32
    %27 = vector.broadcast %cst_15 : f32 to vector<64x1xf32>
    %28 = arith.divf %26, %27 : vector<64x1xf32>
    %29 = vector.broadcast %28 : vector<64x1xf32> to vector<64x128xf32>
    %30 = arith.subf %24, %29 : vector<64x128xf32>
    %31 = arith.mulf %30, %30 : vector<64x128xf32>
    %cst_16 = arith.constant dense<0.000000e+00> : vector<64xf32>
    %32 = vector.multi_reduction <add>, %31, %cst_16 [1] : vector<64x128xf32> to vector<64xf32>
    %33 = vector.shape_cast %32 : vector<64xf32> to vector<64x1xf32>
    %cst_17 = arith.constant 1.280000e+02 : f32
    %34 = vector.broadcast %cst_17 : f32 to vector<64x1xf32>
    %35 = arith.divf %33, %34 : vector<64x1xf32>
    %cst_18 = arith.constant 9.99999974E-6 : f32
    %36 = vector.broadcast %cst_18 : f32 to vector<64x1xf32>
    %37 = arith.addf %35, %36 : vector<64x1xf32>
    %38 = math.rsqrt %37 : vector<64x1xf32>
    %39 = vector.broadcast %38 : vector<64x1xf32> to vector<64x128xf32>
    %40 = arith.mulf %30, %39 : vector<64x128xf32>
    %c0_19 = arith.constant 0 : index
    %c0_20 = arith.constant 0 : index
    %41 = vector.load %arg6[%c0_19, %c0_20] : memref<1x128xf32, #tpu.memory_space<vmem>>, vector<1x128xf32>
    %42 = vector.broadcast %41 : vector<1x128xf32> to vector<64x128xf32>
    %43 = arith.mulf %40, %42 : vector<64x128xf32>
    %c0_21 = arith.constant 0 : index
    %c0_22 = arith.constant 0 : index
    %44 = vector.load %arg7[%c0_21, %c0_22] : memref<1x128xf32, #tpu.memory_space<vmem>>, vector<1x128xf32>
    %45 = vector.broadcast %44 : vector<1x128xf32> to vector<64x128xf32>
    %46 = arith.addf %43, %45 : vector<64x128xf32>
    %c0_23 = arith.constant 0 : index
    %c0_24 = arith.constant 0 : index
    %47 = vector.load %arg8[%c0_23, %c0_24] : memref<64x128xf32, #tpu.memory_space<vmem>>, vector<64x128xf32>
    tpu.vector_store %arg8[%c0_23, %c0_24], %46 {strides = array<i32>} : memref<64x128xf32, #tpu.memory_space<vmem>>, vector<64x128xf32>,
    return
  }
  func.func @transform_0(%arg0: i32) -> (i32, i32) {
    %c0_i32 = arith.constant 0 : i32
    %c0_i32_0 = arith.constant 0 : i32
    return %arg0, %c0_i32 : i32, i32
  }
  func.func @transform_1(%arg0: i32) -> (i32, i32) {
    %c0_i32 = arith.constant 0 : i32
    %c0_i32_0 = arith.constant 0 : i32
    %c0_i32_1 = arith.constant 0 : i32
    return %c0_i32, %c0_i32_0 : i32, i32
  }
  func.func @transform_2(%arg0: i32) -> (i32, i32) {
    %c0_i32 = arith.constant 0 : i32
    %c0_i32_0 = arith.constant 0 : i32
    %c0_i32_1 = arith.constant 0 : i32
    return %c0_i32, %c0_i32_0 : i32, i32
  }
  func.func @transform_3(%arg0: i32) -> (i32, i32) {
    %c0_i32 = arith.constant 0 : i32
    %c0_i32_0 = arith.constant 0 : i32
    %c0_i32_1 = arith.constant 0 : i32
    return %c0_i32, %c0_i32_0 : i32, i32
  }
  func.func @transform_4(%arg0: i32) -> (i32, i32) {
    %c0_i32 = arith.constant 0 : i32
    %c0_i32_0 = arith.constant 0 : i32
    %c0_i32_1 = arith.constant 0 : i32
    return %c0_i32, %c0_i32_0 : i32, i32
  }
  func.func @transform_5(%arg0: i32) -> (i32, i32) {
    %c0_i32 = arith.constant 0 : i32
    %c0_i32_0 = arith.constant 0 : i32
    %c0_i32_1 = arith.constant 0 : i32
    return %c0_i32, %c0_i32_0 : i32, i32
  }
  func.func @transform_6(%arg0: i32) -> (i32, i32) {
    %c0_i32 = arith.constant 0 : i32
    %c0_i32_0 = arith.constant 0 : i32
    %c0_i32_1 = arith.constant 0 : i32
    return %c0_i32, %c0_i32_0 : i32, i32
  }
  func.func @transform_7(%arg0: i32) -> (i32, i32) {
    %c0_i32 = arith.constant 0 : i32
    %c0_i32_0 = arith.constant 0 : i32
    return %arg0, %c0_i32 : i32, i32
  }
}

</mosaic_0001>

<bundles_post_ra>
// kernel: cross_block_forward.10
= control target key start
LH: loop header
LB: loop body
LE: loop exit
PB: predicated region body
PF: predicated region fallthrough
CT: control target
= control target key end

     0   :  { %s976_s27 = smov 0   ;;  %s1240_s0 = inlined_call_operand.vmem [shape: f32[128,128], index: 0, kind: input, shape index: {}]   ;;  %s1241_s1 = inlined_call_operand.vmem [shape: f32[128,128], index: 1, kind: input, shape index: {}]   ;;  %s1242_s2 = inlined_call_operand.vmem [shape: f32[128,256], index: 2, kind: input, shape index: {}]   ;;  %s1243_s3 = inlined_call_operand.vmem [shape: f32[1,256], index: 3, kind: input, shape index: {}]   ;;  %s1244_s4 = inlined_call_operand.vmem [shape: f32[128,128], index: 4, kind: input, shape index: {}]   ;;  %s1245_s5 = inlined_call_operand.vmem [shape: f32[1,128], index: 5, kind: input, shape index: {}]   ;;  %s1246_s6 = inlined_call_operand.vmem [shape: f32[128,128], index: 6, kind: output, shape index: {0}]   ;;  %s1247_s7 = inlined_call_operand.vmem [shape: f32[128,128], index: 7, kind: output, shape index: {1}]   ;;  %s1248_s8 = inlined_call_operand.vmem [shape: f32[128,128], index: 8, kind: output, shape index: {2}]  }
   0x1 LB: > { %s827_s28 = sadd.s32 4294967295, %s928_s27   ;;  %p831_p0 = scmp.ge.s32.totalorder %s928_s27, 1  ;;  %s928_s27 = sphi %s976_s27, %s19_s27  }
   0x2   : > { %p279_p1 = scmp.lt.s32.totalorder %s928_s27, 3 }
   0x4   : > { %p280_p2 = pnand %p831_p0, %p279_p1 }
   0x5   : > { %s832_s19 = sshll.u32 (!%p280_p2), %s827_s28, 3 }
   0x6   : > { %283 = sbr.rel (%p280_p2) target bundleno = 270 (0x10e), region = 44  ;;  %p329_p3 = scmp.lt.s32.totalorder (!%p280_p2), %s832_s19, 15 }
   0xb   : > { %v413_v0 = vld [vmem:[%s1242_s2 + $0xf8] sm:$0xff]  ;;  %v412_v1 = vld [vmem:[%s1242_s2 + $0xf0] sm:$0xff]  ;;  %v411_v2 = vld [vmem:[%s1242_s2 + $0xe8] sm:$0xff]  ;;  %v930_v4 = vmov 0.0   ;;  %s1250_s19 = smov (!%p329_p3, %s832_s19), 15 }
   0xc   : > { %426 = vmatprep.subr.mxu0 %v413_v0  ;;  %v410_v3 = vld [vmem:[%s1242_s2 + $0xe0] sm:$0xff]  ;;  %490 = vmatprep.mubr.f32.mxu0 %v930_v4  ;;  %v409_v5 = vld [vmem:[%s1242_s2 + $0xd8] sm:$0xff]  ;;  %v408_v6 = vld [vmem:[%s1242_s2 + $0xd0] sm:$0xff]  ;;  %s1084_s11 = sshll.u32 %s1250_s19, 3 }
   0xd   : > { %427 = vmatpush1.msra.mxu0 %v412_v1  ;;  %v407_v7 = vld [vmem:[%s1242_s2 + $0xc8] sm:$0xff]  ;;  %v406_v8 = vld [vmem:[%s1242_s2 + $0xc0] sm:$0xff]  ;;  %v554_v9 = vld [vmem:[%s1244_s4 + $0x78] sm:$0xff]  ;;  %s1102_s22 = scalar_lea.vmem %s1240_s0, %s1084_s11  ;;  %s1108_s25 = scalar_lea.vmem %s1241_s1, %s1084_s11 }
   0xe   : > { %428 = vmatprep.subr.mxu0 %v411_v2  ;;  %v405_v10 = vld [vmem:[%s1242_s2 + $0xb8] sm:$0xff]  ;;  %869 = vmatprep.subr.mxu1 %v554_v9  ;;  %v553_v11 = vld [vmem:[%s1244_s4 + $0x70] sm:$0xff]  ;;  %v552_v13 = vld [vmem:[%s1244_s4 + $0x68] sm:$0xff]  ;;  %s1180_s14 = scalar_lea.vmem %s1246_s6, %s1084_s11  ;;  %s1187_s17 = scalar_lea.vmem %s1247_s7, %s1084_s11 }
   0xf   : > { %429 = vmatpush1.msra.mxu0 %v410_v3  ;;  %v404_v12 = vld [vmem:[%s1242_s2 + $0xb0] sm:$0xff]  ;;  %870 = vmatpush3.msra.mxu1 %v554_v9  ;;  %v403_v14 = vld [vmem:[%s1242_s2 + $0xa8] sm:$0xff]  ;;  %v402_v15 = vld [vmem:[%s1242_s2 + $0xa0] sm:$0xff]  ;;  %s1200_s23 = scalar_lea.vmem %s1248_s8, %s1084_s11 }
  0x10   : > { %430 = vmatprep.subr.mxu0 %v409_v5  ;;  %871 = vmatprep.subr.mxu1 %v553_v11  ;;  %v551_v16 = vld [vmem:[%s1244_s4 + $0x60] sm:$0xff]  ;;  %v401_v17 = vld [vmem:[%s1242_s2 + $0x98] sm:$0xff]  ;;  %v400_v18 = vld [vmem:[%s1242_s2 + $0x90] sm:$0xff] }
  0x11   : > { %431 = vmatpush1.msra.mxu0 %v408_v6  ;;  %872 = vmatpush3.msra.mxu1 %v553_v11  ;;  %v550_v19 = vld [vmem:[%s1244_s4 + $0x58] sm:$0xff]  ;;  %v399_v20 = vld [vmem:[%s1242_s2 + $0x88] sm:$0xff]  ;;  %v398_v21 = vld [vmem:[%s1242_s2 + $0x80] sm:$0xff] }
  0x12   : > { %432 = vmatprep.subr.mxu0 %v407_v7  ;;  %873 = vmatprep.subr.mxu1 %v552_v13  ;;  %v549_v22 = vld [vmem:[%s1244_s4 + $0x50] sm:$0xff]  ;;  %v397_v23 = vld [vmem:[%s1242_s2 + $0x78] sm:$0xff]  ;;  %v548_v25 = vld [vmem:[%s1244_s4 + $0x48] sm:$0xff] }
  0x13   : > { %433 = vmatpush1.msra.mxu0 %v406_v8  ;;  %874 = vmatpush3.msra.mxu1 %v552_v13  ;;  %v396_v24 = vld [vmem:[%s1242_s2 + $0x70] sm:$0xff]  ;;  %v395_v26 = vld [vmem:[%s1242_s2 + $0x68] sm:$0xff]  ;;  %v394_v27 = vld [vmem:[%s1242_s2 + $0x60] sm:$0xff] }
  0x14   : > { %434 = vmatprep.subr.mxu0 %v405_v10  ;;  %875 = vmatprep.subr.mxu1 %v551_v16  ;;  %v547_v28 = vld [vmem:[%s1244_s4 + $0x40] sm:$0xff]  ;;  %v393_v29 = vld [vmem:[%s1242_s2 + $0x58] sm:$0xff]  ;;  %v392_v30 = vld [vmem:[%s1242_s2 + $0x50] sm:$0xff]  ;;  %v416_v10 = vlaneseq }
  0x15   : > { %435 = vmatpush1.msra.mxu0 %v404_v12  ;;  %876 = vmatpush3.msra.mxu1 %v551_v16  ;;  %v546_v31 = vld [vmem:[%s1244_s4 + $0x38] sm:$0xff]  ;;  %v391_v32 = vld [vmem:[%s1242_s2 + $0x48] sm:$0xff]  ;;  %v390_v33 = vld [vmem:[%s1242_s2 + $0x40] sm:$0xff] }
  0x16   : > { %436 = vmatprep.subr.mxu0 %v403_v14  ;;  %877 = vmatprep.subr.mxu1 %v550_v19  ;;  %v545_v34 = vld [vmem:[%s1244_s4 + $0x30] sm:$0xff]  ;;  %v389_v35 = vld [vmem:[%s1242_s2 + $0x38] sm:$0xff]  ;;  %v544_v37 = vld [vmem:[%s1244_s4 + $0x28] sm:$0xff]  ;;  %v417_v11 = vshrl.u32 %v416_v10, 7 }
  0x17   : > { %437 = vmatpush1.msra.mxu0 %v402_v15  ;;  %878 = vmatpush3.msra.mxu1 %v550_v19  ;;  %v388_v36 = vld [vmem:[%s1242_s2 + $0x30] sm:$0xff]  ;;  %v387_v38 = vld [vmem:[%s1242_s2 + $0x28] sm:$0xff]  ;;  %v386_v39 = vld [vmem:[%s1242_s2 + $0x20] sm:$0xff] }
  0x18   : > { %438 = vmatprep.subr.mxu0 %v401_v17  ;;  %879 = vmatprep.subr.mxu1 %v549_v22  ;;  %v543_v40 = vld [vmem:[%s1244_s4 + $0x20] sm:$0xff]  ;;  %v385_v41 = vld [vmem:[%s1242_s2 + $0x18] sm:$0xff]  ;;  %v384_v44 = vld [vmem:[%s1242_s2 + $0x10] sm:$0xff]  ;;  %v418_v12 = vsub.s32 0, %v417_v11  ;;  %v422_v14 = vsub.s32 1, %v417_v11 }
  0x19   : > { %439 = vmatpush1.msra.mxu0 %v400_v18  ;;  %880 = vmatpush3.msra.mxu1 %v549_v22  ;;  %v358_v42 = vld [vmem:[%s1102_s22] sm:$0xff]  ;;  %v542_v45 = vld [vmem:[%s1244_s4 + $0x18] sm:$0xff]  ;;  %v383_v46 = vld [vmem:[%s1242_s2 + $0x8] sm:$0xff] }
  0x1a   : > { %440 = vmatprep.subr.mxu0 %v399_v20  ;;  %881 = vmatprep.subr.mxu1 %v548_v25  ;;  %v366_v43 = vld [vmem:[%s1108_s25] sm:$0xff]  ;;  %v541_v49 = vld [vmem:[%s1244_s4 + $0x10] sm:$0xff]  ;;  %v359_v50 = vld [vmem:[%s1102_s22 + $0x8] sm:$0xff] }
  0x1b   : > { %441 = vmatpush1.msra.mxu0 %v398_v21  ;;  %882 = vmatpush3.msra.mxu1 %v548_v25  ;;  %v382_v47 = vld [vmem:[%s1242_s2] sm:$0xff]  ;;  %v374_v48 = vadd.f32 %v366_v43, %v358_v42  ;;  %v367_v51 = vld [vmem:[%s1108_s25 + $0x8] sm:$0xff]  ;;  %v360_v55 = vld [vmem:[%s1102_s22 + $0x10] sm:$0xff] }
  0x1c   : > { %442 = vmatprep.subr.mxu0 %v397_v23  ;;  %883 = vmatprep.subr.mxu1 %v547_v28  ;;  %v540_v52 = vld [vmem:[%s1244_s4 + $0x8] sm:$0xff]  ;;  %v375_v53 = vadd.f32 %v367_v51, %v359_v50  ;;  %v539_v54 = vld [vmem:[%s1244_s4] sm:$0xff]  ;;  %v368_v56 = vld [vmem:[%s1108_s25 + $0x10] sm:$0xff] }
  0x1d   : > { %443 = vmatpush1.msra.mxu0 %v396_v24  ;;  %884 = vmatpush3.msra.mxu1 %v547_v28  ;;  %v376_v57 = vadd.f32 %v368_v56, %v360_v55  ;;  %v361_v58 = vld [vmem:[%s1102_s22 + $0x18] sm:$0xff]  ;;  %v362_v61 = vld [vmem:[%s1102_s22 + $0x20] sm:$0xff]  ;;  %v363_v0 = vld [vmem:[%s1102_s22 + $0x28] sm:$0xff] }
  0x1e   : > { %444 = vmatprep.subr.mxu0 %v395_v26  ;;  %885 = vmatprep.subr.mxu1 %v546_v31  ;;  %v369_v59 = vld [vmem:[%s1108_s25 + $0x18] sm:$0xff]  ;;  %v370_v62 = vld [vmem:[%s1108_s25 + $0x20] sm:$0xff]  ;;  %v371_v1 = vld [vmem:[%s1108_s25 + $0x28] sm:$0xff] }
  0x1f   : > { %445 = vmatpush1.msra.mxu0 %v394_v27  ;;  %886 = vmatpush3.msra.mxu1 %v546_v31  ;;  %v377_v60 = vadd.f32 %v369_v59, %v361_v58  ;;  %v378_v63 = vadd.f32 %v370_v62, %v362_v61  ;;  %v364_v2 = vld [vmem:[%s1102_s22 + $0x30] sm:$0xff]  ;;  %v365_v3 = vld [vmem:[%s1102_s22 + $0x38] sm:$0xff]  ;;  %v379_v5 = vadd.f32 %v371_v1, %v363_v0  ;;  %v414_v13 = vld [vmem:[%s1243_s3] sm:$0x3] }
  0x20   : > { %446 = vmatprep.subr.mxu0 %v393_v29  ;;  %887 = vmatprep.subr.mxu1 %v545_v34  ;;  %v372_v6 = vld [vmem:[%s1108_s25 + $0x30] sm:$0xff]  ;;  %v373_v8 = vld [vmem:[%s1108_s25 + $0x38] sm:$0xff]  ;;  %v1172_v15 = vrot.slane %v414_v13, %v418_v12  ;;  %v1174_v16 = vrot.slane %v414_v13, %v422_v14  ;;  %v842_v20 = vld [vmem:[%s1245_s5] ss:$0 sm:$0xff] }
  0x21   : > { %447 = vmatpush1.msra.mxu0 %v392_v30  ;;  %888 = vmatpush3.msra.mxu1 %v545_v34  ;;  %v380_v7 = vadd.f32 %v372_v6, %v364_v2  ;;  %v381_v9 = vadd.f32 %v373_v8, %v365_v3 }
  0x22   : > { %448 = vmatprep.subr.mxu0 %v391_v32  ;;  %889 = vmatprep.subr.mxu1 %v544_v37 }
  0x23   : > { %449 = vmatpush1.msra.mxu0 %v390_v33  ;;  %890 = vmatpush3.msra.mxu1 %v544_v37 }
  0x24   : > { %450 = vmatprep.subr.mxu0 %v389_v35  ;;  %891 = vmatprep.subr.mxu1 %v543_v40 }
  0x25   : > { %451 = vmatpush1.msra.mxu0 %v388_v36  ;;  %892 = vmatpush3.msra.mxu1 %v543_v40 }
  0x26   : > { %452 = vmatprep.subr.mxu0 %v387_v38  ;;  %893 = vmatprep.subr.mxu1 %v542_v45 }
  0x27   : > { %453 = vmatpush1.msra.mxu0 %v386_v39  ;;  %894 = vmatpush3.msra.mxu1 %v542_v45 }
  0x28   : > { %454 = vmatprep.subr.mxu0 %v385_v41  ;;  %895 = vmatprep.subr.mxu1 %v541_v49 }
  0x29   : > { %455 = vmatpush1.msra.mxu0 %v384_v44  ;;  %896 = vmatpush3.msra.mxu1 %v541_v49 }
  0x2a   : > { %456 = vmatprep.subr.mxu0 %v383_v46  ;;  %897 = vmatprep.subr.mxu1 %v540_v52 }
  0x2b   : > { %457 = vmatpush1.msra.mxu0 %v382_v47  ;;  %898 = vmatpush3.msra.mxu1 %v540_v52 }
  0x2c   : > { %491 = vmatmul.mubr.f32.vlgmr.msra.gmra.mxu0 %v374_v48  ;;  %901 = vmatprep.mubr.f32.mxu1 %v358_v42 }
  0x2d   : > { %496 = vmatprep.mubr.f32.mxu0 %v930_v4  ;;  %899 = vmatprep.subr.mxu1 %v539_v54 }
  0x2e   : > { %900 = vmatpush3.msra.mxu1 %v539_v54 }
  0x2f   : > { %902 = vmatmul.mubr.f32.vlgmr.msra.gmra.mxu1 %v359_v50 }
  0x30   : > { %497 = vmatmul.mubr.f32.gmra.mxu0 %v375_v53  ;;  %904 = vmatprep.mubr.f32.mxu1 %v360_v55 }
  0x31   : > { %502 = vmatprep.mubr.f32.mxu0 %v930_v4 }
  0x33   : > { %905 = vmatmul.mubr.f32.gmra.mxu1 %v361_v58 }
  0x34   : > { %503 = vmatmul.mubr.f32.gmra.mxu0 %v376_v57  ;;  %907 = vmatprep.mubr.f32.mxu1 %v362_v61 }
  0x35   : > { %508 = vmatprep.mubr.f32.mxu0 %v930_v4 }
  0x37   : > { %908 = vmatmul.mubr.f32.gmra.mxu1 %v363_v0 }
  0x38   : > { %509 = vmatmul.mubr.f32.gmra.mxu0 %v377_v60  ;;  %910 = vmatprep.mubr.f32.mxu1 %v364_v2 }
  0x39   : > { %514 = vmatprep.mubr.f32.mxu0 %v930_v4 }
  0x3b   : > { %911 = vmatmul.mubr.f32.gmra.mxu1 %v365_v3 }
  0x3c   : > { %515 = vmatmul.mubr.f32.gmra.mxu0 %v378_v63 }
  0x3d   : > { %520 = vmatprep.mubr.f32.mxu0 %v930_v4 }
  0x40   : > { %521 = vmatmul.mubr.f32.gmra.mxu0 %v379_v5 }
  0x41   : > { %526 = vmatprep.mubr.f32.mxu0 %v930_v4 }
  0x44   : > { %527 = vmatmul.mubr.f32.gmra.mxu0 %v380_v7 }
  0x45   : > { %532 = vmatprep.mubr.f32.mxu0 %v930_v4 }
  0x48   : > { %533 = vmatmul.mubr.f32.gmra.mxu0 %v381_v9 }
  0xec   : > { %v492_v4 = vpop.f32.mrf.mxu0 }
  0xed   : > { %v493_v17 = vadd.f32 %v492_v4, %v1172_v15 }
  0xee   : > { %v494_v18 = vpop.f32.mrf.mxu0 }
  0xef   : > { %667 = vst [vmem:[%s1180_s14] sm:$0xff] %v493_v17  ;;  %v495_v19 = vadd.f32 %v494_v18, %v1174_v16  ;;  %v903_v23 = vpop.f32.mrf.mxu1 }
  0xf0   : > { %v498_v21 = vpop.f32.mrf.mxu0  ;;  %v634_v25 = vadd.f32 %v903_v23, %v842_v20 }
  0xf1   : > { %675 = vst [vmem:[%s1187_s17] sm:$0xff] %v495_v19  ;;  %v499_v22 = vadd.f32 %v498_v21, %v1172_v15  ;;  %v628_v27 = vpop.f32.mrf.mxu1 }
  0xf2   : > { %v500_v24 = vpop.f32.mrf.mxu0  ;;  %684 = vst [vmem:[%s1200_s23 + $0x8] sm:$0xff] %v634_v25  ;;  %v629_v29 = vadd.f32 %v842_v20, %v628_v27 }
  0xf3   : > { %668 = vst [vmem:[%s1180_s14 + $0x8] sm:$0xff] %v499_v22  ;;  %v501_v26 = vadd.f32 %v500_v24, %v1174_v16  ;;  %v906_v31 = vpop.f32.mrf.mxu1 }
  0xf4   : > { %v504_v28 = vpop.f32.mrf.mxu0  ;;  %683 = vst [vmem:[%s1200_s23] sm:$0xff] %v629_v29  ;;  %v644_v33 = vadd.f32 %v906_v31, %v842_v20 }
  0xf5   : > { %676 = vst [vmem:[%s1187_s17 + $0x8] sm:$0xff] %v501_v26  ;;  %v505_v30 = vadd.f32 %v504_v28, %v1172_v15  ;;  %v638_v35 = vpop.f32.mrf.mxu1 }
  0xf6   : > { %v506_v32 = vpop.f32.mrf.mxu0  ;;  %686 = vst [vmem:[%s1200_s23 + $0x18] sm:$0xff] %v644_v33  ;;  %v639_v37 = vadd.f32 %v842_v20, %v638_v35 }
  0xf7   : > { %669 = vst [vmem:[%s1180_s14 + $0x10] sm:$0xff] %v505_v30  ;;  %v507_v34 = vadd.f32 %v506_v32, %v1174_v16  ;;  %v909_v39 = vpop.f32.mrf.mxu1 }
  0xf8   : > { %v510_v36 = vpop.f32.mrf.mxu0  ;;  %685 = vst [vmem:[%s1200_s23 + $0x10] sm:$0xff] %v639_v37  ;;  %v654_v41 = vadd.f32 %v909_v39, %v842_v20 }
  0xf9   : > { %677 = vst [vmem:[%s1187_s17 + $0x10] sm:$0xff] %v507_v34  ;;  %v511_v38 = vadd.f32 %v510_v36, %v1172_v15  ;;  %v648_v43 = vpop.f32.mrf.mxu1 }
  0xfa   : > { %v512_v40 = vpop.f32.mrf.mxu0  ;;  %688 = vst [vmem:[%s1200_s23 + $0x28] sm:$0xff] %v654_v41  ;;  %v649_v45 = vadd.f32 %v842_v20, %v648_v43 }
  0xfb   : > { %670 = vst [vmem:[%s1180_s14 + $0x18] sm:$0xff] %v511_v38  ;;  %v513_v42 = vadd.f32 %v512_v40, %v1174_v16  ;;  %v912_v47 = vpop.f32.mrf.mxu1 }
  0xfc   : > { %v516_v44 = vpop.f32.mrf.mxu0  ;;  %687 = vst [vmem:[%s1200_s23 + $0x20] sm:$0xff] %v649_v45  ;;  %v664_v49 = vadd.f32 %v912_v47, %v842_v20 }
  0xfd   : > { %678 = vst [vmem:[%s1187_s17 + $0x18] sm:$0xff] %v513_v42  ;;  %v517_v46 = vadd.f32 %v516_v44, %v1172_v15  ;;  %v658_v51 = vpop.f32.mrf.mxu1 }
  0xfe   : > { %v518_v48 = vpop.f32.mrf.mxu0  ;;  %690 = vst [vmem:[%s1200_s23 + $0x38] sm:$0xff] %v664_v49  ;;  %v659_v53 = vadd.f32 %v842_v20, %v658_v51 }
  0xff   : > { %671 = vst [vmem:[%s1180_s14 + $0x20] sm:$0xff] %v517_v46  ;;  %v519_v50 = vadd.f32 %v518_v48, %v1174_v16 }
 0x100   : > { %v522_v52 = vpop.f32.mrf.mxu0  ;;  %689 = vst [vmem:[%s1200_s23 + $0x30] sm:$0xff] %v659_v53 }
 0x101   : > { %679 = vst [vmem:[%s1187_s17 + $0x20] sm:$0xff] %v519_v50  ;;  %v523_v54 = vadd.f32 %v522_v52, %v1172_v15 }
 0x102   : > { %v524_v55 = vpop.f32.mrf.mxu0 }
 0x103   : > { %672 = vst [vmem:[%s1180_s14 + $0x28] sm:$0xff] %v523_v54  ;;  %v525_v56 = vadd.f32 %v524_v55, %v1174_v16 }
 0x104   : > { %v528_v57 = vpop.f32.mrf.mxu0 }
 0x105   : > { %680 = vst [vmem:[%s1187_s17 + $0x28] sm:$0xff] %v525_v56  ;;  %v529_v58 = vadd.f32 %v528_v57, %v1172_v15 }
 0x106   : > { %v530_v59 = vpop.f32.mrf.mxu0 }
 0x107   : > { %673 = vst [vmem:[%s1180_s14 + $0x30] sm:$0xff] %v529_v58  ;;  %v531_v60 = vadd.f32 %v530_v59, %v1174_v16 }
 0x108   : > { %v534_v61 = vpop.f32.mrf.mxu0 }
 0x109   : > { %681 = vst [vmem:[%s1187_s17 + $0x30] sm:$0xff] %v531_v60  ;;  %v535_v62 = vadd.f32 %v534_v61, %v1172_v15 }
 0x10a   : > { %v536_v63 = vpop.f32.mrf.mxu0 }
 0x10b   : > { %674 = vst [vmem:[%s1180_s14 + $0x38] sm:$0xff] %v535_v62  ;;  %v537_v0 = vadd.f32 %v536_v63, %v1174_v16 }
 0x10d   : > { %682 = vst [vmem:[%s1187_s17 + $0x38] sm:$0xff] %v537_v0 }
 0x10e PF: > { %s19_s27 = sadd.s32 1, %s928_s27  }
 0x10f   : > { %p16_p4 = scmp.ge.s32.totalorder %s19_s27, 4  }
 0x111   :  { %18 = sbr.rel (!%p16_p4) target bundleno = 1 (0x1), region = 101 }

// kernel: cross_block_forward.13
= control target key start
LH: loop header
LB: loop body
LE: loop exit
PB: predicated region body
PF: predicated region fallthrough
CT: control target
= control target key end

     0   :  { %s606_s15 = smov 0   ;;  %s702_s0 = inlined_call_operand.vmem [shape: f32[128,128], index: 0, kind: input, shape index: {}]   ;;  %s703_s1 = inlined_call_operand.vmem [shape: f32[128,128], index: 1, kind: input, shape index: {}]   ;;  %s704_s2 = inlined_call_operand.vmem [shape: f32[128,128], index: 2, kind: input, shape index: {}]   ;;  %s705_s3 = inlined_call_operand.vmem [shape: f32[1,128], index: 3, kind: input, shape index: {}]   ;;  %s706_s4 = inlined_call_operand.vmem [shape: f32[128,128], index: 4, kind: output, shape index: {}]  }
   0x1 LB: > { %s451_s16 = sadd.s32 4294967295, %s579_s15   ;;  %p455_p0 = scmp.ge.s32.totalorder %s579_s15, 1  ;;  %s579_s15 = sphi %s606_s15, %s14_s15  }
   0x2   : > { %p174_p1 = scmp.lt.s32.totalorder %s579_s15, 3 }
   0x4   : > { %p175_p2 = pnand %p455_p0, %p174_p1 }
   0x5   : > { %s456_s29 = sshll.u32 (!%p175_p2), %s451_s16, 3 }
   0x6   : > { %178 = sbr.rel (%p175_p2) target bundleno = 247 (0xf7), region = 36  ;;  %p206_p3 = scmp.lt.s32.totalorder (!%p175_p2), %s456_s29, 15 }
   0xb   : > { %v262_v0 = vld [vmem:[%s704_s2 + $0x78] sm:$0xff]  ;;  %v261_v1 = vld [vmem:[%s704_s2 + $0x70] sm:$0xff]  ;;  %v260_v2 = vld [vmem:[%s704_s2 + $0x68] sm:$0xff]  ;;  %s708_s29 = smov (!%p206_p3, %s456_s29), 15 }
   0xc   : > { %489 = vmatprep.subr.mxu0 %v262_v0  ;;  %533 = vmatprep.subr.mxu1 %v262_v0  ;;  %v259_v3 = vld [vmem:[%s704_s2 + $0x60] sm:$0xff]  ;;  %v258_v4 = vld [vmem:[%s704_s2 + $0x58] sm:$0xff]  ;;  %v257_v5 = vld [vmem:[%s704_s2 + $0x50] sm:$0xff]  ;;  %s647_s14 = sshll.u32 %s708_s29, 3 }
   0xd   : > { %490 = vmatpush3.msra.mxu0 %v262_v0  ;;  %549 = vmatpush3.msra.mxu1 %v262_v0  ;;  %v256_v6 = vld [vmem:[%s704_s2 + $0x48] sm:$0xff]  ;;  %v255_v7 = vld [vmem:[%s704_s2 + $0x40] sm:$0xff]  ;;  %v254_v8 = vld [vmem:[%s704_s2 + $0x38] sm:$0xff]  ;;  %s659_s22 = scalar_lea.vmem %s702_s0, %s647_s14  ;;  %s665_s25 = scalar_lea.vmem %s703_s1, %s647_s14 }
   0xe   : > { %491 = vmatprep.subr.mxu0 %v261_v1  ;;  %534 = vmatprep.subr.mxu1 %v261_v1  ;;  %v253_v9 = vld [vmem:[%s704_s2 + $0x30] sm:$0xff]  ;;  %v252_v10 = vld [vmem:[%s704_s2 + $0x28] sm:$0xff]  ;;  %v251_v11 = vld [vmem:[%s704_s2 + $0x20] sm:$0xff]  ;;  %s221_s10 = scalar_lea.vmem %s706_s4, %s647_s14 }
   0xf   : > { %492 = vmatpush3.msra.mxu0 %v261_v1  ;;  %550 = vmatpush3.msra.mxu1 %v261_v1  ;;  %v250_v12 = vld [vmem:[%s704_s2 + $0x18] sm:$0xff]  ;;  %v249_v13 = vld [vmem:[%s704_s2 + $0x10] sm:$0xff]  ;;  %v248_v14 = vld [vmem:[%s704_s2 + $0x8] sm:$0xff] }
  0x10   : > { %493 = vmatprep.subr.mxu0 %v260_v2  ;;  %535 = vmatprep.subr.mxu1 %v260_v2  ;;  %v223_v15 = vld [vmem:[%s659_s22] sm:$0xff]  ;;  %v224_v20 = vld [vmem:[%s659_s22 + $0x8] sm:$0xff]  ;;  %v225_v24 = vld [vmem:[%s659_s22 + $0x10] sm:$0xff] }
  0x11   : > { %494 = vmatpush3.msra.mxu0 %v260_v2  ;;  %551 = vmatpush3.msra.mxu1 %v260_v2  ;;  %v231_v16 = vld [vmem:[%s665_s25] sm:$0xff]  ;;  %v232_v21 = vld [vmem:[%s665_s25 + $0x8] sm:$0xff]  ;;  %v233_v25 = vld [vmem:[%s665_s25 + $0x10] sm:$0xff] }
  0x12   : > { %495 = vmatprep.subr.mxu0 %v259_v3  ;;  %536 = vmatprep.subr.mxu1 %v259_v3  ;;  %v227_v17 = vld [vmem:[%s659_s22 + $0x20] sm:$0xff]  ;;  %v228_v22 = vld [vmem:[%s659_s22 + $0x28] sm:$0xff]  ;;  %v229_v26 = vld [vmem:[%s659_s22 + $0x30] sm:$0xff]  ;;  %v239_v28 = vadd.f32 %v231_v16, %v223_v15  ;;  %v240_v30 = vadd.f32 %v232_v21, %v224_v20  ;;  %v241_v33 = vadd.f32 %v233_v25, %v225_v24 }
  0x13   : > { %496 = vmatpush3.msra.mxu0 %v259_v3  ;;  %552 = vmatpush3.msra.mxu1 %v259_v3  ;;  %v247_v18 = vld [vmem:[%s704_s2] sm:$0xff]  ;;  %v236_v23 = vld [vmem:[%s665_s25 + $0x28] sm:$0xff]  ;;  %v237_v27 = vld [vmem:[%s665_s25 + $0x30] sm:$0xff] }
  0x14   : > { %497 = vmatprep.subr.mxu0 %v258_v4  ;;  %537 = vmatprep.subr.mxu1 %v258_v4  ;;  %v235_v19 = vld [vmem:[%s665_s25 + $0x20] sm:$0xff]  ;;  %v244_v31 = vadd.f32 %v236_v23, %v228_v22  ;;  %v226_v32 = vld [vmem:[%s659_s22 + $0x18] sm:$0xff]  ;;  %v245_v34 = vadd.f32 %v237_v27, %v229_v26 }
  0x15   : > { %498 = vmatpush3.msra.mxu0 %v258_v4  ;;  %553 = vmatpush3.msra.mxu1 %v258_v4  ;;  %v243_v29 = vadd.f32 %v235_v19, %v227_v17  ;;  %v234_v35 = vld [vmem:[%s665_s25 + $0x18] sm:$0xff]  ;;  %v462_v40 = vld [vmem:[%s705_s3] ss:$0 sm:$0xff] }
  0x16   : > { %499 = vmatprep.subr.mxu0 %v257_v5  ;;  %538 = vmatprep.subr.mxu1 %v257_v5  ;;  %v230_v36 = vld [vmem:[%s659_s22 + $0x38] sm:$0xff]  ;;  %v242_v38 = vadd.f32 %v234_v35, %v226_v32 }
  0x17   : > { %500 = vmatpush3.msra.mxu0 %v257_v5  ;;  %554 = vmatpush3.msra.mxu1 %v257_v5  ;;  %v238_v37 = vld [vmem:[%s665_s25 + $0x38] sm:$0xff] }
  0x18   : > { %501 = vmatprep.subr.mxu0 %v256_v6  ;;  %539 = vmatprep.subr.mxu1 %v256_v6  ;;  %v246_v39 = vadd.f32 %v238_v37, %v230_v36 }
  0x19   : > { %502 = vmatpush3.msra.mxu0 %v256_v6  ;;  %555 = vmatpush3.msra.mxu1 %v256_v6 }
  0x1a   : > { %503 = vmatprep.subr.mxu0 %v255_v7  ;;  %540 = vmatprep.subr.mxu1 %v255_v7 }
  0x1b   : > { %504 = vmatpush3.msra.mxu0 %v255_v7  ;;  %556 = vmatpush3.msra.mxu1 %v255_v7 }
  0x1c   : > { %505 = vmatprep.subr.mxu0 %v254_v8  ;;  %541 = vmatprep.subr.mxu1 %v254_v8 }
  0x1d   : > { %506 = vmatpush3.msra.mxu0 %v254_v8  ;;  %557 = vmatpush3.msra.mxu1 %v254_v8 }
  0x1e   : > { %507 = vmatprep.subr.mxu0 %v253_v9  ;;  %542 = vmatprep.subr.mxu1 %v253_v9 }
  0x1f   : > { %508 = vmatpush3.msra.mxu0 %v253_v9  ;;  %558 = vmatpush3.msra.mxu1 %v253_v9 }
  0x20   : > { %509 = vmatprep.subr.mxu0 %v252_v10  ;;  %543 = vmatprep.subr.mxu1 %v252_v10 }
  0x21   : > { %510 = vmatpush3.msra.mxu0 %v252_v10  ;;  %559 = vmatpush3.msra.mxu1 %v252_v10 }
  0x22   : > { %511 = vmatprep.subr.mxu0 %v251_v11  ;;  %544 = vmatprep.subr.mxu1 %v251_v11 }
  0x23   : > { %512 = vmatpush3.msra.mxu0 %v251_v11  ;;  %560 = vmatpush3.msra.mxu1 %v251_v11 }
  0x24   : > { %513 = vmatprep.subr.mxu0 %v250_v12  ;;  %545 = vmatprep.subr.mxu1 %v250_v12 }
  0x25   : > { %514 = vmatpush3.msra.mxu0 %v250_v12  ;;  %561 = vmatpush3.msra.mxu1 %v250_v12 }
  0x26   : > { %515 = vmatprep.subr.mxu0 %v249_v13  ;;  %546 = vmatprep.subr.mxu1 %v249_v13 }
  0x27   : > { %516 = vmatpush3.msra.mxu0 %v249_v13  ;;  %562 = vmatpush3.msra.mxu1 %v249_v13 }
  0x28   : > { %517 = vmatprep.subr.mxu0 %v248_v14  ;;  %547 = vmatprep.subr.mxu1 %v248_v14 }
  0x29   : > { %518 = vmatpush3.msra.mxu0 %v248_v14  ;;  %563 = vmatpush3.msra.mxu1 %v248_v14 }
  0x2a   : > { %519 = vmatprep.subr.mxu0 %v247_v18  ;;  %548 = vmatprep.subr.mxu1 %v247_v18 }
  0x2b   : > { %520 = vmatpush3.msra.mxu0 %v247_v18  ;;  %564 = vmatpush3.msra.mxu1 %v247_v18 }
  0x2c   : > { %521 = vmatprep.mubr.f32.mxu0 %v239_v28  ;;  %527 = vmatprep.mubr.f32.mxu1 %v243_v29 }
  0x2d   : > { %522 = vmatmul.mubr.f32.vlgmr.msra.gmra.mxu0 %v240_v30  ;;  %528 = vmatmul.mubr.f32.vlgmr.msra.gmra.mxu1 %v244_v31 }
  0x2e   : > { %524 = vmatprep.mubr.f32.mxu0 %v241_v33  ;;  %530 = vmatprep.mubr.f32.mxu1 %v245_v34 }
  0x31   : > { %525 = vmatmul.mubr.f32.gmra.mxu0 %v242_v38  ;;  %531 = vmatmul.mubr.f32.gmra.mxu1 %v246_v39 }
  0xed   : > { %v523_v41 = vpop.f32.mrf.mxu0  ;;  %v529_v42 = vpop.f32.mrf.mxu1 }
  0xee   : > { %v342_v43 = vadd.f32 %v523_v41, %v462_v40  ;;  %v362_v44 = vadd.f32 %v529_v42, %v462_v40 }
  0xef   : > { %v336_v45 = vpop.f32.mrf.mxu0  ;;  %v356_v46 = vpop.f32.mrf.mxu1 }
  0xf0   : > { %376 = vst [vmem:[%s221_s10 + $0x8] sm:$0xff] %v342_v43  ;;  %380 = vst [vmem:[%s221_s10 + $0x28] sm:$0xff] %v362_v44  ;;  %v337_v47 = vadd.f32 %v462_v40, %v336_v45  ;;  %v357_v48 = vadd.f32 %v462_v40, %v356_v46 }
  0xf1   : > { %v526_v49 = vpop.f32.mrf.mxu0  ;;  %v532_v50 = vpop.f32.mrf.mxu1 }
  0xf2   : > { %375 = vst [vmem:[%s221_s10] sm:$0xff] %v337_v47  ;;  %379 = vst [vmem:[%s221_s10 + $0x20] sm:$0xff] %v357_v48  ;;  %v352_v51 = vadd.f32 %v526_v49, %v462_v40  ;;  %v372_v52 = vadd.f32 %v532_v50, %v462_v40 }
  0xf3   : > { %v346_v53 = vpop.f32.mrf.mxu0  ;;  %v366_v54 = vpop.f32.mrf.mxu1 }
  0xf4   : > { %378 = vst [vmem:[%s221_s10 + $0x18] sm:$0xff] %v352_v51  ;;  %382 = vst [vmem:[%s221_s10 + $0x38] sm:$0xff] %v372_v52  ;;  %v347_v55 = vadd.f32 %v462_v40, %v346_v53  ;;  %v367_v56 = vadd.f32 %v462_v40, %v366_v54 }
  0xf6   : > { %377 = vst [vmem:[%s221_s10 + $0x10] sm:$0xff] %v347_v55  ;;  %381 = vst [vmem:[%s221_s10 + $0x30] sm:$0xff] %v367_v56 }
  0xf7 PF: > { %s14_s15 = sadd.s32 1, %s579_s15  }
  0xf8   : > { %p11_p4 = scmp.ge.s32.totalorder %s14_s15, 4  }
  0xfa   :  { %13 = sbr.rel (!%p11_p4) target bundleno = 1 (0x1), region = 69 }

// kernel: cross_block_forward.12
= control target key start
LH: loop header
LB: loop body
LE: loop exit
PB: predicated region body
PF: predicated region fallthrough
CT: control target
= control target key end

     0   :  { %s807_s21 = smov 0   ;;  %s951_s0 = inlined_call_operand.vmem [shape: f32[128,128], index: 0, kind: input, shape index: {}]   ;;  %s952_s1 = inlined_call_operand.vmem [shape: f32[128,128], index: 1, kind: input, shape index: {}]   ;;  %s953_s2 = inlined_call_operand.vmem [shape: f32[128,128], index: 2, kind: input, shape index: {}]   ;;  %s954_s3 = inlined_call_operand.vmem [shape: f32[1,128], index: 3, kind: input, shape index: {}]   ;;  %s955_s4 = inlined_call_operand.vmem [shape: f32[1,128], index: 4, kind: input, shape index: {}]   ;;  %s956_s5 = inlined_call_operand.vmem [shape: f32[1,128], index: 5, kind: input, shape index: {}]   ;;  %s957_s6 = inlined_call_operand.vmem [shape: f32[128,128], index: 6, kind: output, shape index: {}]  }
   0x1 LB: > { %s624_s22 = sadd.s32 4294967295, %s770_s21   ;;  %p628_p0 = scmp.ge.s32.totalorder %s770_s21, 1  ;;  %s770_s21 = sphi %s807_s21, %s16_s21  }
   0x2   : > { %p224_p1 = scmp.lt.s32.totalorder %s770_s21, 3 }
   0x4   : > { %p225_p2 = pnand %p628_p0, %p224_p1 }
   0x5   : > { %s629_s15 = sshll.u32 (!%p225_p2), %s624_s22, 3 }
   0x6   : > { %228 = sbr.rel (%p225_p2) target bundleno = 565 (0x235), region = 44  ;;  %p260_p3 = scmp.lt.s32.totalorder (!%p225_p2), %s629_s15, 15 }
   0xb   : > { %v300_v0 = vld [vmem:[%s953_s2 + $0x78] sm:$0xff]  ;;  %v299_v1 = vld [vmem:[%s953_s2 + $0x70] sm:$0xff]  ;;  %v298_v2 = vld [vmem:[%s953_s2 + $0x68] sm:$0xff]  ;;  %s959_s15 = smov (!%p260_p3, %s629_s15), 15 }
   0xc   : > { %664 = vmatprep.subr.mxu0 %v300_v0  ;;  %708 = vmatprep.subr.mxu1 %v300_v0  ;;  %v297_v3 = vld [vmem:[%s953_s2 + $0x60] sm:$0xff]  ;;  %v296_v4 = vld [vmem:[%s953_s2 + $0x58] sm:$0xff]  ;;  %v295_v5 = vld [vmem:[%s953_s2 + $0x50] sm:$0xff]  ;;  %s859_s29 = sshll.u32 %s959_s15, 3 }
   0xd   : > { %665 = vmatpush3.msra.mxu0 %v300_v0  ;;  %724 = vmatpush3.msra.mxu1 %v300_v0  ;;  %v294_v6 = vld [vmem:[%s953_s2 + $0x48] sm:$0xff]  ;;  %v293_v7 = vld [vmem:[%s953_s2 + $0x40] sm:$0xff]  ;;  %v292_v8 = vld [vmem:[%s953_s2 + $0x38] sm:$0xff]  ;;  %s263_s10 = scalar_lea.vmem %s951_s0, %s859_s29  ;;  %s875_s15 = scalar_lea.vmem %s952_s1, %s859_s29 }
   0xe   : > { %666 = vmatprep.subr.mxu0 %v299_v1  ;;  %709 = vmatprep.subr.mxu1 %v299_v1  ;;  %v291_v9 = vld [vmem:[%s953_s2 + $0x30] sm:$0xff]  ;;  %v290_v10 = vld [vmem:[%s953_s2 + $0x28] sm:$0xff]  ;;  %v289_v11 = vld [vmem:[%s953_s2 + $0x20] sm:$0xff]  ;;  %s931_s25 = scalar_lea.vmem %s957_s6, %s859_s29 }
   0xf   : > { %667 = vmatpush3.msra.mxu0 %v299_v1  ;;  %725 = vmatpush3.msra.mxu1 %v299_v1  ;;  %v288_v12 = vld [vmem:[%s953_s2 + $0x18] sm:$0xff]  ;;  %v287_v13 = vld [vmem:[%s953_s2 + $0x10] sm:$0xff]  ;;  %v286_v14 = vld [vmem:[%s953_s2 + $0x8] sm:$0xff] }
  0x10   : > { %668 = vmatprep.subr.mxu0 %v298_v2  ;;  %710 = vmatprep.subr.mxu1 %v298_v2  ;;  %v285_v15 = vld [vmem:[%s953_s2] sm:$0xff]  ;;  %v278_v18 = vld [vmem:[%s263_s10 + $0x8] sm:$0xff]  ;;  %v279_v20 = vld [vmem:[%s263_s10 + $0x10] sm:$0xff] }
  0x11   : > { %669 = vmatpush3.msra.mxu0 %v298_v2  ;;  %726 = vmatpush3.msra.mxu1 %v298_v2  ;;  %v277_v16 = vld [vmem:[%s263_s10] sm:$0xff]  ;;  %v282_v19 = vld [vmem:[%s263_s10 + $0x28] sm:$0xff]  ;;  %v283_v21 = vld [vmem:[%s263_s10 + $0x30] sm:$0xff] }
  0x12   : > { %670 = vmatprep.subr.mxu0 %v297_v3  ;;  %711 = vmatprep.subr.mxu1 %v297_v3  ;;  %v281_v17 = vld [vmem:[%s263_s10 + $0x20] sm:$0xff]  ;;  %v280_v22 = vld [vmem:[%s263_s10 + $0x18] sm:$0xff]  ;;  %v418_v27 = vld [vmem:[%s875_s15 + $0x28] sm:$0xff] }
  0x13   : > { %671 = vmatpush3.msra.mxu0 %v297_v3  ;;  %727 = vmatpush3.msra.mxu1 %v297_v3  ;;  %v284_v23 = vld [vmem:[%s263_s10 + $0x38] sm:$0xff]  ;;  %v635_v24 = vld [vmem:[%s954_s3] ss:$0 sm:$0xff]  ;;  %v414_v28 = vld [vmem:[%s875_s15 + $0x8] sm:$0xff] }
  0x14   : > { %672 = vmatprep.subr.mxu0 %v296_v4  ;;  %712 = vmatprep.subr.mxu1 %v296_v4  ;;  %v416_v37 = vld [vmem:[%s875_s15 + $0x18] sm:$0xff]  ;;  %v413_v38 = vld [vmem:[%s875_s15] sm:$0xff]  ;;  %v415_v43 = vld [vmem:[%s875_s15 + $0x10] sm:$0xff] }
  0x15   : > { %673 = vmatpush3.msra.mxu0 %v296_v4  ;;  %728 = vmatpush3.msra.mxu1 %v296_v4  ;;  %v417_v48 = vld [vmem:[%s875_s15 + $0x20] sm:$0xff]  ;;  %v420_v52 = vld [vmem:[%s875_s15 + $0x38] sm:$0xff]  ;;  %v419_v53 = vld [vmem:[%s875_s15 + $0x30] sm:$0xff] }
  0x16   : > { %674 = vmatprep.subr.mxu0 %v295_v5  ;;  %713 = vmatprep.subr.mxu1 %v295_v5 }
  0x17   : > { %675 = vmatpush3.msra.mxu0 %v295_v5  ;;  %729 = vmatpush3.msra.mxu1 %v295_v5 }
  0x18   : > { %676 = vmatprep.subr.mxu0 %v294_v6  ;;  %714 = vmatprep.subr.mxu1 %v294_v6 }
  0x19   : > { %677 = vmatpush3.msra.mxu0 %v294_v6  ;;  %730 = vmatpush3.msra.mxu1 %v294_v6 }
  0x1a   : > { %678 = vmatprep.subr.mxu0 %v293_v7  ;;  %715 = vmatprep.subr.mxu1 %v293_v7 }
  0x1b   : > { %679 = vmatpush3.msra.mxu0 %v293_v7  ;;  %731 = vmatpush3.msra.mxu1 %v293_v7 }
  0x1c   : > { %680 = vmatprep.subr.mxu0 %v292_v8  ;;  %716 = vmatprep.subr.mxu1 %v292_v8 }
  0x1d   : > { %681 = vmatpush3.msra.mxu0 %v292_v8  ;;  %732 = vmatpush3.msra.mxu1 %v292_v8 }
  0x1e   : > { %682 = vmatprep.subr.mxu0 %v291_v9  ;;  %717 = vmatprep.subr.mxu1 %v291_v9 }
  0x1f   : > { %683 = vmatpush3.msra.mxu0 %v291_v9  ;;  %733 = vmatpush3.msra.mxu1 %v291_v9 }
  0x20   : > { %684 = vmatprep.subr.mxu0 %v290_v10  ;;  %718 = vmatprep.subr.mxu1 %v290_v10 }
  0x21   : > { %685 = vmatpush3.msra.mxu0 %v290_v10  ;;  %734 = vmatpush3.msra.mxu1 %v290_v10 }
  0x22   : > { %686 = vmatprep.subr.mxu0 %v289_v11  ;;  %719 = vmatprep.subr.mxu1 %v289_v11 }
  0x23   : > { %687 = vmatpush3.msra.mxu0 %v289_v11  ;;  %735 = vmatpush3.msra.mxu1 %v289_v11 }
  0x24   : > { %688 = vmatprep.subr.mxu0 %v288_v12  ;;  %720 = vmatprep.subr.mxu1 %v288_v12 }
  0x25   : > { %689 = vmatpush3.msra.mxu0 %v288_v12  ;;  %736 = vmatpush3.msra.mxu1 %v288_v12 }
  0x26   : > { %690 = vmatprep.subr.mxu0 %v287_v13  ;;  %721 = vmatprep.subr.mxu1 %v287_v13 }
  0x27   : > { %691 = vmatpush3.msra.mxu0 %v287_v13  ;;  %737 = vmatpush3.msra.mxu1 %v287_v13 }
  0x28   : > { %692 = vmatprep.subr.mxu0 %v286_v14  ;;  %722 = vmatprep.subr.mxu1 %v286_v14 }
  0x29   : > { %693 = vmatpush3.msra.mxu0 %v286_v14  ;;  %738 = vmatpush3.msra.mxu1 %v286_v14 }
  0x2a   : > { %694 = vmatprep.subr.mxu0 %v285_v15  ;;  %723 = vmatprep.subr.mxu1 %v285_v15 }
  0x2b   : > { %695 = vmatpush3.msra.mxu0 %v285_v15  ;;  %739 = vmatpush3.msra.mxu1 %v285_v15 }
  0x2c   : > { %696 = vmatprep.mubr.f32.mxu0 %v277_v16  ;;  %702 = vmatprep.mubr.f32.mxu1 %v281_v17 }
  0x2d   : > { %697 = vmatmul.mubr.f32.vlgmr.msra.gmra.mxu0 %v278_v18  ;;  %703 = vmatmul.mubr.f32.vlgmr.msra.gmra.mxu1 %v282_v19 }
  0x2e   : > { %699 = vmatprep.mubr.f32.mxu0 %v279_v20  ;;  %705 = vmatprep.mubr.f32.mxu1 %v283_v21 }
  0x31   : > { %700 = vmatmul.mubr.f32.gmra.mxu0 %v280_v22  ;;  %706 = vmatmul.mubr.f32.gmra.mxu1 %v284_v23 }
  0xed   : > { %v698_v25 = vpop.f32.mrf.mxu0  ;;  %v704_v26 = vpop.f32.mrf.mxu1 }
  0xee   : > { %v380_v29 = vadd.f32 %v698_v25, %v635_v24  ;;  %v400_v30 = vadd.f32 %v704_v26, %v635_v24 }
  0xef   : > { %v374_v31 = vpop.f32.mrf.mxu0  ;;  %v394_v32 = vpop.f32.mrf.mxu1 }
  0xf0   : > { %v375_v33 = vadd.f32 %v635_v24, %v374_v31  ;;  %v426_v34 = vadd.f32 %v418_v27, %v400_v30  ;;  %v422_v35 = vadd.f32 %v414_v28, %v380_v29  ;;  %v395_v44 = vadd.f32 %v635_v24, %v394_v32 }
  0xf1   : > { %v701_v36 = vpop.f32.mrf.mxu0  ;;  %v707_v39 = vpop.f32.mrf.mxu1 }
  0xf2   : > { %v390_v40 = vadd.f32 %v701_v36, %v635_v24  ;;  %439 = vadd.xlane.f32.xlu1 %v426_v34  ;;  %431 = vadd.xlane.f32.xlu0 %v422_v35  ;;  %v421_v47 = vadd.f32 %v413_v38, %v375_v33  ;;  %v410_v49 = vadd.f32 %v707_v39, %v635_v24 }
  0xf3   : > { %v384_v41 = vpop.f32.mrf.mxu0  ;;  %v404_v42 = vpop.f32.mrf.mxu1  ;;  %v425_v54 = vadd.f32 %v417_v48, %v395_v44 }
  0xf4   : > { %v385_v45 = vadd.f32 %v635_v24, %v384_v41  ;;  %v424_v46 = vadd.f32 %v416_v37, %v390_v40  ;;  %v405_v50 = vadd.f32 %v635_v24, %v404_v42  ;;  %v428_v55 = vadd.f32 %v420_v52, %v410_v49  ;;  %v636_v49 = vld [vmem:[%s955_s4] ss:$0 sm:$0xff] }
  0xf5   : > { %v637_v52 = vld [vmem:[%s956_s5] ss:$0 sm:$0xff] }
  0xf6   : > { %435 = vadd.xlane.f32.xlu1 %v424_v46  ;;  %429 = vadd.xlane.f32.xlu0 %v421_v47  ;;  %v423_v51 = vadd.f32 %v415_v43, %v385_v45  ;;  %v427_v56 = vadd.f32 %v419_v53, %v405_v50 }
  0xfa   : > { %433 = vadd.xlane.f32.xlu1 %v423_v51  ;;  %437 = vadd.xlane.f32.xlu0 %v425_v54 }
  0xfe   : > { %443 = vadd.xlane.f32.xlu1 %v428_v55  ;;  %441 = vadd.xlane.f32.xlu0 %v427_v56 }
 0x17b   : > { %v440_v57 = vpop.xlane.xlu1 %439  ;;  %v432_v58 = vpop.xlane.xlu0 %431 }
 0x17c   : > { %v451_v59 = vmul.f32 0.0078125, %v440_v57  ;;  %v447_v60 = vmul.f32 0.0078125, %v432_v58 }
 0x17e   : > { %v888_v61 = vsub.f32 %v422_v35, %v447_v60  ;;  %v890_v0 = vsub.f32 %v426_v34, %v451_v59 }
 0x17f   : > { %v436_v62 = vpop.xlane.xlu1 %435  ;;  %v430_v63 = vpop.xlane.xlu0 %429 }
 0x180   : > { %v449_v1 = vmul.f32 0.0078125, %v436_v62  ;;  %v446_v2 = vmul.f32 0.0078125, %v430_v63  ;;  %v463_v3 = vmul.f32 %v888_v61, %v888_v61  ;;  %v467_v10 = vmul.f32 %v890_v0, %v890_v0 }
 0x182   : > { %v894_v4 = vsub.f32 %v421_v47, %v446_v2  ;;  %472 = vadd.xlane.f32.xlu1 %v463_v3  ;;  %v896_v5 = vsub.f32 %v424_v46, %v449_v1 }
 0x183   : > { %v434_v6 = vpop.xlane.xlu1 %433  ;;  %v438_v7 = vpop.xlane.xlu0 %437 }
 0x184   : > { %v448_v8 = vmul.f32 0.0078125, %v434_v6  ;;  %v450_v9 = vmul.f32 0.0078125, %v438_v7  ;;  %v462_v11 = vmul.f32 %v894_v4, %v894_v4  ;;  %v465_v15 = vmul.f32 %v896_v5, %v896_v5 }
 0x186   : > { %v902_v12 = vsub.f32 %v425_v54, %v450_v9  ;;  %480 = vadd.xlane.f32.xlu1 %v467_v10  ;;  %470 = vadd.xlane.f32.xlu0 %v462_v11  ;;  %v906_v16 = vsub.f32 %v423_v51, %v448_v8 }
 0x187   : > { %v444_v13 = vpop.xlane.xlu1 %443  ;;  %v442_v14 = vpop.xlane.xlu0 %441 }
 0x188   : > { %v453_v17 = vmul.f32 0.0078125, %v444_v13  ;;  %v452_v18 = vmul.f32 0.0078125, %v442_v14  ;;  %v466_v19 = vmul.f32 %v902_v12, %v902_v12  ;;  %v464_v23 = vmul.f32 %v906_v16, %v906_v16 }
 0x18a   : > { %v910_v20 = vsub.f32 %v428_v55, %v453_v17  ;;  %476 = vadd.xlane.f32.xlu1 %v465_v15  ;;  %478 = vadd.xlane.f32.xlu0 %v466_v19  ;;  %v912_v21 = vsub.f32 %v427_v56, %v452_v18 }
 0x18c   : > { %v469_v22 = vmul.f32 %v910_v20, %v910_v20  ;;  %v468_v24 = vmul.f32 %v912_v21, %v912_v21 }
 0x18e   : > { %484 = vadd.xlane.f32.xlu1 %v469_v22  ;;  %474 = vadd.xlane.f32.xlu0 %v464_v23 }
 0x192   : > { %482 = vadd.xlane.f32.xlu0 %v468_v24 }
 0x20b   : > { %v473_v25 = vpop.xlane.xlu1 %472 }
 0x20c   : > { %v487_v26 = vmul.f32 0.0078125, %v473_v25 }
 0x20e   : > { %v495_v27 = vadd.f32 1e-05, %v487_v26 }
 0x20f   : > { %v481_v28 = vpop.xlane.xlu1 %480  ;;  %v471_v29 = vpop.xlane.xlu0 %470 }
 0x210   : > { %748 = vrsqrt.f32 %v495_v27  ;;  %v491_v30 = vmul.f32 0.0078125, %v481_v28  ;;  %v486_v31 = vmul.f32 0.0078125, %v471_v29 }
 0x212   : > { %v499_v32 = vadd.f32 1e-05, %v491_v30  ;;  %v494_v33 = vadd.f32 1e-05, %v486_v31 }
 0x213   : > { %v477_v34 = vpop.xlane.xlu1 %476  ;;  %v479_v35 = vpop.xlane.xlu0 %478 }
 0x214   : > { %750 = vrsqrt.f32 %v499_v32  ;;  %v489_v36 = vmul.f32 0.0078125, %v477_v34  ;;  %v490_v37 = vmul.f32 0.0078125, %v479_v35 }
 0x215   : > { %752 = vrsqrt.f32 %v494_v33 }
 0x216   : > { %v497_v38 = vadd.f32 1e-05, %v489_v36  ;;  %v498_v39 = vadd.f32 1e-05, %v490_v37 }
 0x217   : > { %v485_v40 = vpop.xlane.xlu1 %484  ;;  %v475_v41 = vpop.xlane.xlu0 %474 }
 0x218   : > { %754 = vrsqrt.f32 %v497_v38  ;;  %v493_v42 = vmul.f32 0.0078125, %v485_v40  ;;  %v488_v43 = vmul.f32 0.0078125, %v475_v41 }
 0x219   : > { %756 = vrsqrt.f32 %v498_v39 }
 0x21a   : > { %v501_v44 = vadd.f32 1e-05, %v493_v42  ;;  %v496_v45 = vadd.f32 1e-05, %v488_v43 }
 0x21b   : > { %v483_v46 = vpop.xlane.xlu0 %482 }
 0x21c   : > { %758 = vrsqrt.f32 %v501_v44  ;;  %v492_v47 = vmul.f32 0.0078125, %v483_v46 }
 0x21d   : > { %v749_v48 = vpop.eup %748  ;;  %760 = vrsqrt.f32 %v496_v45 }
 0x21e   : > { %v511_v50 = vmul.f32 %v749_v48, %v888_v61  ;;  %v500_v51 = vadd.f32 1e-05, %v492_v47 }
 0x220   : > { %v526_v53 = vmul.f32 %v636_v49, %v511_v50  ;;  %762 = vrsqrt.f32 %v500_v51 }
 0x221   : > { %v751_v54 = vpop.eup %750 }
 0x222   : > { %v753_v55 = vpop.eup %752  ;;  %v541_v56 = vadd.f32 %v637_v52, %v526_v53  ;;  %v515_v57 = vmul.f32 %v751_v54, %v890_v0 }
 0x223   : > { %v510_v58 = vmul.f32 %v753_v55, %v894_v4 }
 0x224   : > { %549 = vst [vmem:[%s931_s25 + $0x8] sm:$0xff] %v541_v56  ;;  %v530_v59 = vmul.f32 %v636_v49, %v515_v57 }
 0x225   : > { %v755_v60 = vpop.eup %754  ;;  %v525_v61 = vmul.f32 %v636_v49, %v510_v58 }
 0x226   : > { %v757_v62 = vpop.eup %756  ;;  %v545_v63 = vadd.f32 %v637_v52, %v530_v59  ;;  %v513_v1 = vmul.f32 %v755_v60, %v896_v5 }
 0x227   : > { %v540_v2 = vadd.f32 %v637_v52, %v525_v61  ;;  %v514_v3 = vmul.f32 %v757_v62, %v902_v12 }
 0x228   : > { %553 = vst [vmem:[%s931_s25 + $0x28] sm:$0xff] %v545_v63  ;;  %v528_v6 = vmul.f32 %v636_v49, %v513_v1 }
 0x229   : > { %v759_v7 = vpop.eup %758  ;;  %548 = vst [vmem:[%s931_s25] sm:$0xff] %v540_v2  ;;  %v529_v0 = vmul.f32 %v636_v49, %v514_v3 }
 0x22a   : > { %v761_v4 = vpop.eup %760  ;;  %v543_v8 = vadd.f32 %v637_v52, %v528_v6  ;;  %v517_v9 = vmul.f32 %v759_v7, %v910_v20 }
 0x22b   : > { %v544_v10 = vadd.f32 %v637_v52, %v529_v0  ;;  %v512_v11 = vmul.f32 %v761_v4, %v906_v16 }
 0x22c   : > { %551 = vst [vmem:[%s931_s25 + $0x18] sm:$0xff] %v543_v8  ;;  %v532_v5 = vmul.f32 %v636_v49, %v517_v9 }
 0x22d   : > { %v763_v13 = vpop.eup %762  ;;  %552 = vst [vmem:[%s931_s25 + $0x20] sm:$0xff] %v544_v10  ;;  %v527_v12 = vmul.f32 %v636_v49, %v512_v11 }
 0x22e   : > { %v547_v14 = vadd.f32 %v637_v52, %v532_v5  ;;  %v516_v15 = vmul.f32 %v763_v13, %v912_v21 }
 0x22f   : > { %v542_v17 = vadd.f32 %v637_v52, %v527_v12 }
 0x230   : > { %555 = vst [vmem:[%s931_s25 + $0x38] sm:$0xff] %v547_v14  ;;  %v531_v18 = vmul.f32 %v636_v49, %v516_v15 }
 0x231   : > { %550 = vst [vmem:[%s931_s25 + $0x10] sm:$0xff] %v542_v17 }
 0x232   : > { %v546_v19 = vadd.f32 %v637_v52, %v531_v18 }
 0x234   : > { %554 = vst [vmem:[%s931_s25 + $0x30] sm:$0xff] %v546_v19 }
 0x235 PF: > { %s16_s21 = sadd.s32 1, %s770_s21  }
 0x236   : > { %p13_p4 = scmp.ge.s32.totalorder %s16_s21, 4  }
 0x238   :  { %15 = sbr.rel (!%p13_p4) target bundleno = 1 (0x1), region = 77 }

// kernel: cross_block_forward.11
= control target key start
LH: loop header
LB: loop body
LE: loop exit
PB: predicated region body
PF: predicated region fallthrough
CT: control target
= control target key end

     0   :  { %s2692_s12 = smov 0   ;;  %s3505_s0 = inlined_call_operand.vmem [shape: f32[2,64,128], index: 0, kind: input, shape index: {}]   ;;  %s3506_s1 = inlined_call_operand.vmem [shape: f32[2,64,128], index: 1, kind: input, shape index: {}]   ;;  %s3507_s2 = inlined_call_operand.vmem [shape: f32[2,64,128], index: 2, kind: input, shape index: {}]   ;;  %s3508_s3 = inlined_call_operand.vmem [shape: f32[2,64,128], index: 3, kind: output, shape index: {}]  }
   0x1 LB: > { %s2053_s13 = sadd.s32 4294967295, %s2667_s12   ;;  %p2057_p0 = scmp.ge.s32.totalorder %s2667_s12, 1  ;;  %s2667_s12 = sphi %s2692_s12, %s13_s12  }
   0x2   : > { %p157_p1 = scmp.lt.s32.totalorder %s2667_s12, 3 }
   0x4   : > { %p158_p2 = pnand %p2057_p0, %p157_p1 }
   0x5   : > { %p191_p3 = scmp.lt.s32.totalorder (!%p158_p2), %s2053_s13, 1  ;;  %s2669_s21 = smov (!%p158_p2), 96  }
   0x6   : > { %161 = sbr.rel (%p158_p2) target bundleno = 2077 (0x81d), region = 32  ;;  %s2670_s25 = smov (!%p158_p2), 64  }
   0x7   : > { %s2671_s26 = smov (!%p158_p2), 32  }
   0xb   : > { %s3510_s13 = smov (!%p191_p3, %s2053_s13), 1  ;;  %vm235_vm0 = vcmask 261120   ;;  %vm389_vm1 = vcmask 523264   ;;  %vm1957_vm2 = vcmask 785408  }
   0xc   : > { %s2700_s14 = sshll.u32 %s3510_s13, 6 }
   0xd   : > { %s200_s17 = scalar_lea.vmem %s3506_s1, %s2700_s14  ;;  %s2710_s20 = scalar_lea.vmem %s3505_s0, %s2700_s14 }
   0xe   : > { %v2712_v0 = vld [vmem:[%s200_s17 + $0x38] sm:$0xff]  ;;  %v2714_v1 = vld [vmem:[%s200_s17 + $0x30] sm:$0xff]  ;;  %v2723_v2 = vld [vmem:[%s2710_s20] sm:$0xff]  ;;  %s2814_s24 = scalar_lea.vmem %s3507_s2, %s2700_s14  ;;  %s3461_s29 = scalar_lea.vmem %s3508_s3, %s2700_s14 }
   0xf   : > { %2296 = vmatprep.subr.msk.mxu0 %vm235_vm0, %v2712_v0  ;;  %635 = vrot.lane.b32.xlu1 %v2714_v1, %s2669_s21  ;;  %v2731_v3 = vld [vmem:[%s200_s17 + $0x28] sm:$0xff]  ;;  %v2739_v4 = vld [vmem:[%s200_s17 + $0x20] sm:$0xff]  ;;  %v2747_v5 = vld [vmem:[%s200_s17 + $0x18] sm:$0xff] }
  0x10   : > { %2297 = vmatpush3.xpose.msk.msra.mxu0 %vm235_vm0, %v2712_v0  ;;  %637 = vrot.lane.b32.xlu0 %v2712_v0, %s2669_s21  ;;  %v2749_v6 = vld [vmem:[%s200_s17 + $0x10] sm:$0xff]  ;;  %v2761_v7 = vld [vmem:[%s200_s17 + $0x8] sm:$0xff]  ;;  %v2767_v8 = vld [vmem:[%s200_s17] sm:$0xff] }
  0x11   : > { %2298 = vmatprep.subr.msk.mxu0 %vm235_vm0, %v2714_v1  ;;  %2312 = vmatprep.mubr.msk.f32.mxu0 %vm235_vm0, %v2723_v2  ;;  %v2776_v9 = vld [vmem:[%s2710_s20 + $0x8] sm:$0xff]  ;;  %v2779_v10 = vld [vmem:[%s2710_s20 + $0x10] sm:$0xff]  ;;  %v2786_v11 = vld [vmem:[%s2710_s20 + $0x18] sm:$0xff] }
  0x12   : > { %v2789_v12 = vld [vmem:[%s2710_s20 + $0x20] sm:$0xff]  ;;  %v2796_v13 = vld [vmem:[%s2710_s20 + $0x28] sm:$0xff]  ;;  %v2799_v14 = vld [vmem:[%s2710_s20 + $0x30] sm:$0xff] }
  0x13   : > { %633 = vrot.lane.b32.xlu1 %v2731_v3, %s2669_s21  ;;  %v2806_v15 = vld [vmem:[%s2710_s20 + $0x38] sm:$0xff]  ;;  %v2820_v17 = vld [vmem:[%s2814_s24 + $0x30] sm:$0xff]  ;;  %v2825_v18 = vld [vmem:[%s2814_s24 + $0x28] sm:$0xff] }
  0x14   : > { %2299 = vmatpush3.xpose.msk.msra.mxu0 %vm235_vm0, %v2714_v1  ;;  %v2817_v16 = vld [vmem:[%s2814_s24 + $0x38] sm:$0xff]  ;;  %v2830_v19 = vld [vmem:[%s2814_s24 + $0x20] sm:$0xff]  ;;  %v2840_v21 = vld [vmem:[%s2814_s24 + $0x10] sm:$0xff] }
  0x15   : > { %2300 = vmatprep.subr.msk.mxu0 %vm235_vm0, %v2731_v3  ;;  %2324 = vmatprep.subr.mxu1 %v2817_v16  ;;  %v2835_v20 = vld [vmem:[%s2814_s24 + $0x18] sm:$0xff]  ;;  %v2845_v22 = vld [vmem:[%s2814_s24 + $0x8] sm:$0xff]  ;;  %v2850_v23 = vld [vmem:[%s2814_s24] sm:$0xff] }
  0x16   : > { %2325 = vmatpush3.msra.mxu1 %v2817_v16 }
  0x17   : > { %631 = vrot.lane.b32.xlu1 %v2739_v4, %s2669_s21  ;;  %2326 = vmatprep.subr.mxu1 %v2820_v17 }
  0x18   : > { %2301 = vmatpush3.xpose.msk.msra.mxu0 %vm235_vm0, %v2731_v3  ;;  %2327 = vmatpush3.msra.mxu1 %v2820_v17 }
  0x19   : > { %2302 = vmatprep.subr.msk.mxu0 %vm235_vm0, %v2739_v4  ;;  %2328 = vmatprep.subr.mxu1 %v2825_v18 }
  0x1a   : > { %2329 = vmatpush3.msra.mxu1 %v2825_v18 }
  0x1b   : > { %627 = vrot.lane.b32.xlu1 %v2749_v6, %s2669_s21  ;;  %2330 = vmatprep.subr.mxu1 %v2830_v19 }
  0x1c   : > { %2303 = vmatpush3.xpose.msk.msra.mxu0 %vm235_vm0, %v2739_v4  ;;  %2331 = vmatpush3.msra.mxu1 %v2830_v19 }
  0x1d   : > { %2304 = vmatprep.subr.msk.mxu0 %vm235_vm0, %v2747_v5  ;;  %2332 = vmatprep.subr.mxu1 %v2835_v20 }
  0x1e   : > { %2333 = vmatpush3.msra.mxu1 %v2835_v20 }
  0x1f   : > { %2334 = vmatprep.subr.mxu1 %v2840_v21 }
  0x20   : > { %2305 = vmatpush3.xpose.msk.msra.mxu0 %vm235_vm0, %v2747_v5  ;;  %2335 = vmatpush3.msra.mxu1 %v2840_v21 }
  0x21   : > { %2306 = vmatprep.subr.msk.mxu0 %vm235_vm0, %v2749_v6  ;;  %2336 = vmatprep.subr.mxu1 %v2845_v22 }
  0x22   : > { %2337 = vmatpush3.msra.mxu1 %v2845_v22 }
  0x23   : > { %2338 = vmatprep.subr.mxu1 %v2850_v23 }
  0x24   : > { %2307 = vmatpush3.xpose.msk.msra.mxu0 %vm235_vm0, %v2749_v6  ;;  %2339 = vmatpush3.msra.mxu1 %v2850_v23 }
  0x25   : > { %2308 = vmatprep.subr.msk.mxu0 %vm235_vm0, %v2761_v7 }
  0x28   : > { %2309 = vmatpush3.xpose.msk.msra.mxu0 %vm235_vm0, %v2761_v7 }
  0x29   : > { %2310 = vmatprep.subr.msk.mxu0 %vm235_vm0, %v2767_v8 }
  0x2c   : > { %2311 = vmatpush3.xpose.msk.msra.mxu0 %vm235_vm0, %v2767_v8 }
  0x2f   : > { %2313 = vmatmul.mubr.msk.f32.vlgmr.msra.gmra.mxu0 %vm235_vm0, %v2776_v9 }
  0x30   : > { %2315 = vmatprep.mubr.msk.f32.mxu0 %vm235_vm0, %v2779_v10 }
  0x33   : > { %2316 = vmatmul.mubr.msk.f32.gmra.mxu0 %vm235_vm0, %v2786_v11 }
  0x34   : > { %2318 = vmatprep.mubr.msk.f32.mxu0 %vm235_vm0, %v2789_v12 }
  0x37   : > { %2319 = vmatmul.mubr.msk.f32.gmra.mxu0 %vm235_vm0, %v2796_v13 }
  0x38   : > { %2321 = vmatprep.mubr.msk.f32.mxu0 %vm235_vm0, %v2799_v14 }
  0x3b   : > { %2322 = vmatmul.mubr.msk.f32.gmra.mxu0 %vm235_vm0, %v2806_v15 }
  0x81   : > { %v636_v41 = vpop.permute.xlu1 %635 }
  0x82   : > { %v2854_v24 = vpop.permute.xlu0 %637 }
  0x83   : > { %2352 = vmatprep.subr.msk.mxu1 %vm235_vm0, %v2854_v24 }
  0x85   : > { %v634_v42 = vpop.permute.xlu1 %633 }
  0x89   : > { %v632_v43 = vpop.permute.xlu1 %631 }
  0x8d   : > { %v628_v44 = vpop.permute.xlu1 %627 }
  0xef   : > { %v2314_v25 = vpop.f32.mrf.mxu0 }
  0xf0   : > { %v393_v26 = vsel %vm389_vm1, %v2314_v25, -inf }
  0xf1   : > { %394 = vmax.xlane.f32.xlu0 %v393_v26  ;;  %v350_v27 = vpop.f32.mrf.mxu0 }
  0xf2   : > { %v390_v29 = vsel %vm389_vm1, %v350_v27, -inf }
  0xf3   : > { %v2317_v28 = vpop.f32.mrf.mxu0 }
  0xf4   : > { %v399_v30 = vsel %vm389_vm1, %v2317_v28, -inf }
  0xf5   : > { %391 = vmax.xlane.f32.xlu0 %v390_v29  ;;  %400 = vmax.xlane.f32.xlu1 %v399_v30  ;;  %v360_v31 = vpop.f32.mrf.mxu0 }
  0xf6   : > { %v396_v32 = vsel %vm389_vm1, %v360_v31, -inf }
  0xf7   : > { %v2864_v33 = vpop.f32.mrf.mxu0 }
  0xf8   : > { %v405_v35 = vsel %vm389_vm1, %v2864_v33, -inf }
  0xf9   : > { %397 = vmax.xlane.f32.xlu1 %v396_v32  ;;  %v2866_v34 = vpop.f32.mrf.mxu0 }
  0xfa   : > { %v402_v38 = vsel %vm389_vm1, %v2866_v34, -inf }
  0xfb   : > { %v2870_v36 = vpop.f32.mrf.mxu0 }
  0xfc   : > { %v411_v37 = vsel %vm389_vm1, %v2870_v36, -inf }
  0xfd   : > { %406 = vmax.xlane.f32.xlu1 %v405_v35  ;;  %v2890_v39 = vpop.f32.mrf.mxu0 }
  0xfe   : > { %v408_v40 = vsel %vm389_vm1, %v2890_v39, -inf }
 0x101   : > { %412 = vmax.xlane.f32.xlu1 %v411_v37 }
 0x10b   : > { %629 = vrot.lane.b32.xlu0 %v2747_v5, %s2669_s21 }
 0x112   : > { %623 = vrot.lane.b32.xlu1 %v2767_v8, %s2669_s21 }
 0x116   : > { %609 = vrot.lane.b32.xlu1 %v2776_v9, %s2669_s21 }
 0x11a   : > { %613 = vrot.lane.b32.xlu1 %v2786_v11, %s2669_s21 }
 0x11e   : > { %617 = vrot.lane.b32.xlu1 %v2796_v13, %s2669_s21 }
 0x122   : > { %621 = vrot.lane.b32.xlu1 %v2806_v15, %s2669_s21 }
 0x126   : > { %868 = vrot.lane.b32.xlu1 %v2820_v17, %s2669_s21 }
 0x12a   : > { %403 = vmax.xlane.f32.xlu0 %v402_v38  ;;  %862 = vrot.lane.b32.xlu1 %v2835_v20, %s2669_s21 }
 0x12e   : > { %409 = vmax.xlane.f32.xlu0 %v408_v40  ;;  %858 = vrot.lane.b32.xlu1 %v2845_v22, %s2669_s21 }
 0x132   : > { %1055 = vrot.lane.b32.xlu1 %v2712_v0, %s2670_s25 }
 0x136   : > { %1053 = vrot.lane.b32.xlu1 %v2714_v1, %s2670_s25 }
 0x13a   : > { %1049 = vrot.lane.b32.xlu1 %v2739_v4, %s2670_s25 }
 0x144   : > { %625 = vrot.lane.b32.xlu0 %v2761_v7, %s2669_s21 }
 0x148   : > { %607 = vrot.lane.b32.xlu0 %v2723_v2, %s2669_s21 }
 0x14c   : > { %611 = vrot.lane.b32.xlu0 %v2779_v10, %s2669_s21 }
 0x150   : > { %615 = vrot.lane.b32.xlu0 %v2789_v12, %s2669_s21 }
 0x154   : > { %619 = vrot.lane.b32.xlu0 %v2799_v14, %s2669_s21 }
 0x158   : > { %870 = vrot.lane.b32.xlu0 %v2817_v16, %s2669_s21 }
 0x15c   : > { %866 = vrot.lane.b32.xlu0 %v2825_v18, %s2669_s21 }
 0x160   : > { %864 = vrot.lane.b32.xlu0 %v2830_v19, %s2669_s21 }
 0x164   : > { %860 = vrot.lane.b32.xlu0 %v2840_v21, %s2669_s21 }
 0x168   : > { %856 = vrot.lane.b32.xlu0 %v2850_v23, %s2669_s21 }
 0x16c   : > { %1051 = vrot.lane.b32.xlu0 %v2731_v3, %s2670_s25 }
 0x17a   : > { %v395_v45 = vpop.xlane.xlu0 %394 }
 0x17b   : > { %v415_v46 = vsub.f32 %v2314_v25, %v395_v45 }
 0x17d   : > { %v424_v50 = vmul.f32 1.442695, %v415_v46 }
 0x17e   : > { %v392_v47 = vpop.xlane.xlu0 %391  ;;  %v401_v48 = vpop.xlane.xlu1 %400 }
 0x17f   : > { %v414_v49 = vsub.f32 %v350_v27, %v392_v47  ;;  %v417_v51 = vsub.f32 %v2317_v28, %v401_v48 }
 0x181   : > { %v422_v52 = vmul.f32 1.442695, %v414_v49  ;;  %v428_v55 = vmul.f32 1.442695, %v417_v51 }
 0x182   : > { %v398_v53 = vpop.xlane.xlu1 %397  ;;  %v630_v61 = vpop.permute.xlu0 %629 }
 0x183   : > { %2531 = vpow2.f32 %v422_v52  ;;  %v416_v54 = vsub.f32 %v360_v31, %v398_v53 }
 0x184   : > { %2533 = vpow2.f32 %v424_v50 }
 0x185   : > { %v426_v56 = vmul.f32 1.442695, %v416_v54 }
 0x186   : > { %v407_v62 = vpop.xlane.xlu1 %406 }
 0x187   : > { %2535 = vpow2.f32 %v426_v56  ;;  %v419_v63 = vsub.f32 %v2864_v33, %v407_v62 }
 0x188   : > { %2537 = vpow2.f32 %v428_v55 }
 0x189   : > { %v432_v27 = vmul.f32 1.442695, %v419_v63 }
 0x190   : > { %v2918_v57 = vpop.eup %2531 }
 0x191   : > { %v2920_v58 = vpop.eup %2533  ;;  %2340 = vmatprep.mubr.msk.f32.mxu1 %vm389_vm1, %v2918_v57 }
 0x192   : > { %2341 = vmatmul.mubr.msk.f32.vlgmr.msra.gmra.mxu1 %vm389_vm1, %v2920_v58 }
 0x193   : > { %2353 = vmatpush3.xpose.msk.msra.mxu1 %vm235_vm0, %v2854_v24  ;;  %v413_v24 = vpop.xlane.xlu1 %412 }
 0x194   : > { %v2928_v59 = vpop.eup %2535  ;;  %2354 = vmatprep.subr.msk.mxu1 %vm235_vm0, %v636_v41  ;;  %v421_v28 = vsub.f32 %v2870_v36, %v413_v24 }
 0x195   : > { %v2931_v60 = vpop.eup %2537  ;;  %2343 = vmatprep.mubr.msk.f32.mxu1 %vm389_vm1, %v2928_v59 }
 0x196   : > { %2344 = vmatmul.mubr.msk.f32.gmra.mxu1 %vm389_vm1, %v2931_v60  ;;  %v436_v32 = vmul.f32 1.442695, %v421_v28 }
 0x197   : > { %2355 = vmatpush3.xpose.msk.msra.mxu1 %vm235_vm0, %v636_v41  ;;  %v624_v38 = vpop.permute.xlu1 %623 }
 0x198   : > { %2356 = vmatprep.subr.msk.mxu1 %vm235_vm0, %v634_v42 }
 0x19b   : > { %2357 = vmatpush3.xpose.msk.msra.mxu1 %vm235_vm0, %v634_v42  ;;  %v610_v41 = vpop.permute.xlu1 %609 }
 0x19c   : > { %2358 = vmatprep.subr.msk.mxu1 %vm235_vm0, %v632_v43 }
 0x19f   : > { %2359 = vmatpush3.xpose.msk.msra.mxu1 %vm235_vm0, %v632_v43  ;;  %v614_v43 = vpop.permute.xlu1 %613 }
 0x1a0   : > { %2360 = vmatprep.subr.msk.mxu1 %vm235_vm0, %v630_v61 }
 0x1a3   : > { %2361 = vmatpush3.xpose.msk.msra.mxu1 %vm235_vm0, %v630_v61  ;;  %v618_v45 = vpop.permute.xlu1 %617 }
 0x1a4   : > { %2362 = vmatprep.subr.msk.mxu1 %vm235_vm0, %v628_v44 }
 0x1a7   : > { %2363 = vmatpush3.xpose.msk.msra.mxu1 %vm235_vm0, %v628_v44  ;;  %v622_v47 = vpop.permute.xlu1 %621 }
 0x1ab   : > { %v869_v49 = vpop.permute.xlu1 %868 }
 0x1af   : > { %v863_v52 = vpop.permute.xlu1 %862 }
 0x1b3   : > { %v404_v25 = vpop.xlane.xlu0 %403  ;;  %v859_v54 = vpop.permute.xlu1 %858 }
 0x1b4   : > { %v418_v26 = vsub.f32 %v2866_v34, %v404_v25 }
 0x1b6   : > { %v430_v29 = vmul.f32 1.442695, %v418_v26 }
 0x1b7   : > { %v410_v30 = vpop.xlane.xlu0 %409  ;;  %v2986_v56 = vpop.permute.xlu1 %1055 }
 0x1b8   : > { %2539 = vpow2.f32 %v430_v29  ;;  %v420_v31 = vsub.f32 %v2890_v39, %v410_v30 }
 0x1b9   : > { %2541 = vpow2.f32 %v432_v27 }
 0x1ba   : > { %v434_v35 = vmul.f32 1.442695, %v420_v31 }
 0x1bb   : > { %v626_v37 = vpop.permute.xlu0 %625 }
 0x1bc   : > { %2543 = vpow2.f32 %v434_v35  ;;  %2364 = vmatprep.subr.msk.mxu1 %vm235_vm0, %v626_v37 }
 0x1bd   : > { %2545 = vpow2.f32 %v436_v32  ;;  %2365 = vmatpush3.xpose.msk.msra.mxu1 %vm235_vm0, %v626_v37 }
 0x1be   : > { %2366 = vmatprep.subr.msk.mxu1 %vm235_vm0, %v624_v38 }
 0x1bf   : > { %v608_v36 = vpop.permute.xlu0 %607 }
 0x1c1   : > { %2367 = vmatpush3.xpose.msk.msra.mxu1 %vm235_vm0, %v624_v38 }
 0x1c3   : > { %v612_v42 = vpop.permute.xlu0 %611 }
 0x1c5   : > { %v2954_v33 = vpop.eup %2539 }
 0x1c6   : > { %v2956_v34 = vpop.eup %2541  ;;  %2346 = vmatprep.mubr.msk.f32.mxu1 %vm389_vm1, %v2954_v33 }
 0x1c7   : > { %2347 = vmatmul.mubr.msk.f32.gmra.mxu1 %vm389_vm1, %v2956_v34  ;;  %v616_v44 = vpop.permute.xlu0 %615 }
 0x1c9   : > { %v2962_v39 = vpop.eup %2543 }
 0x1ca   : > { %v2964_v40 = vpop.eup %2545  ;;  %2349 = vmatprep.mubr.msk.f32.mxu1 %vm389_vm1, %v2962_v39 }
 0x1cb   : > { %2350 = vmatmul.mubr.msk.f32.gmra.mxu1 %vm389_vm1, %v2964_v40  ;;  %v620_v46 = vpop.permute.xlu0 %619 }
 0x1cc   : > { %2368 = vmatprep.mubr.msk.f32.mxu1 %vm235_vm0, %v608_v36 }
 0x1cf   : > { %2369 = vmatmul.mubr.msk.f32.vlgmr.msra.gmra.mxu1 %vm235_vm0, %v610_v41  ;;  %v871_v48 = vpop.permute.xlu0 %870 }
 0x1d0   : > { %2371 = vmatprep.mubr.msk.f32.mxu1 %vm235_vm0, %v612_v42  ;;  %2380 = vmatprep.subr.mxu0 %v871_v48 }
 0x1d1   : > { %2381 = vmatpush3.msra.mxu0 %v871_v48 }
 0x1d2   : > { %2382 = vmatprep.subr.mxu0 %v869_v49 }
 0x1d3   : > { %2372 = vmatmul.mubr.msk.f32.gmra.mxu1 %vm235_vm0, %v614_v43  ;;  %v867_v50 = vpop.permute.xlu0 %866  ;;  %2383 = vmatpush3.msra.mxu0 %v869_v49  ;;  %v1054_v49 = vpop.permute.xlu1 %1053 }
 0x1d4   : > { %2374 = vmatprep.mubr.msk.f32.mxu1 %vm235_vm0, %v616_v44  ;;  %2384 = vmatprep.subr.mxu0 %v867_v50 }
 0x1d5   : > { %2385 = vmatpush3.msra.mxu0 %v867_v50 }
 0x1d7   : > { %2375 = vmatmul.mubr.msk.f32.gmra.mxu1 %vm235_vm0, %v618_v45  ;;  %v865_v51 = vpop.permute.xlu0 %864  ;;  %v1050_v50 = vpop.permute.xlu1 %1049 }
 0x1d8   : > { %2377 = vmatprep.mubr.msk.f32.mxu1 %vm235_vm0, %v620_v46  ;;  %2386 = vmatprep.subr.mxu0 %v865_v51 }
 0x1d9   : > { %2387 = vmatpush3.msra.mxu0 %v865_v51 }
 0x1da   : > { %2388 = vmatprep.subr.mxu0 %v863_v52 }
 0x1db   : > { %2378 = vmatmul.mubr.msk.f32.gmra.mxu1 %vm235_vm0, %v622_v47  ;;  %2389 = vmatpush3.msra.mxu0 %v863_v52  ;;  %v861_v53 = vpop.permute.xlu0 %860 }
 0x1dc   : > { %2390 = vmatprep.subr.mxu0 %v861_v53 }
 0x1dd   : > { %2391 = vmatpush3.msra.mxu0 %v861_v53 }
 0x1de   : > { %2392 = vmatprep.subr.mxu0 %v859_v54 }
 0x1df   : > { %2393 = vmatpush3.msra.mxu0 %v859_v54  ;;  %v857_v55 = vpop.permute.xlu0 %856 }
 0x1e0   : > { %2394 = vmatprep.subr.mxu0 %v857_v55 }
 0x1e1   : > { %2395 = vmatpush3.msra.mxu0 %v857_v55 }
 0x1e2   : > { %2408 = vmatprep.subr.msk.mxu0 %vm235_vm0, %v2986_v56 }
 0x1e3   : > { %v1052_v51 = vpop.permute.xlu0 %1051 }
 0x252   : > { %v2990_v61 = vpop.f32.mrf.mxu1 }
 0x254   : > { %v2992_v62 = vpop.f32.mrf.mxu1 }
 0x256   : > { %v2994_v63 = vpop.f32.mrf.mxu1 }
 0x258   : > { %v2996_v24 = vpop.f32.mrf.mxu1 }
 0x287   : > { %v2998_v25 = vpop.f32.mrf.mxu1 }
 0x289   : > { %v3000_v26 = vpop.f32.mrf.mxu1 }
 0x28b   : > { %v3002_v27 = vpop.f32.mrf.mxu1 }
 0x28d   : > { %v3004_v28 = vpop.f32.mrf.mxu1 }
 0x28f   : > { %v2370_v29 = vpop.f32.mrf.mxu1 }
 0x290   : > { %v779_v30 = vsel %vm389_vm1, %v2370_v29, -inf }
 0x291   : > { %780 = vmax.xlane.f32.xlu1 %v779_v30  ;;  %v737_v31 = vpop.f32.mrf.mxu1 }
 0x292   : > { %v776_v32 = vsel %vm389_vm1, %v737_v31, -inf }
 0x293   : > { %777 = vmax.xlane.f32.xlu0 %v776_v32  ;;  %v3012_v35 = vpop.f32.mrf.mxu1 }
 0x294   : > { %v785_v42 = vsel %vm389_vm1, %v3012_v35, -inf }
 0x295   : > { %v3014_v37 = vpop.f32.mrf.mxu1 }
 0x296   : > { %v782_v36 = vsel %vm389_vm1, %v3014_v37, -inf }
 0x297   : > { %v3016_v38 = vpop.f32.mrf.mxu1 }
 0x298   : > { %v791_v45 = vsel %vm389_vm1, %v3016_v38, -inf }
 0x299   : > { %v3020_v41 = vpop.f32.mrf.mxu1 }
 0x29a   : > { %v788_v43 = vsel %vm389_vm1, %v3020_v41, -inf }
 0x29b   : > { %v3026_v44 = vpop.f32.mrf.mxu1 }
 0x29c   : > { %v797_v46 = vsel %vm389_vm1, %v3026_v44, -inf }
 0x29d   : > { %v3046_v47 = vpop.f32.mrf.mxu1 }
 0x29e   : > { %v794_v48 = vsel %vm389_vm1, %v3046_v47, -inf }
 0x2a2   : > { %1045 = vrot.lane.b32.xlu1 %v2749_v6, %s2670_s25 }
 0x2a9   : > { %1047 = vrot.lane.b32.xlu0 %v2747_v5, %s2670_s25 }
 0x2c6   : > { %783 = vmax.xlane.f32.xlu1 %v782_v36 }
 0x2c8   : > { %786 = vmax.xlane.f32.xlu0 %v785_v42 }
 0x2ca   : > { %789 = vmax.xlane.f32.xlu1 %v788_v43 }
 0x2cc   : > { %792 = vmax.xlane.f32.xlu0 %v791_v45 }
 0x2d0   : > { %798 = vmax.xlane.f32.xlu0 %v797_v46 }
 0x2db   : > { %1041 = vrot.lane.b32.xlu1 %v2767_v8, %s2670_s25 }
 0x2e6   : > { %1043 = vrot.lane.b32.xlu0 %v2761_v7, %s2670_s25 }
 0x2ea   : > { %1025 = vrot.lane.b32.xlu0 %v2723_v2, %s2670_s25 }
 0x2ee   : > { %1029 = vrot.lane.b32.xlu0 %v2779_v10, %s2670_s25 }
 0x2f2   : > { %1033 = vrot.lane.b32.xlu0 %v2789_v12, %s2670_s25 }
 0x2f6   : > { %1037 = vrot.lane.b32.xlu0 %v2799_v14, %s2670_s25 }
 0x2fa   : > { %1280 = vrot.lane.b32.xlu0 %v2817_v16, %s2670_s25 }
 0x2fe   : > { %1276 = vrot.lane.b32.xlu0 %v2825_v18, %s2670_s25 }
 0x2ff   : > { %795 = vmax.xlane.f32.xlu1 %v794_v48 }
 0x302   : > { %1274 = vrot.lane.b32.xlu0 %v2830_v19, %s2670_s25 }
 0x306   : > { %1270 = vrot.lane.b32.xlu0 %v2840_v21, %s2670_s25 }
 0x30a   : > { %1266 = vrot.lane.b32.xlu0 %v2850_v23, %s2670_s25 }
 0x30e   : > { %1461 = vrot.lane.b32.xlu0 %v2731_v3, %s2671_s26 }
 0x310   : > { %1027 = vrot.lane.b32.xlu1 %v2776_v9, %s2670_s25 }
 0x314   : > { %1031 = vrot.lane.b32.xlu1 %v2786_v11, %s2670_s25 }
 0x318   : > { %1035 = vrot.lane.b32.xlu1 %v2796_v13, %s2670_s25 }
 0x31a   : > { %v781_v52 = vpop.xlane.xlu1 %780 }
 0x31b   : > { %v801_v53 = vsub.f32 %v2370_v29, %v781_v52 }
 0x31c   : > { %v778_v54 = vpop.xlane.xlu0 %777  ;;  %1039 = vrot.lane.b32.xlu1 %v2806_v15, %s2670_s25 }
 0x31d   : > { %v800_v55 = vsub.f32 %v737_v31, %v778_v54  ;;  %v810_v23 = vmul.f32 1.442695, %v801_v53 }
 0x31e   : > { %v1046_v31 = vpop.permute.xlu1 %1045 }
 0x31f   : > { %v808_v30 = vmul.f32 1.442695, %v800_v55 }
 0x320   : > { %1278 = vrot.lane.b32.xlu1 %v2820_v17, %s2670_s25 }
 0x321   : > { %2547 = vpow2.f32 %v808_v30 }
 0x322   : > { %2549 = vpow2.f32 %v810_v23 }
 0x324   : > { %1272 = vrot.lane.b32.xlu1 %v2835_v20, %s2670_s25 }
 0x328   : > { %1268 = vrot.lane.b32.xlu1 %v2845_v22, %s2670_s25  ;;  %v1048_v22 = vpop.permute.xlu0 %1047 }
 0x32c   : > { %1465 = vrot.lane.b32.xlu1 %v2712_v0, %s2671_s26 }
 0x32e   : > { %v3072_v32 = vpop.eup %2547 }
 0x32f   : > { %v3074_v29 = vpop.eup %2549  ;;  %2396 = vmatprep.mubr.msk.f32.mxu0 %vm389_vm1, %v3072_v32 }
 0x330   : > { %2397 = vmatmul.mubr.msk.f32.vlgmr.msra.gmra.mxu0 %vm389_vm1, %v3074_v29  ;;  %1463 = vrot.lane.b32.xlu1 %v2714_v1, %s2671_s26 }
 0x331   : > { %2409 = vmatpush3.xpose.msk.msra.mxu0 %vm235_vm0, %v2986_v56 }
 0x332   : > { %2410 = vmatprep.subr.msk.mxu0 %vm235_vm0, %v1054_v49 }
 0x334   : > { %1459 = vrot.lane.b32.xlu1 %v2739_v4, %s2671_s26 }
 0x335   : > { %2411 = vmatpush3.xpose.msk.msra.mxu0 %vm235_vm0, %v1054_v49 }
 0x336   : > { %2412 = vmatprep.subr.msk.mxu0 %vm235_vm0, %v1052_v51 }
 0x339   : > { %2413 = vmatpush3.xpose.msk.msra.mxu0 %vm235_vm0, %v1052_v51 }
 0x33a   : > { %2414 = vmatprep.subr.msk.mxu0 %vm235_vm0, %v1050_v50 }
 0x33d   : > { %2415 = vmatpush3.xpose.msk.msra.mxu0 %vm235_vm0, %v1050_v50 }
 0x33e   : > { %2416 = vmatprep.subr.msk.mxu0 %vm235_vm0, %v1048_v22 }
 0x341   : > { %2417 = vmatpush3.xpose.msk.msra.mxu0 %vm235_vm0, %v1048_v22 }
 0x342   : > { %2418 = vmatprep.subr.msk.mxu0 %vm235_vm0, %v1046_v31 }
 0x345   : > { %2419 = vmatpush3.xpose.msk.msra.mxu0 %vm235_vm0, %v1046_v31 }
 0x34f   : > { %v784_v56 = vpop.xlane.xlu1 %783 }
 0x350   : > { %v802_v36 = vsub.f32 %v3014_v37, %v784_v56 }
 0x351   : > { %v787_v42 = vpop.xlane.xlu0 %786 }
 0x352   : > { %v812_v43 = vmul.f32 1.442695, %v802_v36  ;;  %v803_v45 = vsub.f32 %v3012_v35, %v787_v42 }
 0x353   : > { %v790_v46 = vpop.xlane.xlu1 %789 }
 0x354   : > { %2551 = vpow2.f32 %v812_v43  ;;  %v814_v48 = vmul.f32 1.442695, %v803_v45  ;;  %v804_v49 = vsub.f32 %v3020_v41, %v790_v46 }
 0x355   : > { %v793_v50 = vpop.xlane.xlu0 %792 }
 0x356   : > { %2553 = vpow2.f32 %v814_v48  ;;  %v816_v51 = vmul.f32 1.442695, %v804_v49  ;;  %v805_v52 = vsub.f32 %v3016_v38, %v793_v50 }
 0x357   : > { %v1042_v37 = vpop.permute.xlu1 %1041 }
 0x358   : > { %2555 = vpow2.f32 %v816_v51  ;;  %v818_v53 = vmul.f32 1.442695, %v805_v52 }
 0x359   : > { %v799_v54 = vpop.xlane.xlu0 %798 }
 0x35a   : > { %2557 = vpow2.f32 %v818_v53  ;;  %v807_v30 = vsub.f32 %v3026_v44, %v799_v54 }
 0x35c   : > { %v822_v56 = vmul.f32 1.442695, %v807_v30 }
 0x35d   : > { %v1044_v55 = vpop.permute.xlu0 %1043 }
 0x35e   : > { %2420 = vmatprep.subr.msk.mxu0 %vm235_vm0, %v1044_v55 }
 0x35f   : > { %2421 = vmatpush3.xpose.msk.msra.mxu0 %vm235_vm0, %v1044_v55 }
 0x360   : > { %2422 = vmatprep.subr.msk.mxu0 %vm235_vm0, %v1042_v37 }
 0x361   : > { %v3099_v35 = vpop.eup %2551  ;;  %v1026_v42 = vpop.permute.xlu0 %1025 }
 0x362   : > { %2399 = vmatprep.mubr.msk.f32.mxu0 %vm389_vm1, %v3099_v35 }
 0x363   : > { %v3103_v41 = vpop.eup %2553  ;;  %2423 = vmatpush3.xpose.msk.msra.mxu0 %vm235_vm0, %v1042_v37 }
 0x364   : > { %2400 = vmatmul.mubr.msk.f32.gmra.mxu0 %vm389_vm1, %v3103_v41 }
 0x365   : > { %v3108_v38 = vpop.eup %2555  ;;  %v1030_v44 = vpop.permute.xlu0 %1029 }
 0x366   : > { %2402 = vmatprep.mubr.msk.f32.mxu0 %vm389_vm1, %v3108_v38 }
 0x367   : > { %v3112_v23 = vpop.eup %2557 }
 0x368   : > { %2403 = vmatmul.mubr.msk.f32.gmra.mxu0 %vm389_vm1, %v3112_v23 }
 0x369   : > { %v1034_v48 = vpop.permute.xlu0 %1033 }
 0x36d   : > { %v1038_v50 = vpop.permute.xlu0 %1037 }
 0x371   : > { %v1281_v52 = vpop.permute.xlu0 %1280 }
 0x372   : > { %2436 = vmatprep.subr.mxu1 %v1281_v52 }
 0x373   : > { %2437 = vmatpush3.msra.mxu1 %v1281_v52 }
 0x375   : > { %v1277_v54 = vpop.permute.xlu0 %1276 }
 0x379   : > { %v1275_v0 = vpop.permute.xlu0 %1274 }
 0x37d   : > { %v1271_v3 = vpop.permute.xlu0 %1270 }
 0x381   : > { %v1267_v4 = vpop.permute.xlu0 %1266 }
 0x388   : > { %v796_v22 = vpop.xlane.xlu1 %795 }
 0x389   : > { %v806_v31 = vsub.f32 %v3046_v47, %v796_v22 }
 0x38b   : > { %v820_v36 = vmul.f32 1.442695, %v806_v31 }
 0x38c   : > { %v1028_v46 = vpop.permute.xlu1 %1027 }
 0x38d   : > { %2559 = vpow2.f32 %v820_v36 }
 0x38e   : > { %2561 = vpow2.f32 %v822_v56 }
 0x390   : > { %v1032_v47 = vpop.permute.xlu1 %1031 }
 0x394   : > { %v1036_v49 = vpop.permute.xlu1 %1035 }
 0x398   : > { %v1040_v51 = vpop.permute.xlu1 %1039 }
 0x39a   : > { %v3118_v43 = vpop.eup %2559 }
 0x39b   : > { %v3120_v45 = vpop.eup %2561  ;;  %2405 = vmatprep.mubr.msk.f32.mxu0 %vm389_vm1, %v3118_v43 }
 0x39c   : > { %2406 = vmatmul.mubr.msk.f32.gmra.mxu0 %vm389_vm1, %v3120_v45  ;;  %v1279_v53 = vpop.permute.xlu1 %1278 }
 0x39d   : > { %2424 = vmatprep.mubr.msk.f32.mxu0 %vm235_vm0, %v1026_v42  ;;  %2438 = vmatprep.subr.mxu1 %v1279_v53 }
 0x39e   : > { %2439 = vmatpush3.msra.mxu1 %v1279_v53 }
 0x39f   : > { %2440 = vmatprep.subr.mxu1 %v1277_v54 }
 0x3a0   : > { %2425 = vmatmul.mubr.msk.f32.vlgmr.msra.gmra.mxu0 %vm235_vm0, %v1028_v46  ;;  %2441 = vmatpush3.msra.mxu1 %v1277_v54  ;;  %v1273_v55 = vpop.permute.xlu1 %1272 }
 0x3a1   : > { %2427 = vmatprep.mubr.msk.f32.mxu0 %vm235_vm0, %v1030_v44  ;;  %2442 = vmatprep.subr.mxu1 %v1275_v0 }
 0x3a2   : > { %2443 = vmatpush3.msra.mxu1 %v1275_v0 }
 0x3a3   : > { %2444 = vmatprep.subr.mxu1 %v1273_v55 }
 0x3a4   : > { %2428 = vmatmul.mubr.msk.f32.gmra.mxu0 %vm235_vm0, %v1032_v47  ;;  %2445 = vmatpush3.msra.mxu1 %v1273_v55  ;;  %v1269_v1 = vpop.permute.xlu1 %1268 }
 0x3a5   : > { %2430 = vmatprep.mubr.msk.f32.mxu0 %vm235_vm0, %v1034_v48  ;;  %2446 = vmatprep.subr.mxu1 %v1271_v3 }
 0x3a6   : > { %2447 = vmatpush3.msra.mxu1 %v1271_v3 }
 0x3a7   : > { %2448 = vmatprep.subr.mxu1 %v1269_v1 }
 0x3a8   : > { %2431 = vmatmul.mubr.msk.f32.gmra.mxu0 %vm235_vm0, %v1036_v49  ;;  %2449 = vmatpush3.msra.mxu1 %v1269_v1  ;;  %v3142_v37 = vpop.permute.xlu1 %1465 }
 0x3a9   : > { %2433 = vmatprep.mubr.msk.f32.mxu0 %vm235_vm0, %v1038_v50  ;;  %2450 = vmatprep.subr.mxu1 %v1267_v4 }
 0x3aa   : > { %2451 = vmatpush3.msra.mxu1 %v1267_v4 }
 0x3ab   : > { %2464 = vmatprep.subr.msk.mxu1 %vm235_vm0, %v3142_v37 }
 0x3ac   : > { %2434 = vmatmul.mubr.msk.f32.gmra.mxu0 %vm235_vm0, %v1040_v51 }
 0x3f0   : > { %v3146_v30 = vpop.f32.mrf.mxu0 }
 0x3f2   : > { %v3148_v22 = vpop.f32.mrf.mxu0 }
 0x424   : > { %v3150_v31 = vpop.f32.mrf.mxu0 }
 0x426   : > { %v3152_v56 = vpop.f32.mrf.mxu0 }
 0x428   : > { %v3154_v36 = vpop.f32.mrf.mxu0 }
 0x42a   : > { %v3156_v42 = vpop.f32.mrf.mxu0 }
 0x45c   : > { %v3158_v46 = vpop.f32.mrf.mxu0 }
 0x45e   : > { %v3160_v44 = vpop.f32.mrf.mxu0 }
 0x460   : > { %v2426_v47 = vpop.f32.mrf.mxu0 }
 0x461   : > { %v1197_v48 = vsel %vm389_vm1, %v2426_v47, -inf }
 0x462   : > { %1198 = vmax.xlane.f32.xlu1 %v1197_v48  ;;  %v1155_v49 = vpop.f32.mrf.mxu0 }
 0x463   : > { %v1194_v50 = vsel %vm389_vm1, %v1155_v49, -inf }
 0x464   : > { %1195 = vmax.xlane.f32.xlu0 %v1194_v50  ;;  %v3168_v51 = vpop.f32.mrf.mxu0 }
 0x465   : > { %v1203_v55 = vsel %vm389_vm1, %v3168_v51, -inf }
 0x466   : > { %v3170_v52 = vpop.f32.mrf.mxu0 }
 0x467   : > { %v1200_v54 = vsel %vm389_vm1, %v3170_v52, -inf }
 0x468   : > { %v3172_v53 = vpop.f32.mrf.mxu0 }
 0x469   : > { %v1209_v3 = vsel %vm389_vm1, %v3172_v53, -inf }
 0x46a   : > { %v3176_v0 = vpop.f32.mrf.mxu0 }
 0x473   : > { %1455 = vrot.lane.b32.xlu1 %v2749_v6, %s2671_s26  ;;  %v1206_v6 = vsel %vm389_vm1, %v3176_v0, -inf }
 0x47a   : > { %1457 = vrot.lane.b32.xlu0 %v2747_v5, %s2671_s26  ;;  %v3182_v5 = vpop.f32.mrf.mxu0 }
 0x47b   : > { %v1215_v1 = vsel %vm389_vm1, %v3182_v5, -inf }
 0x47c   : > { %v3202_v4 = vpop.f32.mrf.mxu0 }
 0x497   : > { %1201 = vmax.xlane.f32.xlu1 %v1200_v54 }
 0x499   : > { %1204 = vmax.xlane.f32.xlu0 %v1203_v55 }
 0x49b   : > { %1207 = vmax.xlane.f32.xlu1 %v1206_v6 }
 0x49d   : > { %1210 = vmax.xlane.f32.xlu0 %v1209_v3 }
 0x4a1   : > { %1216 = vmax.xlane.f32.xlu0 %v1215_v1 }
 0x4ac   : > { %1451 = vrot.lane.b32.xlu1 %v2767_v8, %s2671_s26 }
 0x4b7   : > { %1453 = vrot.lane.b32.xlu0 %v2761_v7, %s2671_s26  ;;  %v1212_v7 = vsel %vm389_vm1, %v3202_v4, -inf }
 0x4bb   : > { %1435 = vrot.lane.b32.xlu0 %v2723_v2, %s2671_s26  ;;  %v1464_v2 = vpop.permute.xlu1 %1463 }
 0x4bf   : > { %1439 = vrot.lane.b32.xlu0 %v2779_v10, %s2671_s26  ;;  %v1460_v8 = vpop.permute.xlu1 %1459  ;;  %v1462_v10 = vpop.permute.xlu0 %1461 }
 0x4c3   : > { %1443 = vrot.lane.b32.xlu0 %v2789_v12, %s2671_s26 }
 0x4c7   : > { %1447 = vrot.lane.b32.xlu0 %v2799_v14, %s2671_s26 }
 0x4cb   : > { %1690 = vrot.lane.b32.xlu0 %v2817_v16, %s2671_s26 }
 0x4cf   : > { %1682 = vrot.lane.b32.xlu0 %v2835_v20, %s2671_s26 }
 0x4d0   : > { %1213 = vmax.xlane.f32.xlu1 %v1212_v7 }
 0x4e1   : > { %1437 = vrot.lane.b32.xlu1 %v2776_v9, %s2671_s26 }
 0x4e5   : > { %1441 = vrot.lane.b32.xlu1 %v2786_v11, %s2671_s26 }
 0x4e9   : > { %1445 = vrot.lane.b32.xlu1 %v2796_v13, %s2671_s26 }
 0x4eb   : > { %v1199_v12 = vpop.xlane.xlu1 %1198 }
 0x4ec   : > { %v1219_v14 = vsub.f32 %v2426_v47, %v1199_v12 }
 0x4ed   : > { %v1196_v16 = vpop.xlane.xlu0 %1195  ;;  %1449 = vrot.lane.b32.xlu1 %v2806_v15, %s2671_s26 }
 0x4ee   : > { %v1218_v20 = vsub.f32 %v1155_v49, %v1196_v16  ;;  %v1228_v48 = vmul.f32 1.442695, %v1219_v14 }
 0x4ef   : > { %v1456_v15 = vpop.permute.xlu1 %1455 }
 0x4f0   : > { %v1226_v50 = vmul.f32 1.442695, %v1218_v20 }
 0x4f1   : > { %1688 = vrot.lane.b32.xlu1 %v2820_v17, %s2671_s26  ;;  %v1458_v13 = vpop.permute.xlu0 %1457 }
 0x4f2   : > { %2563 = vpow2.f32 %v1226_v50 }
 0x4f3   : > { %2565 = vpow2.f32 %v1228_v48 }
 0x4f5   : > { %1686 = vrot.lane.b32.xlu1 %v2825_v18, %s2671_s26 }
 0x4f9   : > { %1684 = vrot.lane.b32.xlu1 %v2830_v19, %s2671_s26 }
 0x4fd   : > { %1680 = vrot.lane.b32.xlu1 %v2840_v21, %s2671_s26 }
 0x4ff   : > { %v3224_v9 = vpop.eup %2563 }
 0x500   : > { %v3226_v11 = vpop.eup %2565  ;;  %2452 = vmatprep.mubr.msk.f32.mxu1 %vm389_vm1, %v3224_v9 }
 0x501   : > { %2453 = vmatmul.mubr.msk.f32.vlgmr.msra.gmra.mxu1 %vm389_vm1, %v3226_v11 }
 0x502   : > { %2465 = vmatpush3.xpose.msk.msra.mxu1 %vm235_vm0, %v3142_v37 }
 0x503   : > { %2466 = vmatprep.subr.msk.mxu1 %vm235_vm0, %v1464_v2 }
 0x506   : > { %2467 = vmatpush3.xpose.msk.msra.mxu1 %vm235_vm0, %v1464_v2 }
 0x507   : > { %2468 = vmatprep.subr.msk.mxu1 %vm235_vm0, %v1462_v10 }
 0x50a   : > { %2469 = vmatpush3.xpose.msk.msra.mxu1 %vm235_vm0, %v1462_v10 }
 0x50b   : > { %2470 = vmatprep.subr.msk.mxu1 %vm235_vm0, %v1460_v8 }
 0x50e   : > { %2471 = vmatpush3.xpose.msk.msra.mxu1 %vm235_vm0, %v1460_v8 }
 0x50f   : > { %2472 = vmatprep.subr.msk.mxu1 %vm235_vm0, %v1458_v13 }
 0x512   : > { %2473 = vmatpush3.xpose.msk.msra.mxu1 %vm235_vm0, %v1458_v13 }
 0x513   : > { %2474 = vmatprep.subr.msk.mxu1 %vm235_vm0, %v1456_v15 }
 0x516   : > { %2475 = vmatpush3.xpose.msk.msra.mxu1 %vm235_vm0, %v1456_v15 }
 0x520   : > { %v1202_v17 = vpop.xlane.xlu1 %1201 }
 0x521   : > { %v1220_v18 = vsub.f32 %v3170_v52, %v1202_v17 }
 0x522   : > { %v1205_v19 = vpop.xlane.xlu0 %1204 }
 0x523   : > { %v1230_v21 = vmul.f32 1.442695, %v1220_v18  ;;  %v1221_v37 = vsub.f32 %v3168_v51, %v1205_v19 }
 0x524   : > { %v1208_v47 = vpop.xlane.xlu1 %1207 }
 0x525   : > { %2567 = vpow2.f32 %v1230_v21  ;;  %v1232_v49 = vmul.f32 1.442695, %v1221_v37  ;;  %v1222_v54 = vsub.f32 %v3176_v0, %v1208_v47 }
 0x526   : > { %v1211_v55 = vpop.xlane.xlu0 %1210 }
 0x527   : > { %2569 = vpow2.f32 %v1232_v49  ;;  %v1234_v6 = vmul.f32 1.442695, %v1222_v54  ;;  %v1223_v3 = vsub.f32 %v3172_v53, %v1211_v55 }
 0x528   : > { %v1452_v52 = vpop.permute.xlu1 %1451 }
 0x529   : > { %2571 = vpow2.f32 %v1234_v6  ;;  %v1236_v1 = vmul.f32 1.442695, %v1223_v3 }
 0x52a   : > { %v1217_v7 = vpop.xlane.xlu0 %1216 }
 0x52b   : > { %2573 = vpow2.f32 %v1236_v1  ;;  %v1225_v10 = vsub.f32 %v3182_v5, %v1217_v7 }
 0x52d   : > { %v1240_v16 = vmul.f32 1.442695, %v1225_v10 }
 0x52e   : > { %v1454_v2 = vpop.permute.xlu0 %1453 }
 0x52f   : > { %2476 = vmatprep.subr.msk.mxu1 %vm235_vm0, %v1454_v2 }
 0x530   : > { %2477 = vmatpush3.xpose.msk.msra.mxu1 %vm235_vm0, %v1454_v2 }
 0x531   : > { %2478 = vmatprep.subr.msk.mxu1 %vm235_vm0, %v1452_v52 }
 0x532   : > { %v3251_v51 = vpop.eup %2567  ;;  %v1436_v48 = vpop.permute.xlu0 %1435 }
 0x533   : > { %2455 = vmatprep.mubr.msk.f32.mxu1 %vm389_vm1, %v3251_v51 }
 0x534   : > { %v3255_v0 = vpop.eup %2569  ;;  %2479 = vmatpush3.xpose.msk.msra.mxu1 %vm235_vm0, %v1452_v52 }
 0x535   : > { %2456 = vmatmul.mubr.msk.f32.gmra.mxu1 %vm389_vm1, %v3255_v0 }
 0x536   : > { %v3260_v53 = vpop.eup %2571  ;;  %v1440_v15 = vpop.permute.xlu0 %1439 }
 0x537   : > { %2458 = vmatprep.mubr.msk.f32.mxu1 %vm389_vm1, %v3260_v53 }
 0x538   : > { %v3264_v8 = vpop.eup %2573 }
 0x539   : > { %2459 = vmatmul.mubr.msk.f32.gmra.mxu1 %vm389_vm1, %v3264_v8 }
 0x559   : > { %v1214_v12 = vpop.xlane.xlu1 %1213 }
 0x55a   : > { %v1224_v14 = vsub.f32 %v3202_v4, %v1214_v12  ;;  %v1444_v4 = vpop.permute.xlu0 %1443 }
 0x55c   : > { %v1238_v20 = vmul.f32 1.442695, %v1224_v14 }
 0x55d   : > { %v1438_v50 = vpop.permute.xlu1 %1437 }
 0x55e   : > { %2575 = vpow2.f32 %v1238_v20  ;;  %v1448_v19 = vpop.permute.xlu0 %1447 }
 0x55f   : > { %2577 = vpow2.f32 %v1240_v16 }
 0x561   : > { %v1442_v5 = vpop.permute.xlu1 %1441 }
 0x562   : > { %v1691_v37 = vpop.permute.xlu0 %1690 }
 0x563   : > { %2492 = vmatprep.subr.mxu0 %v1691_v37 }
 0x564   : > { %2493 = vmatpush3.msra.mxu0 %v1691_v37 }
 0x565   : > { %v1446_v18 = vpop.permute.xlu1 %1445 }
 0x566   : > { %v1683_v55 = vpop.permute.xlu0 %1682 }
 0x569   : > { %v1450_v21 = vpop.permute.xlu1 %1449 }
 0x56b   : > { %v3270_v13 = vpop.eup %2575 }
 0x56c   : > { %v3272_v17 = vpop.eup %2577  ;;  %2461 = vmatprep.mubr.msk.f32.mxu1 %vm389_vm1, %v3270_v13 }
 0x56d   : > { %2462 = vmatmul.mubr.msk.f32.gmra.mxu1 %vm389_vm1, %v3272_v17  ;;  %v1689_v47 = vpop.permute.xlu1 %1688 }
 0x56e   : > { %2480 = vmatprep.mubr.msk.f32.mxu1 %vm235_vm0, %v1436_v48  ;;  %2494 = vmatprep.subr.mxu0 %v1689_v47 }
 0x56f   : > { %2495 = vmatpush3.msra.mxu0 %v1689_v47 }
 0x571   : > { %2481 = vmatmul.mubr.msk.f32.vlgmr.msra.gmra.mxu1 %vm235_vm0, %v1438_v50  ;;  %v1687_v49 = vpop.permute.xlu1 %1686 }
 0x572   : > { %2483 = vmatprep.mubr.msk.f32.mxu1 %vm235_vm0, %v1440_v15  ;;  %2496 = vmatprep.subr.mxu0 %v1687_v49 }
 0x573   : > { %2497 = vmatpush3.msra.mxu0 %v1687_v49 }
 0x575   : > { %2484 = vmatmul.mubr.msk.f32.gmra.mxu1 %vm235_vm0, %v1442_v5  ;;  %v1685_v54 = vpop.permute.xlu1 %1684 }
 0x576   : > { %2486 = vmatprep.mubr.msk.f32.mxu1 %vm235_vm0, %v1444_v4  ;;  %2498 = vmatprep.subr.mxu0 %v1685_v54 }
 0x577   : > { %2499 = vmatpush3.msra.mxu0 %v1685_v54 }
 0x578   : > { %2500 = vmatprep.subr.mxu0 %v1683_v55 }
 0x579   : > { %2487 = vmatmul.mubr.msk.f32.gmra.mxu1 %vm235_vm0, %v1446_v18  ;;  %v1681_v6 = vpop.permute.xlu1 %1680  ;;  %2501 = vmatpush3.msra.mxu0 %v1683_v55 }
 0x57a   : > { %2489 = vmatprep.mubr.msk.f32.mxu1 %vm235_vm0, %v1448_v19  ;;  %2502 = vmatprep.subr.mxu0 %v1681_v6 }
 0x57b   : > { %2503 = vmatpush3.msra.mxu0 %v1681_v6 }
 0x57d   : > { %2490 = vmatmul.mubr.msk.f32.gmra.mxu1 %vm235_vm0, %v1450_v21 }
 0x5c1   : > { %v3286_v3 = vpop.f32.mrf.mxu1 }
 0x5c3   : > { %v3288_v1 = vpop.f32.mrf.mxu1 }
 0x5f5   : > { %v3290_v7 = vpop.f32.mrf.mxu1 }
 0x5f7   : > { %v3292_v2 = vpop.f32.mrf.mxu1 }
 0x5f9   : > { %v3294_v52 = vpop.f32.mrf.mxu1 }
 0x5fb   : > { %v3296_v10 = vpop.f32.mrf.mxu1 }
 0x62d   : > { %v3298_v12 = vpop.f32.mrf.mxu1 }
 0x62f   : > { %v3300_v14 = vpop.f32.mrf.mxu1 }
 0x631   : > { %v3302_v16 = vpop.f32.mrf.mxu1 }
 0x632   : > { %v1607_v20 = vsel %vm389_vm1, %v3302_v16, -inf }
 0x633   : > { %1608 = vmax.xlane.f32.xlu1 %v1607_v20  ;;  %v3306_v48 = vpop.f32.mrf.mxu1  ;;  %v2659_v20 = vld [vmem:[%s2814_s24] sm:$0xff] }
 0x634   : > { %v1604_v50 = vsel %vm389_vm1, %v3306_v48, -inf }
 0x635   : > { %1605 = vmax.xlane.f32.xlu0 %v1604_v50  ;;  %v3310_v15 = vpop.f32.mrf.mxu1  ;;  %v2660_v50 = vld [vmem:[%s2814_s24 + $0x8] sm:$0xff] }
 0x636   : > { %v1613_v5 = vsel %vm389_vm1, %v3310_v15, -inf }
 0x637   : > { %v3314_v4 = vpop.f32.mrf.mxu1 }
 0x638   : > { %v1610_v37 = vsel %vm389_vm1, %v3314_v4, -inf }
 0x639   : > { %1614 = vmax.xlane.f32.xlu0 %v1613_v5  ;;  %v3316_v18 = vpop.f32.mrf.mxu1  ;;  %v827_v5 = vsel %vm389_vm1, %v3074_v29, 0.0  ;;  %v1245_v29 = vsel %vm389_vm1, %v3226_v11, 0.0  ;;  %v842_v11 = vsel %vm389_vm1, %v3118_v43, 0.0  ;;  %v1260_v43 = vsel %vm389_vm1, %v3270_v13, 0.0 }
 0x63a   : > { %v1619_v19 = vsel %vm389_vm1, %v3316_v18, -inf }
 0x63b   : > { %1620 = vmax.xlane.f32.xlu1 %v1619_v19  ;;  %v3320_v21 = vpop.f32.mrf.mxu1  ;;  %v839_v19 = vsel %vm389_vm1, %v3112_v23, 0.0  ;;  %v833_v23 = vsel %vm389_vm1, %v3103_v41, 0.0  ;;  %v1263_v41 = vsel %vm389_vm1, %v3272_v17, 0.0 }
 0x63c   : > { %v1616_v54 = vsel %vm389_vm1, %v3320_v21, -inf }
 0x63d   : > { %1611 = vmax.xlane.f32.xlu0 %v1610_v37  ;;  %v3324_v47 = vpop.f32.mrf.mxu1  ;;  %v824_v37 = vsel %vm389_vm1, %v3072_v32, 0.0  ;;  %v1251_v32 = vsel %vm389_vm1, %v3255_v0, 0.0  ;;  %v1242_v0 = vsel %vm389_vm1, %v3224_v9, 0.0 }
 0x63e   : > { %v1625_v49 = vsel %vm389_vm1, %v3324_v47, -inf }
 0x63f   : > { %1626 = vmax.xlane.f32.xlu1 %v1625_v49  ;;  %v3330_v55 = vpop.f32.mrf.mxu1  ;;  %v845_v49 = vsel %vm389_vm1, %v3120_v45, 0.0  ;;  %v836_v45 = vsel %vm389_vm1, %v3108_v38, 0.0  ;;  %v1248_v38 = vsel %vm389_vm1, %v3251_v51, 0.0 }
 0x640   : > { %v1622_v6 = vsel %vm389_vm1, %v3330_v55, -inf }
 0x641   : > { %1617 = vmax.xlane.f32.xlu0 %v1616_v54  ;;  %v830_v54 = vsel %vm389_vm1, %v3099_v35, 0.0  ;;  %v1257_v35 = vsel %vm389_vm1, %v3264_v8, 0.0  ;;  %v1254_v8 = vsel %vm389_vm1, %v3260_v53, 0.0 }
 0x645   : > { %1623 = vmax.xlane.f32.xlu0 %v1622_v6 }
 0x650   : > { %1676 = vrot.lane.b32.xlu1 %v2659_v20, %s2671_s26 }
 0x65b   : > { %1678 = vrot.lane.b32.xlu0 %v2660_v50, %s2671_s26 }
 0x674   : > { %828 = vadd.xlane.f32.xlu1 %v827_v5 }
 0x678   : > { %840 = vadd.xlane.f32.xlu1 %v839_v19 }
 0x67a   : > { %825 = vadd.xlane.f32.xlu0 %v824_v37 }
 0x67c   : > { %846 = vadd.xlane.f32.xlu1 %v845_v49 }
 0x67e   : > { %831 = vadd.xlane.f32.xlu0 %v830_v54 }
 0x680   : > { %1246 = vadd.xlane.f32.xlu1 %v1245_v29 }
 0x682   : > { %834 = vadd.xlane.f32.xlu0 %v833_v23 }
 0x684   : > { %1252 = vadd.xlane.f32.xlu1 %v1251_v32 }
 0x686   : > { %837 = vadd.xlane.f32.xlu0 %v836_v45 }
 0x688   : > { %1258 = vadd.xlane.f32.xlu1 %v1257_v35 }
 0x68a   : > { %843 = vadd.xlane.f32.xlu0 %v842_v11 }
 0x68c   : > { %1264 = vadd.xlane.f32.xlu1 %v1263_v41 }
 0x68e   : > { %1243 = vadd.xlane.f32.xlu0 %v1242_v0 }
 0x692   : > { %1249 = vadd.xlane.f32.xlu0 %v1248_v38 }
 0x696   : > { %1255 = vadd.xlane.f32.xlu0 %v1254_v8 }
 0x69a   : > { %1261 = vadd.xlane.f32.xlu0 %v1260_v43 }
 0x6bc   : > { %v1609_v6 = vpop.xlane.xlu1 %1608 }
 0x6bd   : > { %v1629_v17 = vsub.f32 %v3302_v16, %v1609_v6 }
 0x6be   : > { %v1606_v20 = vpop.xlane.xlu0 %1605 }
 0x6bf   : > { %v1638_v50 = vmul.f32 1.442695, %v1629_v17  ;;  %v1628_v9 = vsub.f32 %v3306_v48, %v1606_v20 }
 0x6c1   : > { %2579 = vpow2.f32 %v1638_v50  ;;  %v1636_v5 = vmul.f32 1.442695, %v1628_v9 }
 0x6c2   : > { %v1615_v19 = vpop.xlane.xlu0 %1614 }
 0x6c3   : > { %2581 = vpow2.f32 %v1636_v5  ;;  %v1631_v51 = vsub.f32 %v3310_v15, %v1615_v19 }
 0x6c4   : > { %v1621_v37 = vpop.xlane.xlu1 %1620 }
 0x6c5   : > { %v1642_v53 = vmul.f32 1.442695, %v1631_v51  ;;  %v1633_v49 = vsub.f32 %v3316_v18, %v1621_v37 }
 0x6c6   : > { %v1612_v54 = vpop.xlane.xlu0 %1611 }
 0x6c7   : > { %2583 = vpow2.f32 %v1642_v53  ;;  %v1646_v13 = vmul.f32 1.442695, %v1633_v49  ;;  %v1630_v29 = vsub.f32 %v3314_v4, %v1612_v54  ;;  %v441_v53 = vsel %vm389_vm1, %v2920_v58, 0.0 }
 0x6c8   : > { %v1627_v16 = vpop.xlane.xlu1 %1626  ;;  %v447_v54 = vsel %vm389_vm1, %v2931_v60, 0.0  ;;  %v444_v58 = vsel %vm389_vm1, %v2928_v59, 0.0 }
 0x6c9   : > { %2585 = vpow2.f32 %v1646_v13  ;;  %v1640_v23 = vmul.f32 1.442695, %v1630_v29  ;;  %v1635_v48 = vsub.f32 %v3324_v47, %v1627_v16  ;;  %v438_v13 = vsel %vm389_vm1, %v2918_v57, 0.0 }
 0x6ca   : > { %v1618_v32 = vpop.xlane.xlu0 %1617  ;;  %v453_v29 = vsel %vm389_vm1, %v2956_v34, 0.0  ;;  %v459_v16 = vsel %vm389_vm1, %v2964_v40, 0.0  ;;  %v456_v57 = vsel %vm389_vm1, %v2962_v39, 0.0 }
 0x6cb   : > { %2587 = vpow2.f32 %v1640_v23  ;;  %v1650_v45 = vmul.f32 1.442695, %v1635_v48  ;;  %v1632_v35 = vsub.f32 %v3320_v21, %v1618_v32  ;;  %v450_v23 = vsel %vm389_vm1, %v2954_v33, 0.0 }
 0x6cc   : > { %v1677_v43 = vpop.permute.xlu1 %1676 }
 0x6cd   : > { %2589 = vpow2.f32 %v1650_v45  ;;  %v1644_v15 = vmul.f32 1.442695, %v1632_v35 }
 0x6ce   : > { %v2580_v11 = vpop.eup %2579  ;;  %v1624_v41 = vpop.xlane.xlu0 %1623 }
 0x6cf   : > { %2591 = vpow2.f32 %v1644_v15  ;;  %v1634_v18 = vsub.f32 %v3330_v55, %v1624_v41  ;;  %v1655_v0 = vsel %vm389_vm1, %v2580_v11, 0.0 }
 0x6d0   : > { %v2582_v4 = vpop.eup %2581  ;;  %1656 = vadd.xlane.f32.xlu1 %v1655_v0 }
 0x6d1   : > { %v1648_v38 = vmul.f32 1.442695, %v1634_v18  ;;  %2508 = vmatprep.mubr.msk.f32.mxu0 %vm389_vm1, %v2582_v4  ;;  %v1652_v47 = vsel %vm389_vm1, %v2582_v4, 0.0 }
 0x6d2   : > { %1653 = vadd.xlane.f32.xlu0 %v1652_v47  ;;  %v1679_v8 = vpop.permute.xlu0 %1678 }
 0x6d3   : > { %2593 = vpow2.f32 %v1648_v38  ;;  %2504 = vmatprep.subr.mxu0 %v1679_v8 }
 0x6d4   : > { %v2584_v21 = vpop.eup %2583  ;;  %2505 = vmatpush3.msra.mxu0 %v1679_v8 }
 0x6d5   : > { %2506 = vmatprep.subr.mxu0 %v1677_v43  ;;  %v1661_v6 = vsel %vm389_vm1, %v2584_v21, 0.0 }
 0x6d6   : > { %v2586_v55 = vpop.eup %2585  ;;  %1662 = vadd.xlane.f32.xlu1 %v1661_v6  ;;  %2507 = vmatpush3.msra.mxu0 %v1677_v43 }
 0x6d7   : > { %2509 = vmatmul.mubr.msk.f32.vlgmr.msra.gmra.mxu0 %vm389_vm1, %v2580_v11  ;;  %v1667_v20 = vsel %vm389_vm1, %v2586_v55, 0.0 }
 0x6d8   : > { %v2588_v17 = vpop.eup %2587 }
 0x6d9   : > { %2511 = vmatprep.mubr.msk.f32.mxu0 %vm389_vm1, %v2588_v17  ;;  %v1658_v50 = vsel %vm389_vm1, %v2588_v17, 0.0 }
 0x6da   : > { %v2590_v9 = vpop.eup %2589  ;;  %1668 = vadd.xlane.f32.xlu1 %v1667_v20  ;;  %1659 = vadd.xlane.f32.xlu0 %v1658_v50 }
 0x6db   : > { %2512 = vmatmul.mubr.msk.f32.gmra.mxu0 %vm389_vm1, %v2584_v21  ;;  %v1673_v19 = vsel %vm389_vm1, %v2590_v9, 0.0 }
 0x6dc   : > { %v2592_v5 = vpop.eup %2591 }
 0x6dd   : > { %2514 = vmatprep.mubr.msk.f32.mxu0 %vm389_vm1, %v2592_v5  ;;  %v1664_v51 = vsel %vm389_vm1, %v2592_v5, 0.0 }
 0x6de   : > { %1674 = vadd.xlane.f32.xlu1 %v1673_v19  ;;  %1665 = vadd.xlane.f32.xlu0 %v1664_v51 }
 0x6df   : > { %2515 = vmatmul.mubr.msk.f32.gmra.mxu0 %vm389_vm1, %v2586_v55 }
 0x6e0   : > { %v2594_v37 = vpop.eup %2593 }
 0x6e1   : > { %2517 = vmatprep.mubr.msk.f32.mxu0 %vm389_vm1, %v2594_v37  ;;  %v1670_v49 = vsel %vm389_vm1, %v2594_v37, 0.0 }
 0x6e2   : > { %442 = vadd.xlane.f32.xlu1 %v441_v53  ;;  %1671 = vadd.xlane.f32.xlu0 %v1670_v49 }
 0x6e3   : > { %2518 = vmatmul.mubr.msk.f32.gmra.mxu0 %vm389_vm1, %v2590_v9 }
 0x6e6   : > { %448 = vadd.xlane.f32.xlu1 %v447_v54  ;;  %439 = vadd.xlane.f32.xlu0 %v438_v13 }
 0x6ea   : > { %454 = vadd.xlane.f32.xlu1 %v453_v29  ;;  %445 = vadd.xlane.f32.xlu0 %v444_v58 }
 0x6ee   : > { %460 = vadd.xlane.f32.xlu1 %v459_v16  ;;  %451 = vadd.xlane.f32.xlu0 %v450_v23 }
 0x6f2   : > { %457 = vadd.xlane.f32.xlu0 %v456_v57 }
 0x6fd   : > { %v829_v60 = vpop.xlane.xlu1 %828 }
 0x6fe   : > { %2595 = vrcp.f32 %v829_v60 }
 0x701   : > { %v841_v34 = vpop.xlane.xlu1 %840 }
 0x703   : > { %v826_v48 = vpop.xlane.xlu0 %825 }
 0x704   : > { %2597 = vrcp.f32 %v826_v48 }
 0x705   : > { %v847_v59 = vpop.xlane.xlu1 %846 }
 0x707   : > { %v832_v32 = vpop.xlane.xlu0 %831 }
 0x708   : > { %2599 = vrcp.f32 %v832_v32 }
 0x709   : > { %v1247_v33 = vpop.xlane.xlu1 %1246 }
 0x70b   : > { %v2596_v45 = vpop.eup %2595  ;;  %v835_v35 = vpop.xlane.xlu0 %834 }
 0x70c   : > { %2601 = vrcp.f32 %v835_v35  ;;  %v1018_v40 = vmul.f32 %v2596_v45, %v3146_v30 }
 0x70d   : > { %2603 = vrcp.f32 %v841_v34  ;;  %v1253_v41 = vpop.xlane.xlu1 %1252 }
 0x70e   : > { %1855 = vrot.lane.b32.xlu1 %v1018_v40, %s2671_s26 }
 0x70f   : > { %v838_v15 = vpop.xlane.xlu0 %837 }
 0x710   : > { %2605 = vrcp.f32 %v838_v15 }
 0x711   : > { %v2598_v39 = vpop.eup %2597  ;;  %2607 = vrcp.f32 %v847_v59  ;;  %v1259_v47 = vpop.xlane.xlu1 %1258 }
 0x712   : > { %v1017_v11 = vmul.f32 %v2598_v39, %v3148_v22 }
 0x713   : > { %v844_v18 = vpop.xlane.xlu0 %843 }
 0x714   : > { %2609 = vrcp.f32 %v844_v18  ;;  %1853 = vrot.lane.b32.xlu0 %v1017_v11, %s2671_s26 }
 0x715   : > { %v2600_v0 = vpop.eup %2599  ;;  %2611 = vrcp.f32 %v1247_v33  ;;  %v1265_v17 = vpop.xlane.xlu1 %1264 }
 0x716   : > { %v1019_v4 = vmul.f32 %v2600_v0, %v3152_v56 }
 0x717   : > { %v1244_v30 = vpop.xlane.xlu0 %1243 }
 0x718   : > { %2613 = vrcp.f32 %v1244_v30  ;;  %1857 = vrot.lane.b32.xlu1 %v1019_v4, %s2671_s26 }
 0x719   : > { %v2602_v38 = vpop.eup %2601  ;;  %2615 = vrcp.f32 %v1253_v41 }
 0x71a   : > { %v1020_v8 = vmul.f32 %v2602_v38, %v3150_v31  ;;  %v2604_v43 = vpop.eup %2603 }
 0x71b   : > { %v1250_v22 = vpop.xlane.xlu0 %1249  ;;  %v1022_v6 = vmul.f32 %v2604_v43, %v3154_v36 }
 0x71c   : > { %2617 = vrcp.f32 %v1250_v22  ;;  %1859 = vrot.lane.b32.xlu1 %v1020_v8, %s2671_s26 }
 0x71d   : > { %v2606_v21 = vpop.eup %2605  ;;  %2619 = vrcp.f32 %v1259_v47 }
 0x71e   : > { %v1021_v56 = vmul.f32 %v2606_v21, %v3156_v42  ;;  %v2608_v55 = vpop.eup %2607 }
 0x71f   : > { %v1256_v20 = vpop.xlane.xlu0 %1255  ;;  %v1024_v50 = vmul.f32 %v2608_v55, %v3158_v46 }
 0x720   : > { %2621 = vrcp.f32 %v1256_v20  ;;  %1863 = vrot.lane.b32.xlu1 %v1022_v6, %s2671_s26  ;;  %1861 = vrot.lane.b32.xlu0 %v1021_v56, %s2671_s26 }
 0x721   : > { %v2610_v31 = vpop.eup %2609  ;;  %2623 = vrcp.f32 %v1265_v17 }
 0x722   : > { %v1023_v9 = vmul.f32 %v2610_v31, %v3160_v44  ;;  %v2612_v5 = vpop.eup %2611 }
 0x723   : > { %v1262_v19 = vpop.xlane.xlu0 %1261  ;;  %v1428_v42 = vmul.f32 %v2612_v5, %v3286_v3 }
 0x724   : > { %2625 = vrcp.f32 %v1262_v19  ;;  %1867 = vrot.lane.b32.xlu1 %v1024_v50, %s2671_s26  ;;  %1865 = vrot.lane.b32.xlu0 %v1023_v9, %s2671_s26 }
 0x725   : > { %v2614_v36 = vpop.eup %2613 }
 0x726   : > { %v1427_v51 = vmul.f32 %v2614_v36, %v3288_v1  ;;  %v2616_v37 = vpop.eup %2615 }
 0x727   : > { %v1430_v44 = vmul.f32 %v2616_v37, %v3290_v7 }
 0x728   : > { %1887 = vrot.lane.b32.xlu1 %v1428_v42, %s2670_s25  ;;  %1885 = vrot.lane.b32.xlu0 %v1427_v51, %s2670_s25 }
 0x729   : > { %v2618_v46 = vpop.eup %2617 }
 0x72a   : > { %v1429_v53 = vmul.f32 %v2618_v46, %v3292_v2  ;;  %v2620_v49 = vpop.eup %2619 }
 0x72b   : > { %v1432_v3 = vmul.f32 %v2620_v49, %v3294_v52 }
 0x72c   : > { %1891 = vrot.lane.b32.xlu1 %v1430_v44, %s2670_s25  ;;  %1889 = vrot.lane.b32.xlu0 %v1429_v53, %s2670_s25 }
 0x72d   : > { %v2622_v54 = vpop.eup %2621 }
 0x72e   : > { %v1431_v1 = vmul.f32 %v2622_v54, %v3296_v10  ;;  %v2624_v13 = vpop.eup %2623 }
 0x72f   : > { %v1434_v7 = vmul.f32 %v2624_v13, %v3298_v12 }
 0x730   : > { %1895 = vrot.lane.b32.xlu1 %v1432_v3, %s2670_s25  ;;  %1893 = vrot.lane.b32.xlu0 %v1431_v1, %s2670_s25 }
 0x731   : > { %v2626_v29 = vpop.eup %2625 }
 0x732   : > { %v1433_v2 = vmul.f32 %v2626_v29, %v3300_v14 }
 0x734   : > { %1899 = vrot.lane.b32.xlu1 %v1434_v7, %s2670_s25  ;;  %1897 = vrot.lane.b32.xlu0 %v1433_v2, %s2670_s25 }
 0x759   : > { %v1657_v58 = vpop.xlane.xlu1 %1656 }
 0x75a   : > { %2627 = vrcp.f32 %v1657_v58 }
 0x75b   : > { %v1654_v16 = vpop.xlane.xlu0 %1653 }
 0x75c   : > { %2629 = vrcp.f32 %v1654_v16 }
 0x75f   : > { %v1663_v23 = vpop.xlane.xlu1 %1662 }
 0x760   : > { %2631 = vrcp.f32 %v1663_v23 }
 0x763   : > { %v1660_v52 = vpop.xlane.xlu0 %1659  ;;  %v1669_v10 = vpop.xlane.xlu1 %1668 }
 0x764   : > { %2633 = vrcp.f32 %v1660_v52 }
 0x765   : > { %2635 = vrcp.f32 %v1669_v10 }
 0x767   : > { %v1666_v57 = vpop.xlane.xlu0 %1665  ;;  %v1675_v60 = vpop.xlane.xlu1 %1674 }
 0x768   : > { %2637 = vrcp.f32 %v1666_v57  ;;  %v2628_v14 = vpop.eup %2627 }
 0x769   : > { %2639 = vrcp.f32 %v1675_v60  ;;  %v2630_v59 = vpop.eup %2629 }
 0x76b   : > { %v1672_v12 = vpop.xlane.xlu0 %1671  ;;  %v443_v56 = vpop.xlane.xlu1 %442 }
 0x76c   : > { %2641 = vrcp.f32 %v1672_v12 }
 0x76d   : > { %v2632_v35 = vpop.eup %2631  ;;  %2643 = vrcp.f32 %v443_v56 }
 0x76f   : > { %v449_v55 = vpop.xlane.xlu1 %448  ;;  %v440_v20 = vpop.xlane.xlu0 %439 }
 0x770   : > { %2645 = vrcp.f32 %v440_v20 }
 0x771   : > { %v2634_v15 = vpop.eup %2633  ;;  %2647 = vrcp.f32 %v449_v55 }
 0x772   : > { %v2636_v41 = vpop.eup %2635 }
 0x773   : > { %v455_v17 = vpop.xlane.xlu1 %454  ;;  %v446_v50 = vpop.xlane.xlu0 %445 }
 0x774   : > { %2649 = vrcp.f32 %v446_v50 }
 0x775   : > { %v2638_v4 = vpop.eup %2637  ;;  %2651 = vrcp.f32 %v455_v17 }
 0x776   : > { %v2640_v47 = vpop.eup %2639 }
 0x777   : > { %v461_v31 = vpop.xlane.xlu1 %460  ;;  %v452_v5 = vpop.xlane.xlu0 %451 }
 0x778   : > { %2653 = vrcp.f32 %v452_v5 }
 0x779   : > { %v2642_v22 = vpop.eup %2641  ;;  %2655 = vrcp.f32 %v461_v31 }
 0x77a   : > { %v2644_v7 = vpop.eup %2643 }
 0x77b   : > { %v458_v36 = vpop.xlane.xlu0 %457  ;;  %v600_v16 = vmul.f32 %v2644_v7, %v2990_v61 }
 0x77c   : > { %2657 = vrcp.f32 %v458_v36 }
 0x77d   : > { %v2646_v2 = vpop.eup %2645 }
 0x77e   : > { %v2648_v23 = vpop.eup %2647  ;;  %v599_v57 = vmul.f32 %v2646_v2, %v2992_v62 }
 0x780   : > { %v1856_v9 = vpop.permute.xlu1 %1855 }
 0x781   : > { %v1942_v10 = vsel %vm235_vm0, %v600_v16, %v1856_v9  ;;  %v2650_v60 = vpop.eup %2649 }
 0x786   : > { %v1854_v51 = vpop.permute.xlu0 %1853 }
 0x787   : > { %v1941_v61 = vsel %vm235_vm0, %v599_v57, %v1854_v51 }
 0x78a   : > { %v1858_v19 = vpop.permute.xlu1 %1857 }
 0x78e   : > { %v1860_v42 = vpop.permute.xlu1 %1859 }
 0x792   : > { %v1864_v37 = vpop.permute.xlu1 %1863  ;;  %v1862_v46 = vpop.permute.xlu0 %1861 }
 0x796   : > { %v3450_v44 = vpop.permute.xlu1 %1867  ;;  %v3452_v53 = vpop.permute.xlu0 %1865 }
 0x797   : > { %v2510_v34 = vpop.f32.mrf.mxu0 }
 0x798   : > { %v1838_v48 = vmul.f32 %v2628_v14, %v2510_v34  ;;  %v602_v34 = vmul.f32 %v2648_v23, %v2994_v63 }
 0x799   : > { %v1790_v32 = vpop.f32.mrf.mxu0 }
 0x79a   : > { %v1837_v45 = vmul.f32 %v2630_v59, %v1790_v32  ;;  %1919 = vrot.lane.b32.xlu1 %v1838_v48, %s2669_s21  ;;  %v1888_v49 = vpop.permute.xlu1 %1887  ;;  %v1886_v54 = vpop.permute.xlu0 %1885 }
 0x79b   : > { %v2513_v40 = vpop.f32.mrf.mxu0  ;;  %v1950_v12 = vsel %vm389_vm1, %v1942_v10, %v1888_v49  ;;  %v2652_v59 = vpop.eup %2651  ;;  %v1949_v62 = vsel %vm389_vm1, %v1941_v61, %v1886_v54 }
 0x79c   : > { %v1840_v33 = vmul.f32 %v2632_v35, %v2513_v40  ;;  %1917 = vrot.lane.b32.xlu0 %v1837_v45, %s2669_s21  ;;  %v601_v45 = vmul.f32 %v2650_v60, %v2996_v24  ;;  %v1944_v35 = vsel %vm235_vm0, %v602_v34, %v1860_v42 }
 0x79d   : > { %v1800_v39 = vpop.f32.mrf.mxu0 }
 0x79e   : > { %v1839_v11 = vmul.f32 %v2634_v15, %v1800_v39  ;;  %1923 = vrot.lane.b32.xlu1 %v1840_v33, %s2669_s21  ;;  %v1892_v3 = vpop.permute.xlu1 %1891  ;;  %v1890_v1 = vpop.permute.xlu0 %1889  ;;  %v1943_v39 = vsel %vm235_vm0, %v601_v45, %v1858_v19 }
 0x79f   : > { %v2516_v18 = vpop.f32.mrf.mxu0  ;;  %v2654_v33 = vpop.eup %2653  ;;  %v1952_v15 = vsel %vm389_vm1, %v1944_v35, %v1892_v3  ;;  %v1951_v24 = vsel %vm389_vm1, %v1943_v39, %v1890_v1 }
 0x7a0   : > { %v1842_v0 = vmul.f32 %v2636_v41, %v2516_v18  ;;  %1921 = vrot.lane.b32.xlu0 %v1839_v11, %s2669_s21  ;;  %v604_v11 = vmul.f32 %v2652_v59, %v2998_v25  ;;  %v2656_v18 = vpop.eup %2655 }
 0x7a1   : > { %v1810_v30 = vpop.f32.mrf.mxu0 }
 0x7a2   : > { %v1841_v38 = vmul.f32 %v2638_v4, %v1810_v30  ;;  %1927 = vrot.lane.b32.xlu1 %v1842_v0, %s2669_s21  ;;  %v1896_v13 = vpop.permute.xlu1 %1895  ;;  %v1894_v29 = vpop.permute.xlu0 %1893  ;;  %v1946_v4 = vsel %vm235_vm0, %v604_v11, %v1864_v37  ;;  %v603_v30 = vmul.f32 %v2654_v33, %v3000_v26 }
 0x7a3   : > { %v2519_v8 = vpop.f32.mrf.mxu0 }
 0x7a4   : > { %v1844_v43 = vmul.f32 %v2640_v47, %v2519_v8  ;;  %1925 = vrot.lane.b32.xlu0 %v1841_v38, %s2669_s21  ;;  %v2658_v47 = vpop.eup %2657  ;;  %v1954_v8 = vsel %vm389_vm1, %v1946_v4, %v1896_v13 }
 0x7a5   : > { %v1820_v21 = vpop.f32.mrf.mxu0  ;;  %v605_v55 = vmul.f32 %v2658_v47, %v3004_v28 }
 0x7a6   : > { %v1843_v6 = vmul.f32 %v2642_v22, %v1820_v21  ;;  %1931 = vrot.lane.b32.xlu1 %v1844_v43, %s2669_s21  ;;  %v1900_v58 = vpop.permute.xlu1 %1899  ;;  %v1898_v52 = vpop.permute.xlu0 %1897  ;;  %v1945_v43 = vsel %vm235_vm0, %v603_v30, %v1862_v46  ;;  %v606_v22 = vmul.f32 %v2656_v18, %v3002_v27 }
 0x7a7   : > { %v1947_v27 = vsel %vm235_vm0, %v605_v55, %v3452_v53 }
 0x7a8   : > { %1929 = vrot.lane.b32.xlu0 %v1843_v6, %s2669_s21  ;;  %v1953_v6 = vsel %vm389_vm1, %v1945_v43, %v1894_v29  ;;  %v1948_v56 = vsel %vm235_vm0, %v606_v22, %v3450_v44  ;;  %v1955_v9 = vsel %vm389_vm1, %v1947_v27, %v1898_v52 }
 0x7a9   : > { %v1956_v20 = vsel %vm389_vm1, %v1948_v56, %v1900_v58 }
 0x80c   : > { %v1920_v14 = vpop.permute.xlu1 %1919 }
 0x80d   : > { %v1959_v48 = vsel %vm1957_vm2, %v1950_v12, %v1920_v14 }
 0x80e   : > { %1967 = vst [vmem:[%s3461_s29 + $0x8] sm:$0xff] %v1959_v48  ;;  %v1918_v32 = vpop.permute.xlu0 %1917 }
 0x80f   : > { %v1958_v40 = vsel %vm1957_vm2, %v1949_v62, %v1918_v32 }
 0x810   : > { %1966 = vst [vmem:[%s3461_s29] sm:$0xff] %v1958_v40  ;;  %v1924_v63 = vpop.permute.xlu1 %1923 }
 0x811   : > { %v1961_v41 = vsel %vm1957_vm2, %v1952_v15, %v1924_v63 }
 0x812   : > { %1969 = vst [vmem:[%s3461_s29 + $0x18] sm:$0xff] %v1961_v41  ;;  %v1922_v0 = vpop.permute.xlu0 %1921 }
 0x813   : > { %v1960_v38 = vsel %vm1957_vm2, %v1951_v24, %v1922_v0 }
 0x814   : > { %1968 = vst [vmem:[%s3461_s29 + $0x10] sm:$0xff] %v1960_v38  ;;  %v1928_v25 = vpop.permute.xlu1 %1927 }
 0x815   : > { %v1963_v21 = vsel %vm1957_vm2, %v1954_v8, %v1928_v25 }
 0x816   : > { %1971 = vst [vmem:[%s3461_s29 + $0x28] sm:$0xff] %v1963_v21  ;;  %v1926_v26 = vpop.permute.xlu0 %1925 }
 0x817   : > { %v1962_v17 = vsel %vm1957_vm2, %v1953_v6, %v1926_v26 }
 0x818   : > { %1970 = vst [vmem:[%s3461_s29 + $0x20] sm:$0xff] %v1962_v17  ;;  %v1932_v31 = vpop.permute.xlu1 %1931 }
 0x819   : > { %v1965_v50 = vsel %vm1957_vm2, %v1956_v20, %v1932_v31 }
 0x81a   : > { %1973 = vst [vmem:[%s3461_s29 + $0x38] sm:$0xff] %v1965_v50  ;;  %v1930_v5 = vpop.permute.xlu0 %1929 }
 0x81b   : > { %v1964_v19 = vsel %vm1957_vm2, %v1955_v9, %v1930_v5 }
 0x81c   : > { %1972 = vst [vmem:[%s3461_s29 + $0x30] sm:$0xff] %v1964_v19 }
 0x81d PF: > { %s13_s12 = sadd.s32 1, %s2667_s12  }
 0x81e   : > { %p10_p4 = scmp.ge.s32.totalorder %s13_s12, 4  }
 0x820   :  { %12 = sbr.rel (!%p10_p4) target bundleno = 1 (0x1), region = 68 }

// kernel: cross_block_forward.9
= control target key start
LH: loop header
LB: loop body
LE: loop exit
PB: predicated region body
PF: predicated region fallthrough
CT: control target
= control target key end

     0   :  { %s539_s12 = smov 0   ;;  %s689_s0 = inlined_call_operand.vmem [shape: f32[128,256], index: 0, kind: input, shape index: {}]   ;;  %s690_s1 = inlined_call_operand.vmem [shape: f32[256,128], index: 1, kind: input, shape index: {}]   ;;  %s691_s2 = inlined_call_operand.vmem [shape: f32[1,128], index: 2, kind: input, shape index: {}]   ;;  %s692_s3 = inlined_call_operand.vmem [shape: f32[128,128], index: 3, kind: output, shape index: {}]  }
   0x1 LB: > { %s401_s13 = sadd.s32 4294967295, %s517_s12   ;;  %p405_p0 = scmp.ge.s32.totalorder %s517_s12, 1  ;;  %s517_s12 = sphi %s539_s12, %s13_s12  }
   0x2   : > { %p139_p1 = scmp.lt.s32.totalorder %s517_s12, 3 }
   0x4   : > { %p140_p2 = pnand %p405_p0, %p139_p1 }
   0x5   : > { %s406_s21 = sshll.u32 (!%p140_p2), %s401_s13, 3 }
   0x6   : > { %143 = sbr.rel (%p140_p2) target bundleno = 257 (0x101), region = 32  ;;  %p165_p3 = scmp.lt.s32.totalorder (!%p140_p2), %s406_s21, 15 }
   0xb   : > { %v224_v0 = vld [vmem:[%s690_s1 + $0xf8] sm:$0xff]  ;;  %v223_v2 = vld [vmem:[%s690_s1 + $0xf0] sm:$0xff]  ;;  %v222_v4 = vld [vmem:[%s690_s1 + $0xe8] sm:$0xff]  ;;  %s694_s21 = smov (!%p165_p3, %s406_s21), 15 }
   0xc   : > { %v208_v1 = vld [vmem:[%s690_s1 + $0x78] sm:$0xff]  ;;  %415 = vmatprep.subr.mxu0 %v224_v0  ;;  %471 = vmatprep.subr.mxu1 %v224_v0  ;;  %v207_v3 = vld [vmem:[%s690_s1 + $0x70] sm:$0xff]  ;;  %v206_v5 = vld [vmem:[%s690_s1 + $0x68] sm:$0xff]  ;;  %s414_s18 = sshll.u32 %s694_s21, 4  ;;  %s410_s5 = sshll.u32 %s694_s21, 3 }
   0xd   : > { %416 = vmatpush3.msra.mxu0 %v208_v1  ;;  %487 = vmatpush3.msra.mxu1 %v208_v1  ;;  %v221_v6 = vld [vmem:[%s690_s1 + $0xe0] sm:$0xff]  ;;  %v220_v8 = vld [vmem:[%s690_s1 + $0xd8] sm:$0xff]  ;;  %v219_v10 = vld [vmem:[%s690_s1 + $0xd0] sm:$0xff]  ;;  %s645_s13 = scalar_lea.vmem %s689_s0, %s414_s18  ;;  %s676_s10 = scalar_lea.vmem %s692_s3, %s410_s5 }
   0xe   : > { %417 = vmatprep.subr.mxu0 %v223_v2  ;;  %472 = vmatprep.subr.mxu1 %v223_v2  ;;  %v205_v7 = vld [vmem:[%s690_s1 + $0x60] sm:$0xff]  ;;  %v204_v9 = vld [vmem:[%s690_s1 + $0x58] sm:$0xff]  ;;  %v203_v11 = vld [vmem:[%s690_s1 + $0x50] sm:$0xff] }
   0xf   : > { %418 = vmatpush3.msra.mxu0 %v207_v3  ;;  %488 = vmatpush3.msra.mxu1 %v207_v3  ;;  %v218_v12 = vld [vmem:[%s690_s1 + $0xc8] sm:$0xff]  ;;  %v217_v14 = vld [vmem:[%s690_s1 + $0xc0] sm:$0xff]  ;;  %v216_v16 = vld [vmem:[%s690_s1 + $0xb8] sm:$0xff] }
  0x10   : > { %419 = vmatprep.subr.mxu0 %v222_v4  ;;  %473 = vmatprep.subr.mxu1 %v222_v4  ;;  %v202_v13 = vld [vmem:[%s690_s1 + $0x48] sm:$0xff]  ;;  %v201_v15 = vld [vmem:[%s690_s1 + $0x40] sm:$0xff]  ;;  %v200_v17 = vld [vmem:[%s690_s1 + $0x38] sm:$0xff] }
  0x11   : > { %420 = vmatpush3.msra.mxu0 %v206_v5  ;;  %489 = vmatpush3.msra.mxu1 %v206_v5  ;;  %v215_v18 = vld [vmem:[%s690_s1 + $0xb0] sm:$0xff]  ;;  %v214_v20 = vld [vmem:[%s690_s1 + $0xa8] sm:$0xff]  ;;  %v213_v22 = vld [vmem:[%s690_s1 + $0xa0] sm:$0xff] }
  0x12   : > { %421 = vmatprep.subr.mxu0 %v221_v6  ;;  %474 = vmatprep.subr.mxu1 %v221_v6  ;;  %v199_v19 = vld [vmem:[%s690_s1 + $0x30] sm:$0xff]  ;;  %v198_v21 = vld [vmem:[%s690_s1 + $0x28] sm:$0xff]  ;;  %v197_v23 = vld [vmem:[%s690_s1 + $0x20] sm:$0xff] }
  0x13   : > { %422 = vmatpush3.msra.mxu0 %v205_v7  ;;  %490 = vmatpush3.msra.mxu1 %v205_v7  ;;  %v212_v24 = vld [vmem:[%s690_s1 + $0x98] sm:$0xff]  ;;  %v211_v26 = vld [vmem:[%s690_s1 + $0x90] sm:$0xff]  ;;  %v210_v28 = vld [vmem:[%s690_s1 + $0x88] sm:$0xff] }
  0x14   : > { %423 = vmatprep.subr.mxu0 %v220_v8  ;;  %475 = vmatprep.subr.mxu1 %v220_v8  ;;  %v196_v25 = vld [vmem:[%s690_s1 + $0x18] sm:$0xff]  ;;  %v195_v27 = vld [vmem:[%s690_s1 + $0x10] sm:$0xff]  ;;  %v194_v29 = vld [vmem:[%s690_s1 + $0x8] sm:$0xff] }
  0x15   : > { %424 = vmatpush3.msra.mxu0 %v204_v9  ;;  %491 = vmatpush3.msra.mxu1 %v204_v9  ;;  %v209_v30 = vld [vmem:[%s690_s1 + $0x80] sm:$0xff]  ;;  %v178_v32 = vld [vmem:[%s645_s13 + $0x8] sm:$0xff]  ;;  %v180_v36 = vld [vmem:[%s645_s13 + $0x18] sm:$0xff] }
  0x16   : > { %425 = vmatprep.subr.mxu0 %v219_v10  ;;  %476 = vmatprep.subr.mxu1 %v219_v10  ;;  %v193_v31 = vld [vmem:[%s690_s1] sm:$0xff]  ;;  %v186_v33 = vld [vmem:[%s645_s13 + $0x48] sm:$0xff]  ;;  %v188_v37 = vld [vmem:[%s645_s13 + $0x58] sm:$0xff] }
  0x17   : > { %426 = vmatpush3.msra.mxu0 %v203_v11  ;;  %492 = vmatpush3.msra.mxu1 %v203_v11  ;;  %v177_v34 = vld [vmem:[%s645_s13] sm:$0xff]  ;;  %v179_v38 = vld [vmem:[%s645_s13 + $0x10] sm:$0xff]  ;;  %v182_v40 = vld [vmem:[%s645_s13 + $0x28] sm:$0xff] }
  0x18   : > { %427 = vmatprep.subr.mxu0 %v218_v12  ;;  %477 = vmatprep.subr.mxu1 %v218_v12  ;;  %v185_v35 = vld [vmem:[%s645_s13 + $0x40] sm:$0xff]  ;;  %v187_v39 = vld [vmem:[%s645_s13 + $0x50] sm:$0xff]  ;;  %v190_v41 = vld [vmem:[%s645_s13 + $0x68] sm:$0xff] }
  0x19   : > { %428 = vmatpush3.msra.mxu0 %v202_v13  ;;  %493 = vmatpush3.msra.mxu1 %v202_v13  ;;  %v181_v42 = vld [vmem:[%s645_s13 + $0x20] sm:$0xff]  ;;  %v184_v44 = vld [vmem:[%s645_s13 + $0x38] sm:$0xff]  ;;  %v183_v46 = vld [vmem:[%s645_s13 + $0x30] sm:$0xff] }
  0x1a   : > { %429 = vmatprep.subr.mxu0 %v217_v14  ;;  %478 = vmatprep.subr.mxu1 %v217_v14  ;;  %v189_v43 = vld [vmem:[%s645_s13 + $0x60] sm:$0xff]  ;;  %v192_v45 = vld [vmem:[%s645_s13 + $0x78] sm:$0xff]  ;;  %v191_v47 = vld [vmem:[%s645_s13 + $0x70] sm:$0xff] }
  0x1b   : > { %430 = vmatpush3.msra.mxu0 %v201_v15  ;;  %494 = vmatpush3.msra.mxu1 %v201_v15  ;;  %v411_v50 = vld [vmem:[%s691_s2] ss:$0 sm:$0xff] }
  0x1c   : > { %431 = vmatprep.subr.mxu0 %v216_v16  ;;  %479 = vmatprep.subr.mxu1 %v216_v16 }
  0x1d   : > { %432 = vmatpush3.msra.mxu0 %v200_v17  ;;  %495 = vmatpush3.msra.mxu1 %v200_v17 }
  0x1e   : > { %433 = vmatprep.subr.mxu0 %v215_v18  ;;  %480 = vmatprep.subr.mxu1 %v215_v18 }
  0x1f   : > { %434 = vmatpush3.msra.mxu0 %v199_v19  ;;  %496 = vmatpush3.msra.mxu1 %v199_v19 }
  0x20   : > { %435 = vmatprep.subr.mxu0 %v214_v20  ;;  %481 = vmatprep.subr.mxu1 %v214_v20 }
  0x21   : > { %436 = vmatpush3.msra.mxu0 %v198_v21  ;;  %497 = vmatpush3.msra.mxu1 %v198_v21 }
  0x22   : > { %437 = vmatprep.subr.mxu0 %v213_v22  ;;  %482 = vmatprep.subr.mxu1 %v213_v22 }
  0x23   : > { %438 = vmatpush3.msra.mxu0 %v197_v23  ;;  %498 = vmatpush3.msra.mxu1 %v197_v23 }
  0x24   : > { %439 = vmatprep.subr.mxu0 %v212_v24  ;;  %483 = vmatprep.subr.mxu1 %v212_v24 }
  0x25   : > { %440 = vmatpush3.msra.mxu0 %v196_v25  ;;  %499 = vmatpush3.msra.mxu1 %v196_v25 }
  0x26   : > { %441 = vmatprep.subr.mxu0 %v211_v26  ;;  %484 = vmatprep.subr.mxu1 %v211_v26 }
  0x27   : > { %442 = vmatpush3.msra.mxu0 %v195_v27  ;;  %500 = vmatpush3.msra.mxu1 %v195_v27 }
  0x28   : > { %443 = vmatprep.subr.mxu0 %v210_v28  ;;  %485 = vmatprep.subr.mxu1 %v210_v28 }
  0x29   : > { %444 = vmatpush3.msra.mxu0 %v194_v29  ;;  %501 = vmatpush3.msra.mxu1 %v194_v29 }
  0x2a   : > { %445 = vmatprep.subr.mxu0 %v209_v30  ;;  %486 = vmatprep.subr.mxu1 %v209_v30 }
  0x2b   : > { %446 = vmatpush3.msra.mxu0 %v193_v31  ;;  %502 = vmatpush3.msra.mxu1 %v193_v31 }
  0x2c   : > { %296 = vmatprep.mubr.f32.mxu0 %v178_v32  ;;  %316 = vmatprep.mubr.f32.mxu1 %v186_v33 }
  0x2d   : > { %297 = vmatmul.mubr.f32.vlgmr.msra.gmra.mxu0 %v177_v34  ;;  %317 = vmatmul.mubr.f32.vlgmr.msra.gmra.mxu1 %v185_v35 }
  0x2e   : > { %301 = vmatprep.mubr.f32.mxu0 %v180_v36  ;;  %321 = vmatprep.mubr.f32.mxu1 %v188_v37 }
  0x31   : > { %302 = vmatmul.mubr.f32.gmra.mxu0 %v179_v38  ;;  %322 = vmatmul.mubr.f32.gmra.mxu1 %v187_v39 }
  0x32   : > { %306 = vmatprep.mubr.f32.mxu0 %v182_v40  ;;  %326 = vmatprep.mubr.f32.mxu1 %v190_v41 }
  0x35   : > { %307 = vmatmul.mubr.f32.gmra.mxu0 %v181_v42  ;;  %327 = vmatmul.mubr.f32.gmra.mxu1 %v189_v43 }
  0x36   : > { %311 = vmatprep.mubr.f32.mxu0 %v184_v44  ;;  %331 = vmatprep.mubr.f32.mxu1 %v192_v45 }
  0x39   : > { %312 = vmatmul.mubr.f32.gmra.mxu0 %v183_v46  ;;  %332 = vmatmul.mubr.f32.gmra.mxu1 %v191_v47 }
  0xed   : > { %v447_v48 = vpop.f32.mrf.mxu0  ;;  %v459_v49 = vpop.f32.mrf.mxu1 }
  0xef   : > { %v448_v51 = vpop.f32.mrf.mxu0  ;;  %v460_v52 = vpop.f32.mrf.mxu1 }
  0xf0   : > { %v449_v53 = vadd.f32 %v448_v51, %v447_v48  ;;  %v461_v54 = vadd.f32 %v460_v52, %v459_v49 }
  0xf1   : > { %v450_v55 = vpop.f32.mrf.mxu0  ;;  %v462_v56 = vpop.f32.mrf.mxu1 }
  0xf2   : > { %v299_v57 = vadd.f32 %v449_v53, %v411_v50  ;;  %v319_v58 = vadd.f32 %v461_v54, %v411_v50 }
  0xf3   : > { %v451_v59 = vpop.f32.mrf.mxu0  ;;  %v463_v60 = vpop.f32.mrf.mxu1 }
  0xf4   : > { %337 = vst [vmem:[%s676_s10] sm:$0xff] %v299_v57  ;;  %341 = vst [vmem:[%s676_s10 + $0x20] sm:$0xff] %v319_v58  ;;  %v452_v61 = vadd.f32 %v451_v59, %v450_v55  ;;  %v464_v62 = vadd.f32 %v463_v60, %v462_v56 }
  0xf5   : > { %v453_v63 = vpop.f32.mrf.mxu0  ;;  %v465_v0 = vpop.f32.mrf.mxu1 }
  0xf6   : > { %v304_v1 = vadd.f32 %v452_v61, %v411_v50  ;;  %v324_v2 = vadd.f32 %v464_v62, %v411_v50 }
  0xf7   : > { %v454_v3 = vpop.f32.mrf.mxu0  ;;  %v466_v4 = vpop.f32.mrf.mxu1 }
  0xf8   : > { %338 = vst [vmem:[%s676_s10 + $0x8] sm:$0xff] %v304_v1  ;;  %342 = vst [vmem:[%s676_s10 + $0x28] sm:$0xff] %v324_v2  ;;  %v455_v5 = vadd.f32 %v454_v3, %v453_v63  ;;  %v467_v6 = vadd.f32 %v466_v4, %v465_v0 }
  0xf9   : > { %v456_v7 = vpop.f32.mrf.mxu0  ;;  %v468_v8 = vpop.f32.mrf.mxu1 }
  0xfa   : > { %v309_v9 = vadd.f32 %v455_v5, %v411_v50  ;;  %v329_v10 = vadd.f32 %v467_v6, %v411_v50 }
  0xfb   : > { %v457_v11 = vpop.f32.mrf.mxu0  ;;  %v469_v12 = vpop.f32.mrf.mxu1 }
  0xfc   : > { %339 = vst [vmem:[%s676_s10 + $0x10] sm:$0xff] %v309_v9  ;;  %343 = vst [vmem:[%s676_s10 + $0x30] sm:$0xff] %v329_v10  ;;  %v458_v13 = vadd.f32 %v457_v11, %v456_v7  ;;  %v470_v14 = vadd.f32 %v469_v12, %v468_v8 }
  0xfe   : > { %v314_v15 = vadd.f32 %v458_v13, %v411_v50  ;;  %v334_v16 = vadd.f32 %v470_v14, %v411_v50 }
 0x100   : > { %340 = vst [vmem:[%s676_s10 + $0x18] sm:$0xff] %v314_v15  ;;  %344 = vst [vmem:[%s676_s10 + $0x38] sm:$0xff] %v334_v16 }
 0x101 PF: > { %s13_s12 = sadd.s32 1, %s517_s12  }
 0x102   : > { %p10_p4 = scmp.ge.s32.totalorder %s13_s12, 4  }
 0x104   :  { %12 = sbr.rel (!%p10_p4) target bundleno = 1 (0x1), region = 62 }

// kernel: cross_block_forward.14
= control target key start
LH: loop header
LB: loop body
LE: loop exit
PB: predicated region body
PF: predicated region fallthrough
CT: control target
= control target key end

     0   :  { %s925_s24 = smov 0   ;;  %s1098_s0 = inlined_call_operand.vmem [shape: f32[128,128], index: 0, kind: input, shape index: {}]   ;;  %s1099_s1 = inlined_call_operand.vmem [shape: f32[128,128], index: 1, kind: input, shape index: {}]   ;;  %s1100_s2 = inlined_call_operand.vmem [shape: f32[128,128], index: 2, kind: input, shape index: {}]   ;;  %s1101_s3 = inlined_call_operand.vmem [shape: f32[1,128], index: 3, kind: input, shape index: {}]   ;;  %s1102_s4 = inlined_call_operand.vmem [shape: f32[128,128], index: 4, kind: input, shape index: {}]   ;;  %s1103_s5 = inlined_call_operand.vmem [shape: f32[1,128], index: 5, kind: input, shape index: {}]   ;;  %s1104_s6 = inlined_call_operand.vmem [shape: f32[128,128], index: 6, kind: output, shape index: {0}]   ;;  %s1105_s7 = inlined_call_operand.vmem [shape: f32[128,128], index: 7, kind: output, shape index: {1}]  }
   0x1 LB: > { %s716_s25 = sadd.s32 4294967295, %s883_s24   ;;  %p720_p0 = scmp.ge.s32.totalorder %s883_s24, 1  ;;  %s883_s24 = sphi %s925_s24, %s18_s24  }
   0x2   : > { %p252_p1 = scmp.lt.s32.totalorder %s883_s24, 3 }
   0x4   : > { %p253_p2 = pnand %p720_p0, %p252_p1 }
   0x5   : > { %s721_s29 = sshll.u32 (!%p253_p2), %s716_s25, 3 }
   0x6   : > { %256 = sbr.rel (%p253_p2) target bundleno = 256 (0x100), region = 44  ;;  %p295_p3 = scmp.lt.s32.totalorder (!%p253_p2), %s721_s29, 15 }
   0xb   : > { %v357_v0 = vld [vmem:[%s1100_s2 + $0x78] sm:$0xff]  ;;  %v356_v2 = vld [vmem:[%s1100_s2 + $0x70] sm:$0xff]  ;;  %v355_v4 = vld [vmem:[%s1100_s2 + $0x68] sm:$0xff]  ;;  %s1107_s29 = smov (!%p295_p3, %s721_s29), 15 }
   0xc   : > { %v485_v1 = vld [vmem:[%s1102_s4 + $0x78] sm:$0xff]  ;;  %781 = vmatprep.subr.mxu0 %v357_v0  ;;  %v484_v3 = vld [vmem:[%s1102_s4 + $0x70] sm:$0xff]  ;;  %v483_v5 = vld [vmem:[%s1102_s4 + $0x68] sm:$0xff]  ;;  %s1001_s28 = sshll.u32 %s1107_s29, 3 }
   0xd   : > { %825 = vmatprep.subr.mxu1 %v485_v1  ;;  %782 = vmatpush3.msra.mxu0 %v357_v0  ;;  %v354_v6 = vld [vmem:[%s1100_s2 + $0x60] sm:$0xff]  ;;  %v353_v8 = vld [vmem:[%s1100_s2 + $0x58] sm:$0xff]  ;;  %v352_v10 = vld [vmem:[%s1100_s2 + $0x50] sm:$0xff]  ;;  %s1019_s15 = scalar_lea.vmem %s1098_s0, %s1001_s28  ;;  %s1025_s18 = scalar_lea.vmem %s1099_s1, %s1001_s28 }
   0xe   : > { %826 = vmatpush3.msra.mxu1 %v485_v1  ;;  %783 = vmatprep.subr.mxu0 %v356_v2  ;;  %v482_v7 = vld [vmem:[%s1102_s4 + $0x60] sm:$0xff]  ;;  %v481_v9 = vld [vmem:[%s1102_s4 + $0x58] sm:$0xff]  ;;  %v480_v11 = vld [vmem:[%s1102_s4 + $0x50] sm:$0xff]  ;;  %s1077_s19 = scalar_lea.vmem %s1105_s7, %s1001_s28 }
   0xf   : > { %827 = vmatprep.subr.mxu1 %v484_v3  ;;  %784 = vmatpush3.msra.mxu0 %v356_v2  ;;  %v351_v12 = vld [vmem:[%s1100_s2 + $0x48] sm:$0xff]  ;;  %v350_v14 = vld [vmem:[%s1100_s2 + $0x40] sm:$0xff]  ;;  %v349_v16 = vld [vmem:[%s1100_s2 + $0x38] sm:$0xff] }
  0x10   : > { %828 = vmatpush3.msra.mxu1 %v484_v3  ;;  %785 = vmatprep.subr.mxu0 %v355_v4  ;;  %v479_v13 = vld [vmem:[%s1102_s4 + $0x48] sm:$0xff]  ;;  %v478_v15 = vld [vmem:[%s1102_s4 + $0x40] sm:$0xff]  ;;  %v477_v17 = vld [vmem:[%s1102_s4 + $0x38] sm:$0xff] }
  0x11   : > { %829 = vmatprep.subr.mxu1 %v483_v5  ;;  %786 = vmatpush3.msra.mxu0 %v355_v4  ;;  %v348_v18 = vld [vmem:[%s1100_s2 + $0x30] sm:$0xff]  ;;  %v347_v20 = vld [vmem:[%s1100_s2 + $0x28] sm:$0xff]  ;;  %v346_v22 = vld [vmem:[%s1100_s2 + $0x20] sm:$0xff] }
  0x12   : > { %830 = vmatpush3.msra.mxu1 %v483_v5  ;;  %787 = vmatprep.subr.mxu0 %v354_v6  ;;  %v476_v19 = vld [vmem:[%s1102_s4 + $0x30] sm:$0xff]  ;;  %v475_v21 = vld [vmem:[%s1102_s4 + $0x28] sm:$0xff]  ;;  %v474_v23 = vld [vmem:[%s1102_s4 + $0x20] sm:$0xff] }
  0x13   : > { %831 = vmatprep.subr.mxu1 %v482_v7  ;;  %788 = vmatpush3.msra.mxu0 %v354_v6  ;;  %v345_v24 = vld [vmem:[%s1100_s2 + $0x18] sm:$0xff]  ;;  %v344_v26 = vld [vmem:[%s1100_s2 + $0x10] sm:$0xff]  ;;  %v318_v28 = vld [vmem:[%s1019_s15] sm:$0xff] }
  0x14   : > { %832 = vmatpush3.msra.mxu1 %v482_v7  ;;  %789 = vmatprep.subr.mxu0 %v353_v8  ;;  %v473_v25 = vld [vmem:[%s1102_s4 + $0x18] sm:$0xff]  ;;  %v472_v27 = vld [vmem:[%s1102_s4 + $0x10] sm:$0xff]  ;;  %v326_v29 = vld [vmem:[%s1025_s18] sm:$0xff] }
  0x15   : > { %833 = vmatprep.subr.mxu1 %v481_v9  ;;  %790 = vmatpush3.msra.mxu0 %v353_v8  ;;  %v343_v30 = vld [vmem:[%s1100_s2 + $0x8] sm:$0xff]  ;;  %v342_v32 = vld [vmem:[%s1100_s2] sm:$0xff]  ;;  %v334_v36 = vadd.f32 %v326_v29, %v318_v28  ;;  %v320_v37 = vld [vmem:[%s1019_s15 + $0x10] sm:$0xff] }
  0x16   : > { %834 = vmatpush3.msra.mxu1 %v481_v9  ;;  %791 = vmatprep.subr.mxu0 %v352_v10  ;;  %v471_v31 = vld [vmem:[%s1102_s4 + $0x8] sm:$0xff]  ;;  %v470_v35 = vld [vmem:[%s1102_s4] sm:$0xff]  ;;  %v328_v38 = vld [vmem:[%s1025_s18 + $0x10] sm:$0xff] }
  0x17   : > { %835 = vmatprep.subr.mxu1 %v480_v11  ;;  %792 = vmatpush3.msra.mxu0 %v352_v10  ;;  %v319_v33 = vld [vmem:[%s1019_s15 + $0x8] sm:$0xff]  ;;  %v336_v40 = vadd.f32 %v328_v38, %v320_v37  ;;  %v321_v41 = vld [vmem:[%s1019_s15 + $0x18] sm:$0xff]  ;;  %v322_v43 = vld [vmem:[%s1019_s15 + $0x20] sm:$0xff] }
  0x18   : > { %836 = vmatpush3.msra.mxu1 %v480_v11  ;;  %793 = vmatprep.subr.mxu0 %v351_v12  ;;  %v327_v34 = vld [vmem:[%s1025_s18 + $0x8] sm:$0xff]  ;;  %v329_v42 = vld [vmem:[%s1025_s18 + $0x18] sm:$0xff]  ;;  %v330_v44 = vld [vmem:[%s1025_s18 + $0x20] sm:$0xff] }
  0x19   : > { %837 = vmatprep.subr.mxu1 %v479_v13  ;;  %794 = vmatpush3.msra.mxu0 %v351_v12  ;;  %v335_v39 = vadd.f32 %v327_v34, %v319_v33  ;;  %v337_v45 = vadd.f32 %v329_v42, %v321_v41  ;;  %v338_v46 = vadd.f32 %v330_v44, %v322_v43  ;;  %v323_v47 = vld [vmem:[%s1019_s15 + $0x28] sm:$0xff]  ;;  %v324_v49 = vld [vmem:[%s1019_s15 + $0x30] sm:$0xff]  ;;  %v325_v53 = vld [vmem:[%s1019_s15 + $0x38] sm:$0xff]  ;;  %s1071_s15 = scalar_lea.vmem %s1104_s6, %s1001_s28 }
  0x1a   : > { %838 = vmatpush3.msra.mxu1 %v479_v13  ;;  %795 = vmatprep.subr.mxu0 %v350_v14  ;;  %v331_v48 = vld [vmem:[%s1025_s18 + $0x28] sm:$0xff]  ;;  %v332_v50 = vld [vmem:[%s1025_s18 + $0x30] sm:$0xff]  ;;  %v333_v54 = vld [vmem:[%s1025_s18 + $0x38] sm:$0xff] }
  0x1b   : > { %839 = vmatprep.subr.mxu1 %v478_v15  ;;  %796 = vmatpush3.msra.mxu0 %v350_v14  ;;  %v339_v51 = vadd.f32 %v331_v48, %v323_v47  ;;  %v340_v52 = vadd.f32 %v332_v50, %v324_v49  ;;  %v341_v55 = vadd.f32 %v333_v54, %v325_v53  ;;  %v729_v56 = vld [vmem:[%s1101_s3] ss:$0 sm:$0xff] }
  0x1c   : > { %840 = vmatpush3.msra.mxu1 %v478_v15  ;;  %797 = vmatprep.subr.mxu0 %v349_v16  ;;  %v730_v57 = vld [vmem:[%s1103_s5] ss:$0 sm:$0xff] }
  0x1d   : > { %841 = vmatprep.subr.mxu1 %v477_v17  ;;  %798 = vmatpush3.msra.mxu0 %v349_v16 }
  0x1e   : > { %842 = vmatpush3.msra.mxu1 %v477_v17  ;;  %799 = vmatprep.subr.mxu0 %v348_v18 }
  0x1f   : > { %843 = vmatprep.subr.mxu1 %v476_v19  ;;  %800 = vmatpush3.msra.mxu0 %v348_v18 }
  0x20   : > { %844 = vmatpush3.msra.mxu1 %v476_v19  ;;  %801 = vmatprep.subr.mxu0 %v347_v20 }
  0x21   : > { %845 = vmatprep.subr.mxu1 %v475_v21  ;;  %802 = vmatpush3.msra.mxu0 %v347_v20 }
  0x22   : > { %846 = vmatpush3.msra.mxu1 %v475_v21  ;;  %803 = vmatprep.subr.mxu0 %v346_v22 }
  0x23   : > { %847 = vmatprep.subr.mxu1 %v474_v23  ;;  %804 = vmatpush3.msra.mxu0 %v346_v22 }
  0x24   : > { %848 = vmatpush3.msra.mxu1 %v474_v23  ;;  %805 = vmatprep.subr.mxu0 %v345_v24 }
  0x25   : > { %849 = vmatprep.subr.mxu1 %v473_v25  ;;  %806 = vmatpush3.msra.mxu0 %v345_v24 }
  0x26   : > { %850 = vmatpush3.msra.mxu1 %v473_v25  ;;  %807 = vmatprep.subr.mxu0 %v344_v26 }
  0x27   : > { %851 = vmatprep.subr.mxu1 %v472_v27  ;;  %808 = vmatpush3.msra.mxu0 %v344_v26 }
  0x28   : > { %852 = vmatpush3.msra.mxu1 %v472_v27  ;;  %809 = vmatprep.subr.mxu0 %v343_v30 }
  0x29   : > { %853 = vmatprep.subr.mxu1 %v471_v31  ;;  %810 = vmatpush3.msra.mxu0 %v343_v30 }
  0x2a   : > { %854 = vmatpush3.msra.mxu1 %v471_v31  ;;  %811 = vmatprep.subr.mxu0 %v342_v32 }
  0x2b   : > { %855 = vmatprep.subr.mxu1 %v470_v35  ;;  %812 = vmatpush3.msra.mxu0 %v342_v32 }
  0x2c   : > { %813 = vmatprep.mubr.f32.mxu0 %v334_v36  ;;  %856 = vmatpush3.msra.mxu1 %v470_v35 }
  0x2d   : > { %857 = vmatprep.mubr.f32.mxu1 %v318_v28  ;;  %814 = vmatmul.mubr.f32.vlgmr.msra.gmra.mxu0 %v335_v39 }
  0x2e   : > { %858 = vmatmul.mubr.f32.vlgmr.msra.gmra.mxu1 %v319_v33  ;;  %816 = vmatprep.mubr.f32.mxu0 %v336_v40 }
  0x2f   : > { %860 = vmatprep.mubr.f32.mxu1 %v320_v37 }
  0x31   : > { %817 = vmatmul.mubr.f32.gmra.mxu0 %v337_v45 }
  0x32   : > { %861 = vmatmul.mubr.f32.gmra.mxu1 %v321_v41  ;;  %819 = vmatprep.mubr.f32.mxu0 %v338_v46 }
  0x33   : > { %863 = vmatprep.mubr.f32.mxu1 %v322_v43 }
  0x35   : > { %820 = vmatmul.mubr.f32.gmra.mxu0 %v339_v51 }
  0x36   : > { %864 = vmatmul.mubr.f32.gmra.mxu1 %v323_v47  ;;  %822 = vmatprep.mubr.f32.mxu0 %v340_v52 }
  0x37   : > { %866 = vmatprep.mubr.f32.mxu1 %v324_v49 }
  0x39   : > { %823 = vmatmul.mubr.f32.gmra.mxu0 %v341_v55 }
  0x3a   : > { %867 = vmatmul.mubr.f32.gmra.mxu1 %v325_v53 }
  0xed   : > { %v815_v58 = vpop.f32.mrf.mxu0 }
  0xee   : > { %v859_v59 = vpop.f32.mrf.mxu1  ;;  %v437_v60 = vadd.f32 %v815_v58, %v729_v56 }
  0xef   : > { %v565_v61 = vadd.f32 %v859_v59, %v730_v57  ;;  %v431_v62 = vpop.f32.mrf.mxu0 }
  0xf0   : > { %v559_v63 = vpop.f32.mrf.mxu1  ;;  %599 = vst [vmem:[%s1071_s15 + $0x8] sm:$0xff] %v437_v60  ;;  %v432_v0 = vadd.f32 %v729_v56, %v431_v62 }
  0xf1   : > { %607 = vst [vmem:[%s1077_s19 + $0x8] sm:$0xff] %v565_v61  ;;  %v560_v1 = vadd.f32 %v730_v57, %v559_v63  ;;  %v818_v2 = vpop.f32.mrf.mxu0 }
  0xf2   : > { %v862_v3 = vpop.f32.mrf.mxu1  ;;  %598 = vst [vmem:[%s1071_s15] sm:$0xff] %v432_v0  ;;  %v447_v4 = vadd.f32 %v818_v2, %v729_v56 }
  0xf3   : > { %606 = vst [vmem:[%s1077_s19] sm:$0xff] %v560_v1  ;;  %v575_v5 = vadd.f32 %v862_v3, %v730_v57  ;;  %v441_v6 = vpop.f32.mrf.mxu0 }
  0xf4   : > { %v569_v7 = vpop.f32.mrf.mxu1  ;;  %601 = vst [vmem:[%s1071_s15 + $0x18] sm:$0xff] %v447_v4  ;;  %v442_v8 = vadd.f32 %v729_v56, %v441_v6 }
  0xf5   : > { %609 = vst [vmem:[%s1077_s19 + $0x18] sm:$0xff] %v575_v5  ;;  %v570_v9 = vadd.f32 %v730_v57, %v569_v7  ;;  %v821_v10 = vpop.f32.mrf.mxu0 }
  0xf6   : > { %v865_v11 = vpop.f32.mrf.mxu1  ;;  %600 = vst [vmem:[%s1071_s15 + $0x10] sm:$0xff] %v442_v8  ;;  %v457_v12 = vadd.f32 %v821_v10, %v729_v56 }
  0xf7   : > { %608 = vst [vmem:[%s1077_s19 + $0x10] sm:$0xff] %v570_v9  ;;  %v585_v13 = vadd.f32 %v865_v11, %v730_v57  ;;  %v451_v14 = vpop.f32.mrf.mxu0 }
  0xf8   : > { %v579_v15 = vpop.f32.mrf.mxu1  ;;  %603 = vst [vmem:[%s1071_s15 + $0x28] sm:$0xff] %v457_v12  ;;  %v452_v16 = vadd.f32 %v729_v56, %v451_v14 }
  0xf9   : > { %611 = vst [vmem:[%s1077_s19 + $0x28] sm:$0xff] %v585_v13  ;;  %v580_v17 = vadd.f32 %v730_v57, %v579_v15  ;;  %v824_v18 = vpop.f32.mrf.mxu0 }
  0xfa   : > { %v868_v19 = vpop.f32.mrf.mxu1  ;;  %602 = vst [vmem:[%s1071_s15 + $0x20] sm:$0xff] %v452_v16  ;;  %v467_v20 = vadd.f32 %v824_v18, %v729_v56 }
  0xfb   : > { %610 = vst [vmem:[%s1077_s19 + $0x20] sm:$0xff] %v580_v17  ;;  %v595_v21 = vadd.f32 %v868_v19, %v730_v57  ;;  %v461_v22 = vpop.f32.mrf.mxu0 }
  0xfc   : > { %v589_v23 = vpop.f32.mrf.mxu1  ;;  %605 = vst [vmem:[%s1071_s15 + $0x38] sm:$0xff] %v467_v20  ;;  %v462_v24 = vadd.f32 %v729_v56, %v461_v22 }
  0xfd   : > { %613 = vst [vmem:[%s1077_s19 + $0x38] sm:$0xff] %v595_v21  ;;  %v590_v25 = vadd.f32 %v730_v57, %v589_v23 }
  0xfe   : > { %604 = vst [vmem:[%s1071_s15 + $0x30] sm:$0xff] %v462_v24 }
  0xff   : > { %612 = vst [vmem:[%s1077_s19 + $0x30] sm:$0xff] %v590_v25 }
 0x100 PF: > { %s18_s24 = sadd.s32 1, %s883_s24  }
 0x101   : > { %p15_p4 = scmp.ge.s32.totalorder %s18_s24, 4  }
 0x103   :  { %17 = sbr.rel (!%p15_p4) target bundleno = 1 (0x1), region = 89 }

// kernel: cross_block_forward.17
= control target key start
LH: loop header
LB: loop body
LE: loop exit
PB: predicated region body
PF: predicated region fallthrough
CT: control target
= control target key end

     0   :  { %s1634_s24 = smov 0   ;;  %s2470_s0 = inlined_call_operand.vmem [shape: f32[128,128], index: 0, kind: input, shape index: {}]   ;;  %s2471_s1 = inlined_call_operand.vmem [shape: f32[128,512], index: 1, kind: input, shape index: {}]   ;;  %s2472_s2 = inlined_call_operand.vmem [shape: f32[1,512], index: 2, kind: input, shape index: {}]   ;;  %s2473_s3 = inlined_call_operand.vmem [shape: f32[512,128], index: 3, kind: input, shape index: {}]   ;;  %s2474_s4 = inlined_call_operand.vmem [shape: f32[1,128], index: 4, kind: input, shape index: {}]   ;;  %s2475_s5 = inlined_call_operand.vmem [shape: f32[1,128], index: 5, kind: input, shape index: {}]   ;;  %s2476_s6 = inlined_call_operand.vmem [shape: f32[1,128], index: 6, kind: input, shape index: {}]   ;;  %s2477_s7 = inlined_call_operand.vmem [shape: f32[128,128], index: 7, kind: output, shape index: {}]  }
   0x1 LB: > { %s1362_s25 = sadd.s32 4294967295, %s1591_s24   ;;  %p1366_p0 = scmp.ge.s32.totalorder %s1591_s24, 1  ;;  %s1591_s24 = sphi %s1634_s24, %s17_s24  }
   0x2   : > { %p238_p1 = scmp.lt.s32.totalorder %s1591_s24, 3 }
   0x4   : > { %p239_p2 = pnand %p1366_p0, %p238_p1 }
   0x6   : > { %242 = sbr.rel (%p239_p2) target bundleno = 839 (0x347), region = 48 }
   0xb   : > { %v351_v0 = vld [vmem:[%s2471_s1 + $0x1e8] sm:$0xff]  ;;  %v353_v1 = vld [vmem:[%s2471_s1 + $0x1f8] sm:$0xff]  ;;  %v350_v2 = vld [vmem:[%s2471_s1 + $0x1e0] sm:$0xff]  ;;  %s1746_s8 = sshll.u32 %s1362_s25, 3 }
   0xc   : > { %376 = vmatprep.subr.mxu0 %v351_v0  ;;  %489 = vmatprep.subr.mxu1 %v353_v1  ;;  %v352_v3 = vld [vmem:[%s2471_s1 + $0x1f0] sm:$0xff]  ;;  %v347_v4 = vld [vmem:[%s2471_s1 + $0x1c8] sm:$0xff]  ;;  %v349_v5 = vld [vmem:[%s2471_s1 + $0x1d8] sm:$0xff]  ;;  %p271_p3 = scmp.lt.s32.totalorder %s1746_s8, 15  ;;  %v1593_v1 = vmov 0.0  }
   0xd   : > { %377 = vmatpush1.msra.mxu0 %v350_v2  ;;  %490 = vmatpush1.msra.mxu1 %v352_v3  ;;  %v346_v6 = vld [vmem:[%s2471_s1 + $0x1c0] sm:$0xff]  ;;  %v348_v7 = vld [vmem:[%s2471_s1 + $0x1d0] sm:$0xff]  ;;  %v343_v8 = vld [vmem:[%s2471_s1 + $0x1a8] sm:$0xff] }
   0xe   : > { %378 = vmatprep.subr.mxu0 %v347_v4  ;;  %491 = vmatprep.subr.mxu1 %v349_v5  ;;  %v345_v9 = vld [vmem:[%s2471_s1 + $0x1b8] sm:$0xff]  ;;  %v342_v10 = vld [vmem:[%s2471_s1 + $0x1a0] sm:$0xff]  ;;  %v344_v11 = vld [vmem:[%s2471_s1 + $0x1b0] sm:$0xff]  ;;  %s2485_s8 = smov (!%p271_p3, %s1746_s8), 15 }
   0xf   : > { %379 = vmatpush1.msra.mxu0 %v346_v6  ;;  %492 = vmatpush1.msra.mxu1 %v348_v7  ;;  %v339_v12 = vld [vmem:[%s2471_s1 + $0x188] sm:$0xff]  ;;  %v341_v13 = vld [vmem:[%s2471_s1 + $0x198] sm:$0xff]  ;;  %v338_v14 = vld [vmem:[%s2471_s1 + $0x180] sm:$0xff]  ;;  %s1368_s11 = sshll.u32 %s2485_s8, 3 }
  0x10   : > { %380 = vmatprep.subr.mxu0 %v343_v8  ;;  %493 = vmatprep.subr.mxu1 %v345_v9  ;;  %v340_v15 = vld [vmem:[%s2471_s1 + $0x190] sm:$0xff]  ;;  %v335_v16 = vld [vmem:[%s2471_s1 + $0x168] sm:$0xff]  ;;  %v337_v17 = vld [vmem:[%s2471_s1 + $0x178] sm:$0xff]  ;;  %s1844_s27 = scalar_lea.vmem %s2470_s0, %s1368_s11  ;;  %s2450_s15 = scalar_lea.vmem %s2477_s7, %s1368_s11 }
  0x11   : > { %381 = vmatpush1.msra.mxu0 %v342_v10  ;;  %494 = vmatpush1.msra.mxu1 %v344_v11  ;;  %v334_v18 = vld [vmem:[%s2471_s1 + $0x160] sm:$0xff]  ;;  %v336_v19 = vld [vmem:[%s2471_s1 + $0x170] sm:$0xff]  ;;  %v331_v20 = vld [vmem:[%s2471_s1 + $0x148] sm:$0xff] }
  0x12   : > { %382 = vmatprep.subr.mxu0 %v339_v12  ;;  %495 = vmatprep.subr.mxu1 %v341_v13  ;;  %v333_v21 = vld [vmem:[%s2471_s1 + $0x158] sm:$0xff]  ;;  %v330_v22 = vld [vmem:[%s2471_s1 + $0x140] sm:$0xff]  ;;  %v332_v23 = vld [vmem:[%s2471_s1 + $0x150] sm:$0xff] }
  0x13   : > { %383 = vmatpush1.msra.mxu0 %v338_v14  ;;  %496 = vmatpush1.msra.mxu1 %v340_v15  ;;  %v327_v24 = vld [vmem:[%s2471_s1 + $0x128] sm:$0xff]  ;;  %v329_v25 = vld [vmem:[%s2471_s1 + $0x138] sm:$0xff]  ;;  %v326_v26 = vld [vmem:[%s2471_s1 + $0x120] sm:$0xff] }
  0x14   : > { %384 = vmatprep.subr.mxu0 %v335_v16  ;;  %497 = vmatprep.subr.mxu1 %v337_v17  ;;  %v328_v27 = vld [vmem:[%s2471_s1 + $0x130] sm:$0xff]  ;;  %v323_v28 = vld [vmem:[%s2471_s1 + $0x108] sm:$0xff]  ;;  %v325_v29 = vld [vmem:[%s2471_s1 + $0x118] sm:$0xff] }
  0x15   : > { %385 = vmatpush1.msra.mxu0 %v334_v18  ;;  %498 = vmatpush1.msra.mxu1 %v336_v19  ;;  %v322_v30 = vld [vmem:[%s2471_s1 + $0x100] sm:$0xff]  ;;  %v324_v31 = vld [vmem:[%s2471_s1 + $0x110] sm:$0xff]  ;;  %v319_v32 = vld [vmem:[%s2471_s1 + $0xe8] sm:$0xff] }
  0x16   : > { %386 = vmatprep.subr.mxu0 %v331_v20  ;;  %499 = vmatprep.subr.mxu1 %v333_v21  ;;  %v321_v33 = vld [vmem:[%s2471_s1 + $0xf8] sm:$0xff]  ;;  %v318_v34 = vld [vmem:[%s2471_s1 + $0xe0] sm:$0xff]  ;;  %v320_v35 = vld [vmem:[%s2471_s1 + $0xf0] sm:$0xff] }
  0x17   : > { %387 = vmatpush1.msra.mxu0 %v330_v22  ;;  %500 = vmatpush1.msra.mxu1 %v332_v23  ;;  %v315_v36 = vld [vmem:[%s2471_s1 + $0xc8] sm:$0xff]  ;;  %v317_v37 = vld [vmem:[%s2471_s1 + $0xd8] sm:$0xff]  ;;  %v314_v38 = vld [vmem:[%s2471_s1 + $0xc0] sm:$0xff] }
  0x18   : > { %388 = vmatprep.subr.mxu0 %v327_v24  ;;  %501 = vmatprep.subr.mxu1 %v329_v25  ;;  %v316_v39 = vld [vmem:[%s2471_s1 + $0xd0] sm:$0xff]  ;;  %v311_v40 = vld [vmem:[%s2471_s1 + $0xa8] sm:$0xff]  ;;  %v313_v41 = vld [vmem:[%s2471_s1 + $0xb8] sm:$0xff] }
  0x19   : > { %389 = vmatpush1.msra.mxu0 %v326_v26  ;;  %502 = vmatpush1.msra.mxu1 %v328_v27  ;;  %v310_v42 = vld [vmem:[%s2471_s1 + $0xa0] sm:$0xff]  ;;  %v312_v43 = vld [vmem:[%s2471_s1 + $0xb0] sm:$0xff]  ;;  %v307_v44 = vld [vmem:[%s2471_s1 + $0x88] sm:$0xff] }
  0x1a   : > { %390 = vmatprep.subr.mxu0 %v323_v28  ;;  %503 = vmatprep.subr.mxu1 %v325_v29  ;;  %v309_v45 = vld [vmem:[%s2471_s1 + $0x98] sm:$0xff]  ;;  %v306_v46 = vld [vmem:[%s2471_s1 + $0x80] sm:$0xff]  ;;  %v308_v47 = vld [vmem:[%s2471_s1 + $0x90] sm:$0xff] }
  0x1b   : > { %391 = vmatpush1.msra.mxu0 %v322_v30  ;;  %504 = vmatpush1.msra.mxu1 %v324_v31  ;;  %v303_v48 = vld [vmem:[%s2471_s1 + $0x68] sm:$0xff]  ;;  %v305_v49 = vld [vmem:[%s2471_s1 + $0x78] sm:$0xff]  ;;  %v302_v50 = vld [vmem:[%s2471_s1 + $0x60] sm:$0xff] }
  0x1c   : > { %392 = vmatprep.subr.mxu0 %v319_v32  ;;  %505 = vmatprep.subr.mxu1 %v321_v33  ;;  %v304_v51 = vld [vmem:[%s2471_s1 + $0x70] sm:$0xff]  ;;  %v299_v52 = vld [vmem:[%s2471_s1 + $0x48] sm:$0xff]  ;;  %v301_v53 = vld [vmem:[%s2471_s1 + $0x58] sm:$0xff] }
  0x1d   : > { %393 = vmatpush1.msra.mxu0 %v318_v34  ;;  %506 = vmatpush1.msra.mxu1 %v320_v35  ;;  %v298_v54 = vld [vmem:[%s2471_s1 + $0x40] sm:$0xff]  ;;  %v300_v55 = vld [vmem:[%s2471_s1 + $0x50] sm:$0xff]  ;;  %v295_v56 = vld [vmem:[%s2471_s1 + $0x28] sm:$0xff] }
  0x1e   : > { %394 = vmatprep.subr.mxu0 %v315_v36  ;;  %507 = vmatprep.subr.mxu1 %v317_v37  ;;  %v297_v57 = vld [vmem:[%s2471_s1 + $0x38] sm:$0xff]  ;;  %v294_v58 = vld [vmem:[%s2471_s1 + $0x20] sm:$0xff]  ;;  %v296_v59 = vld [vmem:[%s2471_s1 + $0x30] sm:$0xff] }
  0x1f   : > { %395 = vmatpush1.msra.mxu0 %v314_v38  ;;  %508 = vmatpush1.msra.mxu1 %v316_v39  ;;  %v291_v60 = vld [vmem:[%s2471_s1 + $0x8] sm:$0xff]  ;;  %v293_v61 = vld [vmem:[%s2471_s1 + $0x18] sm:$0xff]  ;;  %v290_v62 = vld [vmem:[%s2471_s1] sm:$0xff] }
  0x20   : > { %396 = vmatprep.subr.mxu0 %v311_v40  ;;  %509 = vmatprep.subr.mxu1 %v313_v41  ;;  %v292_v63 = vld [vmem:[%s2471_s1 + $0x10] sm:$0xff]  ;;  %v282_v0 = vld [vmem:[%s1844_s27] sm:$0xff]  ;;  %v283_v2 = vld [vmem:[%s1844_s27 + $0x8] sm:$0xff] }
  0x21   : > { %397 = vmatpush1.msra.mxu0 %v310_v42  ;;  %510 = vmatpush1.msra.mxu1 %v312_v43  ;;  %v284_v3 = vld [vmem:[%s1844_s27 + $0x10] sm:$0xff]  ;;  %v285_v4 = vld [vmem:[%s1844_s27 + $0x18] sm:$0xff]  ;;  %v286_v5 = vld [vmem:[%s1844_s27 + $0x20] sm:$0xff] }
  0x22   : > { %398 = vmatprep.subr.mxu0 %v307_v44  ;;  %511 = vmatprep.subr.mxu1 %v309_v45  ;;  %v287_v6 = vld [vmem:[%s1844_s27 + $0x28] sm:$0xff]  ;;  %v288_v7 = vld [vmem:[%s1844_s27 + $0x30] sm:$0xff]  ;;  %v289_v8 = vld [vmem:[%s1844_s27 + $0x38] sm:$0xff] }
  0x23   : > { %399 = vmatpush1.msra.mxu0 %v306_v46  ;;  %512 = vmatpush1.msra.mxu1 %v308_v47  ;;  %v921_v9 = vld [vmem:[%s2473_s3 + $0xf8] sm:$0xff]  ;;  %v920_v13 = vld [vmem:[%s2473_s3 + $0xf0] sm:$0xff]  ;;  %v919_v17 = vld [vmem:[%s2473_s3 + $0xe8] sm:$0xff] }
  0x24   : > { %400 = vmatprep.subr.mxu0 %v303_v48  ;;  %513 = vmatprep.subr.mxu1 %v305_v49  ;;  %v953_v10 = vld [vmem:[%s2473_s3 + $0x1f8] sm:$0xff]  ;;  %v952_v14 = vld [vmem:[%s2473_s3 + $0x1f0] sm:$0xff]  ;;  %v951_v18 = vld [vmem:[%s2473_s3 + $0x1e8] sm:$0xff] }
  0x25   : > { %401 = vmatpush1.msra.mxu0 %v302_v50  ;;  %514 = vmatpush1.msra.mxu1 %v304_v51  ;;  %v905_v11 = vld [vmem:[%s2473_s3 + $0x78] sm:$0xff]  ;;  %v904_v15 = vld [vmem:[%s2473_s3 + $0x70] sm:$0xff]  ;;  %v903_v19 = vld [vmem:[%s2473_s3 + $0x68] sm:$0xff] }
  0x26   : > { %402 = vmatprep.subr.mxu0 %v299_v52  ;;  %515 = vmatprep.subr.mxu1 %v301_v53  ;;  %v937_v12 = vld [vmem:[%s2473_s3 + $0x178] sm:$0xff]  ;;  %v936_v16 = vld [vmem:[%s2473_s3 + $0x170] sm:$0xff]  ;;  %v935_v20 = vld [vmem:[%s2473_s3 + $0x168] sm:$0xff] }
  0x27   : > { %403 = vmatpush1.msra.mxu0 %v298_v54  ;;  %516 = vmatpush1.msra.mxu1 %v300_v55  ;;  %v918_v21 = vld [vmem:[%s2473_s3 + $0xe0] sm:$0xff]  ;;  %v917_v25 = vld [vmem:[%s2473_s3 + $0xd8] sm:$0xff]  ;;  %v916_v29 = vld [vmem:[%s2473_s3 + $0xd0] sm:$0xff] }
  0x28   : > { %404 = vmatprep.subr.mxu0 %v295_v56  ;;  %517 = vmatprep.subr.mxu1 %v297_v57  ;;  %v950_v22 = vld [vmem:[%s2473_s3 + $0x1e0] sm:$0xff]  ;;  %v949_v26 = vld [vmem:[%s2473_s3 + $0x1d8] sm:$0xff]  ;;  %v948_v30 = vld [vmem:[%s2473_s3 + $0x1d0] sm:$0xff] }
  0x29   : > { %405 = vmatpush1.msra.mxu0 %v294_v58  ;;  %518 = vmatpush1.msra.mxu1 %v296_v59  ;;  %v902_v23 = vld [vmem:[%s2473_s3 + $0x60] sm:$0xff]  ;;  %v901_v27 = vld [vmem:[%s2473_s3 + $0x58] sm:$0xff]  ;;  %v900_v31 = vld [vmem:[%s2473_s3 + $0x50] sm:$0xff] }
  0x2a   : > { %406 = vmatprep.subr.mxu0 %v291_v60  ;;  %519 = vmatprep.subr.mxu1 %v293_v61  ;;  %v934_v24 = vld [vmem:[%s2473_s3 + $0x160] sm:$0xff]  ;;  %v933_v28 = vld [vmem:[%s2473_s3 + $0x158] sm:$0xff]  ;;  %v932_v32 = vld [vmem:[%s2473_s3 + $0x150] sm:$0xff] }
  0x2b   : > { %407 = vmatpush1.msra.mxu0 %v290_v62  ;;  %440 = vmatprep.mubr.f32.mxu0 %v1593_v1  ;;  %v915_v33 = vld [vmem:[%s2473_s3 + $0xc8] sm:$0xff]  ;;  %v914_v37 = vld [vmem:[%s2473_s3 + $0xc0] sm:$0xff]  ;;  %v913_v41 = vld [vmem:[%s2473_s3 + $0xb8] sm:$0xff] }
  0x2c   : > { %520 = vmatpush1.msra.mxu1 %v292_v63  ;;  %553 = vmatprep.mubr.f32.mxu1 %v1593_v1  ;;  %v947_v34 = vld [vmem:[%s2473_s3 + $0x1c8] sm:$0xff]  ;;  %v946_v38 = vld [vmem:[%s2473_s3 + $0x1c0] sm:$0xff]  ;;  %v945_v42 = vld [vmem:[%s2473_s3 + $0x1b8] sm:$0xff] }
  0x2d   : > { %441 = vmatmul.mubr.f32.vlgmr.msra.gmra.mxu0 %v282_v0  ;;  %554 = vmatmul.mubr.f32.vlgmr.msra.gmra.mxu1 %v282_v0  ;;  %v899_v35 = vld [vmem:[%s2473_s3 + $0x48] sm:$0xff]  ;;  %v898_v39 = vld [vmem:[%s2473_s3 + $0x40] sm:$0xff]  ;;  %v897_v43 = vld [vmem:[%s2473_s3 + $0x38] sm:$0xff] }
  0x2e   : > { %446 = vmatprep.mubr.f32.mxu0 %v1593_v1  ;;  %559 = vmatprep.mubr.f32.mxu1 %v1593_v1  ;;  %v931_v36 = vld [vmem:[%s2473_s3 + $0x148] sm:$0xff]  ;;  %v930_v40 = vld [vmem:[%s2473_s3 + $0x140] sm:$0xff]  ;;  %v929_v44 = vld [vmem:[%s2473_s3 + $0x138] sm:$0xff] }
  0x2f   : > { %1376 = vmatprep.subr.mxu0 %v921_v9  ;;  %1432 = vmatprep.subr.mxu1 %v953_v10  ;;  %v912_v45 = vld [vmem:[%s2473_s3 + $0xb0] sm:$0xff]  ;;  %v911_v49 = vld [vmem:[%s2473_s3 + $0xa8] sm:$0xff]  ;;  %v910_v53 = vld [vmem:[%s2473_s3 + $0xa0] sm:$0xff]  ;;  %v356_v9 = vlaneseq }
  0x30   : > { %1377 = vmatpush3.msra.mxu0 %v905_v11  ;;  %1433 = vmatpush3.msra.mxu1 %v937_v12  ;;  %v944_v46 = vld [vmem:[%s2473_s3 + $0x1b0] sm:$0xff]  ;;  %v943_v50 = vld [vmem:[%s2473_s3 + $0x1a8] sm:$0xff]  ;;  %v942_v54 = vld [vmem:[%s2473_s3 + $0x1a0] sm:$0xff] }
  0x31   : > { %447 = vmatmul.mubr.f32.gmra.mxu0 %v283_v2  ;;  %560 = vmatmul.mubr.f32.gmra.mxu1 %v283_v2  ;;  %v896_v47 = vld [vmem:[%s2473_s3 + $0x30] sm:$0xff]  ;;  %v895_v51 = vld [vmem:[%s2473_s3 + $0x28] sm:$0xff]  ;;  %v894_v55 = vld [vmem:[%s2473_s3 + $0x20] sm:$0xff]  ;;  %v357_v10 = vshrl.u32 %v356_v9, 7 }
  0x32   : > { %452 = vmatprep.mubr.f32.mxu0 %v1593_v1  ;;  %565 = vmatprep.mubr.f32.mxu1 %v1593_v1  ;;  %v928_v48 = vld [vmem:[%s2473_s3 + $0x130] sm:$0xff]  ;;  %v927_v52 = vld [vmem:[%s2473_s3 + $0x128] sm:$0xff]  ;;  %v926_v56 = vld [vmem:[%s2473_s3 + $0x120] sm:$0xff] }
  0x33   : > { %1378 = vmatprep.subr.mxu0 %v920_v13  ;;  %1434 = vmatprep.subr.mxu1 %v952_v14  ;;  %v909_v57 = vld [vmem:[%s2473_s3 + $0x98] sm:$0xff]  ;;  %v908_v61 = vld [vmem:[%s2473_s3 + $0x90] sm:$0xff]  ;;  %v939_v2 = vld [vmem:[%s2473_s3 + $0x188] sm:$0xff]  ;;  %v358_v11 = vsub.s32 0, %v357_v10  ;;  %v366_v12 = vsub.s32 2, %v357_v10  ;;  %v362_v14 = vsub.s32 1, %v357_v10 }
  0x34   : > { %1379 = vmatpush3.msra.mxu0 %v904_v15  ;;  %1435 = vmatpush3.msra.mxu1 %v936_v16  ;;  %v941_v58 = vld [vmem:[%s2473_s3 + $0x198] sm:$0xff]  ;;  %v940_v62 = vld [vmem:[%s2473_s3 + $0x190] sm:$0xff]  ;;  %v354_v13 = vld [vmem:[%s2472_s2] sm:$0xf]  ;;  %v370_v15 = vsub.s32 3, %v357_v10 }
  0x35   : > { %453 = vmatmul.mubr.f32.gmra.mxu0 %v284_v3  ;;  %566 = vmatmul.mubr.f32.gmra.mxu1 %v284_v3  ;;  %v893_v59 = vld [vmem:[%s2473_s3 + $0x18] sm:$0xff]  ;;  %v892_v63 = vld [vmem:[%s2473_s3 + $0x10] sm:$0xff]  ;;  %v891_v3 = vld [vmem:[%s2473_s3 + $0x8] sm:$0xff]  ;;  %v2055_v16 = vrot.slane %v354_v13, %v358_v11 }
  0x36   : > { %458 = vmatprep.mubr.f32.mxu0 %v1593_v1  ;;  %571 = vmatprep.mubr.f32.mxu1 %v1593_v1  ;;  %v925_v60 = vld [vmem:[%s2473_s3 + $0x118] sm:$0xff]  ;;  %v924_v0 = vld [vmem:[%s2473_s3 + $0x110] sm:$0xff] }
  0x37   : > { %1380 = vmatprep.subr.mxu0 %v919_v17  ;;  %1436 = vmatprep.subr.mxu1 %v951_v18  ;;  %v2057_v17 = vrot.slane %v354_v13, %v366_v12  ;;  %v2059_v18 = vrot.slane %v354_v13, %v362_v14 }
  0x38   : > { %1381 = vmatpush3.msra.mxu0 %v903_v19  ;;  %1437 = vmatpush3.msra.mxu1 %v935_v20  ;;  %v2061_v19 = vrot.slane %v354_v13, %v370_v15 }
  0x39   : > { %459 = vmatmul.mubr.f32.gmra.mxu0 %v285_v4  ;;  %572 = vmatmul.mubr.f32.gmra.mxu1 %v285_v4  ;;  %v923_v4 = vld [vmem:[%s2473_s3 + $0x108] sm:$0xff] }
  0x3a   : > { %464 = vmatprep.mubr.f32.mxu0 %v1593_v1  ;;  %577 = vmatprep.mubr.f32.mxu1 %v1593_v1 }
  0x3b   : > { %1382 = vmatprep.subr.mxu0 %v918_v21  ;;  %1438 = vmatprep.subr.mxu1 %v950_v22 }
  0x3c   : > { %1383 = vmatpush3.msra.mxu0 %v902_v23  ;;  %1439 = vmatpush3.msra.mxu1 %v934_v24 }
  0x3d   : > { %465 = vmatmul.mubr.f32.gmra.mxu0 %v286_v5  ;;  %578 = vmatmul.mubr.f32.gmra.mxu1 %v286_v5  ;;  %v906_v5 = vld [vmem:[%s2473_s3 + $0x80] sm:$0xff] }
  0x3e   : > { %470 = vmatprep.mubr.f32.mxu0 %v1593_v1  ;;  %583 = vmatprep.mubr.f32.mxu1 %v1593_v1 }
  0x3f   : > { %1384 = vmatprep.subr.mxu0 %v917_v25  ;;  %1440 = vmatprep.subr.mxu1 %v949_v26 }
  0x40   : > { %1385 = vmatpush3.msra.mxu0 %v901_v27  ;;  %1441 = vmatpush3.msra.mxu1 %v933_v28 }
  0x41   : > { %471 = vmatmul.mubr.f32.gmra.mxu0 %v287_v6  ;;  %584 = vmatmul.mubr.f32.gmra.mxu1 %v287_v6  ;;  %v938_v6 = vld [vmem:[%s2473_s3 + $0x180] sm:$0xff] }
  0x42   : > { %476 = vmatprep.mubr.f32.mxu0 %v1593_v1  ;;  %589 = vmatprep.mubr.f32.mxu1 %v1593_v1 }
  0x43   : > { %1386 = vmatprep.subr.mxu0 %v916_v29  ;;  %1442 = vmatprep.subr.mxu1 %v948_v30 }
  0x44   : > { %1387 = vmatpush3.msra.mxu0 %v900_v31  ;;  %1443 = vmatpush3.msra.mxu1 %v932_v32 }
  0x45   : > { %477 = vmatmul.mubr.f32.gmra.mxu0 %v288_v7  ;;  %590 = vmatmul.mubr.f32.gmra.mxu1 %v288_v7  ;;  %v890_v7 = vld [vmem:[%s2473_s3] sm:$0xff] }
  0x46   : > { %482 = vmatprep.mubr.f32.mxu0 %v1593_v1  ;;  %595 = vmatprep.mubr.f32.mxu1 %v1593_v1  ;;  %v907_v1 = vld [vmem:[%s2473_s3 + $0x88] sm:$0xff] }
  0x47   : > { %1388 = vmatprep.subr.mxu0 %v915_v33  ;;  %1444 = vmatprep.subr.mxu1 %v947_v34 }
  0x48   : > { %1389 = vmatpush3.msra.mxu0 %v899_v35  ;;  %1445 = vmatpush3.msra.mxu1 %v931_v36 }
  0x49   : > { %483 = vmatmul.mubr.f32.gmra.mxu0 %v289_v8  ;;  %596 = vmatmul.mubr.f32.gmra.mxu1 %v289_v8  ;;  %v922_v8 = vld [vmem:[%s2473_s3 + $0x100] sm:$0xff] }
  0x4a   : > { %1390 = vmatprep.subr.mxu0 %v914_v37  ;;  %1446 = vmatprep.subr.mxu1 %v946_v38 }
  0x4b   : > { %1391 = vmatpush3.msra.mxu0 %v898_v39  ;;  %1447 = vmatpush3.msra.mxu1 %v930_v40 }
  0x4c   : > { %1392 = vmatprep.subr.mxu0 %v913_v41  ;;  %1448 = vmatprep.subr.mxu1 %v945_v42 }
  0x4d   : > { %1393 = vmatpush3.msra.mxu0 %v897_v43  ;;  %1449 = vmatpush3.msra.mxu1 %v929_v44 }
  0x4e   : > { %1394 = vmatprep.subr.mxu0 %v912_v45  ;;  %1450 = vmatprep.subr.mxu1 %v944_v46 }
  0x4f   : > { %1395 = vmatpush3.msra.mxu0 %v896_v47  ;;  %1451 = vmatpush3.msra.mxu1 %v928_v48 }
  0x50   : > { %1396 = vmatprep.subr.mxu0 %v911_v49  ;;  %1452 = vmatprep.subr.mxu1 %v943_v50 }
  0x51   : > { %1397 = vmatpush3.msra.mxu0 %v895_v51  ;;  %1453 = vmatpush3.msra.mxu1 %v927_v52 }
  0x52   : > { %1398 = vmatprep.subr.mxu0 %v910_v53  ;;  %1454 = vmatprep.subr.mxu1 %v942_v54 }
  0x53   : > { %1399 = vmatpush3.msra.mxu0 %v894_v55  ;;  %1455 = vmatpush3.msra.mxu1 %v926_v56 }
  0x54   : > { %1400 = vmatprep.subr.mxu0 %v909_v57  ;;  %1456 = vmatprep.subr.mxu1 %v941_v58 }
  0x55   : > { %1401 = vmatpush3.msra.mxu0 %v893_v59  ;;  %1457 = vmatpush3.msra.mxu1 %v925_v60 }
  0x56   : > { %1402 = vmatprep.subr.mxu0 %v908_v61  ;;  %1458 = vmatprep.subr.mxu1 %v940_v62 }
  0x57   : > { %1403 = vmatpush3.msra.mxu0 %v892_v63  ;;  %1459 = vmatpush3.msra.mxu1 %v924_v0 }
  0x58   : > { %1404 = vmatprep.subr.mxu0 %v907_v1  ;;  %1460 = vmatprep.subr.mxu1 %v939_v2 }
  0x59   : > { %1405 = vmatpush3.msra.mxu0 %v891_v3  ;;  %1461 = vmatpush3.msra.mxu1 %v923_v4 }
  0x5a   : > { %1406 = vmatprep.subr.mxu0 %v906_v5  ;;  %1462 = vmatprep.subr.mxu1 %v938_v6 }
  0x5b   : > { %1407 = vmatpush3.msra.mxu0 %v890_v7  ;;  %1463 = vmatpush3.msra.mxu1 %v922_v8 }
  0xed   : > { %v442_v20 = vpop.f32.mrf.mxu0  ;;  %v555_v21 = vpop.f32.mrf.mxu1 }
  0xee   : > { %v2064_v22 = vadd.f32 %v442_v20, %v2055_v16  ;;  %v2067_v23 = vadd.f32 %v555_v21, %v2057_v17 }
  0xef   : > { %v444_v24 = vpop.f32.mrf.mxu0  ;;  %v557_v25 = vpop.f32.mrf.mxu1 }
  0xf0   : > { %v602_v26 = vmul.f32 %v2064_v22, %v2064_v22  ;;  %v604_v27 = vmul.f32 %v2067_v23, %v2067_v23  ;;  %v2074_v28 = vadd.f32 %v444_v24, %v2059_v18  ;;  %v2077_v29 = vadd.f32 %v557_v25, %v2061_v19 }
  0xf1   : > { %v448_v30 = vpop.f32.mrf.mxu0  ;;  %v561_v31 = vpop.f32.mrf.mxu1 }
  0xf2   : > { %v634_v32 = vmul.f32 %v602_v26, %v2064_v22  ;;  %v636_v33 = vmul.f32 %v604_v27, %v2067_v23  ;;  %v603_v34 = vmul.f32 %v2074_v28, %v2074_v28  ;;  %v605_v35 = vmul.f32 %v2077_v29, %v2077_v29 }
  0xf3   : > { %v2086_v36 = vadd.f32 %v448_v30, %v2055_v16  ;;  %v2089_v37 = vadd.f32 %v561_v31, %v2057_v17  ;;  %v450_v38 = vpop.f32.mrf.mxu0  ;;  %v563_v39 = vpop.f32.mrf.mxu1 }
  0xf4   : > { %v666_v40 = vmul.f32 0.044715, %v634_v32  ;;  %v668_v41 = vmul.f32 0.044715, %v636_v33  ;;  %v635_v42 = vmul.f32 %v603_v34, %v2074_v28  ;;  %v637_v43 = vmul.f32 %v605_v35, %v2077_v29 }
  0xf5   : > { %v606_v44 = vmul.f32 %v2086_v36, %v2086_v36  ;;  %v608_v45 = vmul.f32 %v2089_v37, %v2089_v37  ;;  %v2098_v46 = vadd.f32 %v450_v38, %v2059_v18  ;;  %v2101_v47 = vadd.f32 %v563_v39, %v2061_v19  ;;  %v454_v48 = vpop.f32.mrf.mxu0  ;;  %v567_v49 = vpop.f32.mrf.mxu1 }
  0xf6   : > { %v698_v50 = vadd.f32 %v666_v40, %v2064_v22  ;;  %v700_v51 = vadd.f32 %v668_v41, %v2067_v23  ;;  %v667_v52 = vmul.f32 0.044715, %v635_v42  ;;  %v669_v53 = vmul.f32 0.044715, %v637_v43 }
  0xf7   : > { %v638_v54 = vmul.f32 %v606_v44, %v2086_v36  ;;  %v640_v55 = vmul.f32 %v608_v45, %v2089_v37  ;;  %v607_v56 = vmul.f32 %v2098_v46, %v2098_v46  ;;  %v609_v57 = vmul.f32 %v2101_v47, %v2101_v47  ;;  %v456_v58 = vpop.f32.mrf.mxu0  ;;  %v569_v59 = vpop.f32.mrf.mxu1 }
  0xf8   : > { %v730_v60 = vmul.f32 0.7978846, %v698_v50  ;;  %v732_v61 = vmul.f32 0.7978846, %v700_v51  ;;  %v699_v62 = vadd.f32 %v667_v52, %v2074_v28  ;;  %v701_v63 = vadd.f32 %v669_v53, %v2077_v29 }
  0xf9   : > { %v670_v0 = vmul.f32 0.044715, %v638_v54  ;;  %v672_v1 = vmul.f32 0.044715, %v640_v55  ;;  %v639_v2 = vmul.f32 %v607_v56, %v2098_v46  ;;  %v641_v3 = vmul.f32 %v609_v57, %v2101_v47  ;;  %v460_v7 = vpop.f32.mrf.mxu0  ;;  %v573_v11 = vpop.f32.mrf.mxu1 }
  0xfa   : > { %1497 = vtanh.f32 %v730_v60  ;;  %v731_v4 = vmul.f32 0.7978846, %v699_v62  ;;  %v733_v5 = vmul.f32 0.7978846, %v701_v63  ;;  %v2116_v6 = vadd.f32 %v454_v48, %v2055_v16 }
  0xfb   : > { %1499 = vtanh.f32 %v732_v61  ;;  %v702_v8 = vadd.f32 %v670_v0, %v2086_v36  ;;  %v704_v9 = vadd.f32 %v672_v1, %v2089_v37  ;;  %v671_v10 = vmul.f32 0.044715, %v639_v2  ;;  %v462_v30 = vpop.f32.mrf.mxu0  ;;  %v575_v34 = vpop.f32.mrf.mxu1 }
  0xfc   : > { %1501 = vtanh.f32 %v731_v4  ;;  %v673_v12 = vmul.f32 0.044715, %v641_v3  ;;  %v610_v13 = vmul.f32 %v2116_v6, %v2116_v6  ;;  %v2123_v14 = vadd.f32 %v567_v49, %v2057_v17 }
  0xfd   : > { %1503 = vtanh.f32 %v733_v5  ;;  %v734_v15 = vmul.f32 0.7978846, %v702_v8  ;;  %v736_v20 = vmul.f32 0.7978846, %v704_v9  ;;  %v703_v21 = vadd.f32 %v671_v10, %v2098_v46  ;;  %v466_v48 = vpop.f32.mrf.mxu0  ;;  %v579_v53 = vpop.f32.mrf.mxu1 }
  0xfe   : > { %v705_v24 = vadd.f32 %v673_v12, %v2101_v47  ;;  %v642_v25 = vmul.f32 %v610_v13, %v2116_v6  ;;  %v612_v26 = vmul.f32 %v2123_v14, %v2123_v14  ;;  %v2131_v27 = vadd.f32 %v456_v58, %v2059_v18 }
  0xff   : > { %1505 = vtanh.f32 %v734_v15  ;;  %v735_v31 = vmul.f32 0.7978846, %v703_v21  ;;  %v2134_v32 = vadd.f32 %v569_v59, %v2061_v19  ;;  %v2137_v33 = vadd.f32 %v460_v7, %v2055_v16  ;;  %v468_v1 = vpop.f32.mrf.mxu0  ;;  %v581_v8 = vpop.f32.mrf.mxu1 }
 0x100   : > { %1507 = vtanh.f32 %v736_v20  ;;  %v737_v35 = vmul.f32 0.7978846, %v705_v24  ;;  %v674_v38 = vmul.f32 0.044715, %v642_v25  ;;  %v644_v39 = vmul.f32 %v612_v26, %v2123_v14 }
 0x101   : > { %1509 = vtanh.f32 %v735_v31  ;;  %v611_v40 = vmul.f32 %v2131_v27, %v2131_v27  ;;  %v613_v41 = vmul.f32 %v2134_v32, %v2134_v32  ;;  %v614_v42 = vmul.f32 %v2137_v33, %v2137_v33 }
 0x102   : > { %1511 = vtanh.f32 %v737_v35  ;;  %v706_v43 = vadd.f32 %v674_v38, %v2116_v6  ;;  %v676_v44 = vmul.f32 0.044715, %v644_v39  ;;  %v2148_v45 = vadd.f32 %v573_v11, %v2057_v17  ;;  %v472_v35 = vpop.f32.mrf.mxu0 }
 0x103   : > { %v643_v49 = vmul.f32 %v611_v40, %v2131_v27  ;;  %v645_v50 = vmul.f32 %v613_v41, %v2134_v32  ;;  %v646_v51 = vmul.f32 %v614_v42, %v2137_v33  ;;  %v2154_v52 = vadd.f32 %v462_v30, %v2059_v18  ;;  %v585_v41 = vpop.f32.mrf.mxu1 }
 0x104   : > { %v738_v54 = vmul.f32 0.7978846, %v706_v43  ;;  %v708_v55 = vadd.f32 %v676_v44, %v2123_v14  ;;  %v616_v56 = vmul.f32 %v2148_v45, %v2148_v45  ;;  %v2160_v57 = vadd.f32 %v575_v34, %v2061_v19 }
 0x105   : > { %v675_v58 = vmul.f32 0.044715, %v643_v49  ;;  %v677_v59 = vmul.f32 0.044715, %v645_v50  ;;  %v678_v60 = vmul.f32 0.044715, %v646_v51  ;;  %v615_v61 = vmul.f32 %v2154_v52, %v2154_v52 }
 0x106   : > { %1513 = vtanh.f32 %v738_v54  ;;  %v740_v62 = vmul.f32 0.7978846, %v708_v55  ;;  %v648_v63 = vmul.f32 %v616_v56, %v2148_v45  ;;  %v617_v0 = vmul.f32 %v2160_v57, %v2160_v57 }
 0x107   : > { %v1498_v2 = vpop.eup %1497  ;;  %v707_v3 = vadd.f32 %v675_v58, %v2131_v27  ;;  %v709_v4 = vadd.f32 %v677_v59, %v2134_v32  ;;  %v710_v5 = vadd.f32 %v678_v60, %v2137_v33  ;;  %v647_v7 = vmul.f32 %v615_v61, %v2154_v52  ;;  %v474_v59 = vpop.f32.mrf.mxu0 }
 0x108   : > { %v1500_v9 = vpop.eup %1499  ;;  %v794_v10 = vadd.f32 1.0, %v1498_v2  ;;  %1515 = vtanh.f32 %v740_v62  ;;  %v680_v11 = vmul.f32 0.044715, %v648_v63  ;;  %v649_v12 = vmul.f32 %v617_v0, %v2160_v57  ;;  %v587_v0 = vpop.f32.mrf.mxu1 }
 0x109   : > { %v2172_v13 = vpop.eup %1501  ;;  %v796_v15 = vadd.f32 1.0, %v1500_v9  ;;  %v739_v20 = vmul.f32 0.7978846, %v707_v3  ;;  %v741_v21 = vmul.f32 0.7978846, %v709_v4  ;;  %v2175_v24 = vadd.f32 %v466_v48, %v2055_v16 }
 0x10a   : > { %v2177_v25 = vpop.eup %1503  ;;  %v826_v26 = vmul.f32 0.5, %v794_v10  ;;  %v742_v30 = vmul.f32 0.7978846, %v710_v5  ;;  %v712_v31 = vadd.f32 %v680_v11, %v2148_v45  ;;  %v679_v34 = vmul.f32 0.044715, %v647_v7  ;;  %v478_v11 = vpop.f32.mrf.mxu0 }
 0x10b   : > { %v828_v38 = vmul.f32 0.5, %v796_v15  ;;  %1517 = vtanh.f32 %v739_v20  ;;  %v681_v39 = vmul.f32 0.044715, %v649_v12  ;;  %v618_v40 = vmul.f32 %v2175_v24, %v2175_v24 }
 0x10c   : > { %v2182_v42 = vpop.eup %1505  ;;  %v2185_v43 = vmul.f32 %v826_v26, %v2064_v22  ;;  %1519 = vtanh.f32 %v741_v21  ;;  %v744_v44 = vmul.f32 0.7978846, %v712_v31  ;;  %v711_v48 = vadd.f32 %v679_v34, %v2154_v52 }
 0x10d   : > { %v2188_v49 = vpop.eup %1507  ;;  %v2191_v50 = vmul.f32 %v828_v38, %v2067_v23  ;;  %1521 = vtanh.f32 %v742_v30  ;;  %v713_v51 = vadd.f32 %v681_v39, %v2160_v57  ;;  %v650_v54 = vmul.f32 %v618_v40, %v2175_v24  ;;  %v591_v30 = vpop.f32.mrf.mxu1 }
 0x10e   : > { %v2195_v55 = vpop.eup %1509  ;;  %1523 = vtanh.f32 %v744_v44  ;;  %v743_v56 = vmul.f32 0.7978846, %v711_v48  ;;  %v2198_v22 = vadd.f32 %v579_v53, %v2057_v17  ;;  %v2201_v58 = vadd.f32 %v468_v1, %v2059_v18 }
 0x10f   : > { %v2203_v60 = vpop.eup %1511  ;;  %v745_v23 = vmul.f32 0.7978846, %v713_v51  ;;  %v682_v61 = vmul.f32 0.044715, %v650_v54  ;;  %v2206_v62 = vadd.f32 %v581_v8, %v2061_v19  ;;  %v2209_v63 = vadd.f32 %v472_v35, %v2055_v16 }
 0x110   : > { %1525 = vtanh.f32 %v743_v56  ;;  %v620_v53 = vmul.f32 %v2198_v22, %v2198_v22  ;;  %v619_v1 = vmul.f32 %v2201_v58, %v2201_v58  ;;  %v2216_v2 = vadd.f32 %v585_v41, %v2057_v17 }
 0x111   : > { %1527 = vtanh.f32 %v745_v23  ;;  %v714_v3 = vadd.f32 %v682_v61, %v2175_v24  ;;  %v621_v4 = vmul.f32 %v2206_v62, %v2206_v62  ;;  %v622_v5 = vmul.f32 %v2209_v63, %v2209_v63 }
 0x112   : > { %v652_v7 = vmul.f32 %v620_v53, %v2198_v22  ;;  %v651_v8 = vmul.f32 %v619_v1, %v2201_v58  ;;  %v624_v9 = vmul.f32 %v2216_v2, %v2216_v2  ;;  %v2228_v10 = vadd.f32 %v474_v59, %v2059_v18  ;;  %v480_v59 = vpop.f32.mrf.mxu0  ;;  %v593_v1 = vpop.f32.mrf.mxu1 }
 0x113   : > { %v2230_v12 = vpop.eup %1513  ;;  %v746_v15 = vmul.f32 0.7978846, %v714_v3  ;;  %v653_v20 = vmul.f32 %v621_v4, %v2206_v62  ;;  %v654_v21 = vmul.f32 %v622_v5, %v2209_v63  ;;  %v2235_v26 = vadd.f32 %v587_v0, %v2061_v19 }
 0x114   : > { %v684_v31 = vmul.f32 0.044715, %v652_v7  ;;  %v683_v34 = vmul.f32 0.044715, %v651_v8  ;;  %v656_v35 = vmul.f32 %v624_v9, %v2216_v2  ;;  %v623_v38 = vmul.f32 %v2228_v10, %v2228_v10 }
 0x115   : > { %v2240_v39 = vpop.eup %1515  ;;  %1529 = vtanh.f32 %v746_v15  ;;  %v685_v40 = vmul.f32 0.044715, %v653_v20  ;;  %v686_v41 = vmul.f32 0.044715, %v654_v21  ;;  %v625_v44 = vmul.f32 %v2235_v26, %v2235_v26 }
 0x116   : > { %v716_v48 = vadd.f32 %v684_v31, %v2198_v22  ;;  %v715_v51 = vadd.f32 %v683_v34, %v2201_v58  ;;  %v688_v54 = vmul.f32 0.044715, %v656_v35  ;;  %v655_v56 = vmul.f32 %v623_v38, %v2228_v10 }
 0x117   : > { %v717_v23 = vadd.f32 %v685_v40, %v2206_v62  ;;  %v718_v61 = vadd.f32 %v686_v41, %v2209_v63  ;;  %v657_v0 = vmul.f32 %v625_v44, %v2235_v26  ;;  %v2251_v53 = vadd.f32 %v478_v11, %v2055_v16  ;;  %v484_v40 = vpop.f32.mrf.mxu0 }
 0x118   : > { %v2253_v3 = vpop.eup %1517  ;;  %v748_v4 = vmul.f32 0.7978846, %v716_v48  ;;  %v747_v5 = vmul.f32 0.7978846, %v715_v51  ;;  %v720_v7 = vadd.f32 %v688_v54, %v2216_v2  ;;  %v687_v8 = vmul.f32 0.044715, %v655_v56  ;;  %v597_v54 = vpop.f32.mrf.mxu1 }
 0x119   : > { %2480 = vst [vmem:[#allocation2_spill] sm:$0xff] %v2251_v53  ;;  %v2256_v9 = vpop.eup %1519  ;;  %v749_v15 = vmul.f32 0.7978846, %v717_v23  ;;  %v750_v20 = vmul.f32 0.7978846, %v718_v61  ;;  %v626_v31 = vmul.f32 %v2251_v53, %v2251_v53  ;;  %v2264_v38 = vadd.f32 %v591_v30, %v2057_v17 }
 0x11a   : > { %v689_v21 = vmul.f32 0.044715, %v657_v0  ;;  %v2260_v34 = vpop.eup %1521  ;;  %1531 = vtanh.f32 %v748_v4  ;;  %v752_v11 = vmul.f32 0.7978846, %v720_v7  ;;  %v719_v35 = vadd.f32 %v687_v8, %v2228_v10 }
 0x11b   : > { %2481 = vst [vmem:[#allocation3_spill] sm:$0xff] %v2264_v38  ;;  %v2266_v41 = vpop.eup %1523  ;;  %1533 = vtanh.f32 %v747_v5  ;;  %v658_v48 = vmul.f32 %v626_v31, %v2251_v53  ;;  %v2271_v51 = vadd.f32 %v480_v59, %v2059_v18  ;;  %v628_v23 = vmul.f32 %v2264_v38, %v2264_v38 }
 0x11c   : > { %v721_v44 = vadd.f32 %v689_v21, %v2235_v26  ;;  %1535 = vtanh.f32 %v749_v15  ;;  %v751_v56 = vmul.f32 0.7978846, %v719_v35  ;;  %v2276_v30 = vadd.f32 %v593_v1, %v2061_v19  ;;  %v486_v1 = vpop.f32.mrf.mxu0  ;;  %v599_v35 = vpop.f32.mrf.mxu1 }
 0x11d   : > { %v2278_v61 = vpop.eup %1525  ;;  %1537 = vtanh.f32 %v750_v20  ;;  %v690_v4 = vmul.f32 0.044715, %v658_v48  ;;  %v627_v5 = vmul.f32 %v2271_v51, %v2271_v51  ;;  %v660_v59 = vmul.f32 %v628_v23, %v2264_v38 }
 0x11e   : > { %v753_v0 = vmul.f32 0.7978846, %v721_v44  ;;  %v2282_v7 = vpop.eup %1527  ;;  %1539 = vtanh.f32 %v752_v11  ;;  %v629_v8 = vmul.f32 %v2276_v30, %v2276_v30  ;;  %v2288_v15 = vadd.f32 %v484_v40, %v2055_v16 }
 0x11f   : > { %1541 = vtanh.f32 %v751_v56  ;;  %v722_v20 = vadd.f32 %v690_v4, %v2251_v53  ;;  %v659_v21 = vmul.f32 %v627_v5, %v2271_v51  ;;  %v2293_v31 = vadd.f32 %v597_v54, %v2057_v17 }
 0x120   : > { %1543 = vtanh.f32 %v753_v0  ;;  %v692_v11 = vmul.f32 0.044715, %v660_v59  ;;  %v661_v44 = vmul.f32 %v629_v8, %v2276_v30  ;;  %v630_v48 = vmul.f32 %v2288_v15, %v2288_v15 }
 0x121   : > { %v754_v23 = vmul.f32 0.7978846, %v722_v20  ;;  %v691_v16 = vmul.f32 0.044715, %v659_v21  ;;  %v632_v40 = vmul.f32 %v2293_v31, %v2293_v31  ;;  %v2301_v56 = vadd.f32 %v486_v1, %v2059_v18 }
 0x122   : > { %v2303_v4 = vpop.eup %1529  ;;  %v724_v17 = vadd.f32 %v692_v11, %v2264_v38  ;;  %v693_v54 = vmul.f32 0.044715, %v661_v44  ;;  %v662_v0 = vmul.f32 %v630_v48, %v2288_v15  ;;  %v2308_v5 = vadd.f32 %v599_v35, %v2061_v19 }
 0x123   : > { %1545 = vtanh.f32 %v754_v23  ;;  %v723_v59 = vadd.f32 %v691_v16, %v2271_v51  ;;  %v664_v8 = vmul.f32 %v632_v40, %v2293_v31  ;;  %v631_v20 = vmul.f32 %v2301_v56, %v2301_v56 }
 0x124   : > { %v756_v18 = vmul.f32 0.7978846, %v724_v17  ;;  %v725_v1 = vadd.f32 %v693_v54, %v2276_v30  ;;  %v694_v21 = vmul.f32 0.044715, %v662_v0  ;;  %v633_v11 = vmul.f32 %v2308_v5, %v2308_v5 }
 0x125   : > { %v755_v44 = vmul.f32 0.7978846, %v723_v59  ;;  %v696_v48 = vmul.f32 0.044715, %v664_v8  ;;  %v663_v19 = vmul.f32 %v631_v20, %v2301_v56  ;;  %v795_v35 = vadd.f32 1.0, %v2172_v13 }
 0x126   : > { %1547 = vtanh.f32 %v756_v18  ;;  %v757_v23 = vmul.f32 0.7978846, %v725_v1  ;;  %v726_v16 = vadd.f32 %v694_v21, %v2288_v15  ;;  %v665_v40 = vmul.f32 %v633_v11, %v2308_v5 }
 0x127   : > { %v2321_v38 = vpop.eup %1531  ;;  %1549 = vtanh.f32 %v755_v44  ;;  %v728_v17 = vadd.f32 %v696_v48, %v2293_v31  ;;  %v695_v54 = vmul.f32 0.044715, %v663_v19  ;;  %v827_v0 = vmul.f32 0.5, %v795_v35 }
 0x128   : > { %v1534_v53 = vpop.eup %1533  ;;  %1551 = vtanh.f32 %v757_v23  ;;  %v758_v59 = vmul.f32 0.7978846, %v726_v16  ;;  %v697_v8 = vmul.f32 0.044715, %v665_v40  ;;  %v797_v20 = vadd.f32 1.0, %v2177_v25 }
 0x129   : > { %v2325_v13 = vpop.eup %1535  ;;  %v760_v18 = vmul.f32 0.7978846, %v728_v17  ;;  %v727_v1 = vadd.f32 %v695_v54, %v2301_v56  ;;  %v859_v21 = vmul.f32 %v827_v0, %v2074_v28  ;;  %v799_v11 = vadd.f32 1.0, %v2195_v55 }
 0x12a   : > { %v2330_v44 = vpop.eup %1537  ;;  %1553 = vtanh.f32 %v758_v59  ;;  %v729_v48 = vadd.f32 %v697_v8, %v2308_v5  ;;  %v829_v19 = vmul.f32 0.5, %v797_v20  ;;  %v801_v35 = vadd.f32 1.0, %v2203_v60 }
 0x12b   : > { %v2334_v23 = vpop.eup %1539  ;;  %1555 = vtanh.f32 %v760_v18  ;;  %v759_v25 = vmul.f32 0.7978846, %v727_v1  ;;  %1025 = vmatprep.mubr.f32.mxu0 %v859_v21  ;;  %v831_v16 = vmul.f32 0.5, %v799_v11  ;;  %v798_v40 = vadd.f32 1.0, %v2182_v42 }
 0x12c   : > { %v1542_v17 = vpop.eup %1541  ;;  %v761_v28 = vmul.f32 0.7978846, %v729_v48  ;;  %v861_v55 = vmul.f32 %v829_v19, %v2077_v29  ;;  %1026 = vmatmul.mubr.f32.vlgmr.msra.gmra.mxu0 %v2185_v43  ;;  %v833_v54 = vmul.f32 0.5, %v801_v35  ;;  %v800_v0 = vadd.f32 1.0, %v2188_v49 }
 0x12d   : > { %v1544_v59 = vpop.eup %1543  ;;  %1557 = vtanh.f32 %v759_v25  ;;  %v863_v60 = vmul.f32 %v831_v16, %v2098_v46  ;;  %v830_v8 = vmul.f32 0.5, %v798_v40  ;;  %v803_v20 = vadd.f32 1.0, %v2253_v3 }
 0x12e   : > { %1559 = vtanh.f32 %v761_v28  ;;  %1130 = vmatprep.mubr.f32.mxu1 %v861_v55  ;;  %v865_v42 = vmul.f32 %v833_v54, %v2101_v47  ;;  %v832_v18 = vmul.f32 0.5, %v800_v0  ;;  %v805_v1 = vadd.f32 1.0, %v2256_v9 }
 0x12f   : > { %1131 = vmatmul.mubr.f32.vlgmr.msra.gmra.mxu1 %v2191_v50  ;;  %1030 = vmatprep.mubr.f32.mxu0 %v863_v60  ;;  %v862_v29 = vmul.f32 %v830_v8, %v2086_v36  ;;  %v835_v43 = vmul.f32 0.5, %v803_v20  ;;  %v802_v49 = vadd.f32 1.0, %v2230_v12  ;;  %v804_v46 = vadd.f32 1.0, %v2240_v39 }
 0x130   : > { %v1546_v21 = vpop.eup %1545  ;;  %1135 = vmatprep.mubr.f32.mxu1 %v865_v42  ;;  %v864_v3 = vmul.f32 %v832_v18, %v2089_v37  ;;  %v837_v11 = vmul.f32 0.5, %v805_v1  ;;  %v807_v47 = vadd.f32 1.0, %v2278_v61  ;;  %v809_v48 = vadd.f32 1.0, %v2282_v7 }
 0x131   : > { %1031 = vmatmul.mubr.f32.gmra.mxu0 %v862_v29  ;;  %v867_v50 = vmul.f32 %v835_v43, %v2131_v27  ;;  %v834_v9 = vmul.f32 0.5, %v802_v49  ;;  %v836_v19 = vmul.f32 0.5, %v804_v46  ;;  %v806_v36 = vadd.f32 1.0, %v2260_v34 }
 0x132   : > { %v869_v12 = vmul.f32 %v837_v11, %v2134_v32  ;;  %v839_v35 = vmul.f32 0.5, %v807_v47  ;;  %v841_v39 = vmul.f32 0.5, %v809_v48  ;;  %v808_v25 = vadd.f32 1.0, %v2266_v41 }
 0x133   : > { %v1548_v16 = vpop.eup %1547  ;;  %1136 = vmatmul.mubr.f32.gmra.mxu1 %v864_v3  ;;  %1035 = vmatprep.mubr.f32.mxu0 %v867_v50  ;;  %v866_v37 = vmul.f32 %v834_v9, %v2116_v6  ;;  %v838_v61 = vmul.f32 0.5, %v806_v36  ;;  %v811_v7 = vadd.f32 1.0, %v1534_v53  ;;  %v868_v27 = vmul.f32 %v836_v19, %v2123_v14 }
 0x134   : > { %v1550_v40 = vpop.eup %1549  ;;  %1140 = vmatprep.mubr.f32.mxu1 %v869_v12  ;;  %v871_v28 = vmul.f32 %v839_v35, %v2154_v52  ;;  %v873_v34 = vmul.f32 %v841_v39, %v2160_v57  ;;  %v813_v32 = vadd.f32 1.0, %v2325_v13  ;;  %v840_v41 = vmul.f32 0.5, %v808_v25 }
 0x135   : > { %v1552_v55 = vpop.eup %1551  ;;  %1036 = vmatmul.mubr.f32.gmra.mxu0 %v866_v37  ;;  %v843_v54 = vmul.f32 0.5, %v811_v7  ;;  %v810_v0 = vadd.f32 1.0, %v2303_v4  ;;  %v812_v6 = vadd.f32 1.0, %v2321_v38  ;;  %v815_v60 = vadd.f32 1.0, %v1542_v17 }
 0x136   : > { %1040 = vmatprep.mubr.f32.mxu0 %v871_v28  ;;  %v845_v53 = vmul.f32 0.5, %v813_v32  ;;  %v817_v8 = vadd.f32 1.0, %v1544_v59  ;;  %v870_v14 = vmul.f32 %v838_v61, %v2137_v33  ;;  %v814_v13 = vadd.f32 1.0, %v2330_v44  ;;  %v2483_v61 = vld [vmem:[#allocation3_spill] sm:$0xff] }
 0x137   : > { %v1554_v20 = vpop.eup %1553  ;;  %1141 = vmatmul.mubr.f32.gmra.mxu1 %v868_v27  ;;  %v875_v52 = vmul.f32 %v843_v54, %v2201_v58  ;;  %v842_v57 = vmul.f32 0.5, %v810_v0  ;;  %v847_v4 = vmul.f32 0.5, %v815_v60  ;;  %v872_v38 = vmul.f32 %v840_v41, %v2148_v45  ;;  %v2385_v27 = vld [vmem:[%s2474_s4] ss:$0 sm:$0xff] }
 0x138   : > { %v1556_v42 = vpop.eup %1555  ;;  %1145 = vmatprep.mubr.f32.mxu1 %v873_v34  ;;  %v877_v18 = vmul.f32 %v845_v53, %v2206_v62  ;;  %v849_v1 = vmul.f32 0.5, %v817_v8  ;;  %v844_v17 = vmul.f32 0.5, %v812_v6  ;;  %v816_v59 = vadd.f32 1.0, %v2334_v23 }
 0x139   : > { %1041 = vmatmul.mubr.f32.gmra.mxu0 %v870_v14  ;;  %v819_v29 = vadd.f32 1.0, %v1550_v40  ;;  %v879_v33 = vmul.f32 %v847_v4, %v2228_v10  ;;  %v821_v58 = vadd.f32 1.0, %v1552_v55  ;;  %v874_v44 = vmul.f32 %v842_v57, %v2175_v24  ;;  %v1577_v14 = vld [vmem:[%s1844_s27] sm:$0xff] }
 0x13a   : > { %v1558_v43 = vpop.eup %1557  ;;  %1045 = vmatprep.mubr.f32.mxu0 %v875_v52  ;;  %v846_v46 = vmul.f32 0.5, %v814_v13  ;;  %v818_v3 = vadd.f32 1.0, %v1546_v21  ;;  %v881_v11 = vmul.f32 %v849_v1, %v2235_v26  ;;  %v876_v23 = vmul.f32 %v844_v17, %v2198_v22 }
 0x13b   : > { %v1560_v49 = vpop.eup %1559  ;;  %1146 = vmatmul.mubr.f32.gmra.mxu1 %v872_v38  ;;  %v851_v62 = vmul.f32 0.5, %v819_v29  ;;  %v853_v45 = vmul.f32 0.5, %v821_v58  ;;  %v823_v47 = vadd.f32 1.0, %v1558_v43  ;;  %v848_v50 = vmul.f32 0.5, %v816_v59  ;;  %v1578_v59 = vld [vmem:[%s1844_s27 + $0x8] sm:$0xff] }
 0x13c   : > { %1150 = vmatprep.mubr.f32.mxu1 %v877_v18  ;;  %v825_v48 = vadd.f32 1.0, %v1560_v49  ;;  %v820_v9 = vadd.f32 1.0, %v1548_v16  ;;  %v878_v24 = vmul.f32 %v846_v46, %v2209_v63  ;;  %v850_v36 = vmul.f32 0.5, %v818_v3 }
 0x13d   : > { %1046 = vmatmul.mubr.f32.gmra.mxu0 %v874_v44  ;;  %v883_v10 = vmul.f32 %v851_v62, %v2271_v51  ;;  %v855_v19 = vmul.f32 0.5, %v823_v47  ;;  %v822_v21 = vadd.f32 1.0, %v1554_v20  ;;  %v885_v26 = vmul.f32 %v853_v45, %v2276_v30  ;;  %v2482_v51 = vld [vmem:[#allocation2_spill] sm:$0xff] }
 0x13e   : > { %1050 = vmatprep.mubr.f32.mxu0 %v879_v33  ;;  %v857_v12 = vmul.f32 0.5, %v825_v48  ;;  %v880_v35 = vmul.f32 %v848_v50, %v2216_v2  ;;  %v852_v39 = vmul.f32 0.5, %v820_v9  ;;  %v824_v22 = vadd.f32 1.0, %v1556_v42 }
 0x13f   : > { %1151 = vmatmul.mubr.f32.gmra.mxu1 %v876_v23  ;;  %v887_v25 = vmul.f32 %v855_v19, %v2301_v56  ;;  %v882_v16 = vmul.f32 %v850_v36, %v2482_v51  ;;  %v854_v37 = vmul.f32 0.5, %v822_v21  ;;  %v1580_v36 = vld [vmem:[%s1844_s27 + $0x18] sm:$0xff] }
 0x140   : > { %1155 = vmatprep.mubr.f32.mxu1 %v881_v11  ;;  %v889_v63 = vmul.f32 %v857_v12, %v2308_v5  ;;  %v884_v7 = vmul.f32 %v852_v39, %v2483_v61  ;;  %v856_v30 = vmul.f32 0.5, %v824_v22  ;;  %v1579_v11 = vld [vmem:[%s1844_s27 + $0x10] sm:$0xff] }
 0x141   : > { %1051 = vmatmul.mubr.f32.gmra.mxu0 %v878_v24  ;;  %v886_v2 = vmul.f32 %v854_v37, %v2288_v15  ;;  %v1581_v37 = vld [vmem:[%s1844_s27 + $0x20] sm:$0xff] }
 0x142   : > { %1055 = vmatprep.mubr.f32.mxu0 %v883_v10  ;;  %v888_v40 = vmul.f32 %v856_v30, %v2293_v31 }
 0x143   : > { %1156 = vmatmul.mubr.f32.gmra.mxu1 %v880_v35 }
 0x144   : > { %1160 = vmatprep.mubr.f32.mxu1 %v885_v26 }
 0x145   : > { %1056 = vmatmul.mubr.f32.gmra.mxu0 %v882_v16 }
 0x146   : > { %1060 = vmatprep.mubr.f32.mxu0 %v887_v25 }
 0x147   : > { %1161 = vmatmul.mubr.f32.gmra.mxu1 %v884_v7 }
 0x148   : > { %1165 = vmatprep.mubr.f32.mxu1 %v889_v63 }
 0x149   : > { %1061 = vmatmul.mubr.f32.gmra.mxu0 %v886_v2 }
 0x14b   : > { %1166 = vmatmul.mubr.f32.gmra.mxu1 %v888_v40 }
 0x1ec   : > { %v1408_v56 = vpop.f32.mrf.mxu0 }
 0x1ee   : > { %v1409_v5 = vpop.f32.mrf.mxu0 }
 0x1ef   : > { %v1464_v28 = vpop.f32.mrf.mxu1  ;;  %v1410_v34 = vadd.f32 %v1409_v5, %v1408_v56 }
 0x1f1   : > { %v1028_v32 = vadd.f32 %v1410_v34, %v2385_v27  ;;  %v1465_v55 = vpop.f32.mrf.mxu1  ;;  %v1411_v41 = vpop.f32.mrf.mxu0  ;;  %v1582_v34 = vld [vmem:[%s1844_s27 + $0x28] sm:$0xff] }
 0x1f2   : > { %v1466_v15 = vadd.f32 %v1465_v55, %v1464_v28 }
 0x1f3   : > { %v1467_v54 = vpop.f32.mrf.mxu1  ;;  %v1412_v0 = vpop.f32.mrf.mxu0 }
 0x1f4   : > { %v1133_v6 = vadd.f32 %v1466_v15, %v1028_v32  ;;  %v1413_v31 = vadd.f32 %v1412_v0, %v1411_v41 }
 0x1f5   : > { %v1468_v53 = vpop.f32.mrf.mxu1  ;;  %v1414_v60 = vpop.f32.mrf.mxu0 }
 0x1f6   : > { %v1033_v8 = vadd.f32 %v1413_v31, %v2385_v27  ;;  %v1469_v20 = vadd.f32 %v1468_v53, %v1467_v54  ;;  %v2390_v52 = vadd.f32 %v1577_v14, %v1133_v6  ;;  %v1583_v53 = vld [vmem:[%s1844_s27 + $0x30] sm:$0xff] }
 0x1f7   : > { %v1470_v57 = vpop.f32.mrf.mxu1  ;;  %v1415_v13 = vpop.f32.mrf.mxu0 }
 0x1f8   : > { %v1138_v42 = vadd.f32 %v1469_v20, %v1033_v8  ;;  %v1416_v18 = vadd.f32 %v1415_v13, %v1414_v60  ;;  %1179 = vadd.xlane.f32.xlu0 %v2390_v52  ;;  %v1584_v20 = vld [vmem:[%s1844_s27 + $0x38] sm:$0xff] }
 0x1f9   : > { %v1471_v4 = vpop.f32.mrf.mxu1  ;;  %v1417_v1 = vpop.f32.mrf.mxu0 }
 0x1fa   : > { %v1038_v38 = vadd.f32 %v1416_v18, %v2385_v27  ;;  %v1472_v17 = vadd.f32 %v1471_v4, %v1470_v57  ;;  %v2395_v29 = vadd.f32 %v1578_v59, %v1138_v42 }
 0x1fb   : > { %v1473_v43 = vpop.f32.mrf.mxu1  ;;  %v1418_v33 = vpop.f32.mrf.mxu0 }
 0x1fc   : > { %v1143_v58 = vadd.f32 %v1472_v17, %v1038_v38  ;;  %v1419_v49 = vadd.f32 %v1418_v33, %v1417_v1  ;;  %1181 = vadd.xlane.f32.xlu0 %v2395_v29 }
 0x1fd   : > { %v1474_v44 = vpop.f32.mrf.mxu1  ;;  %v1420_v46 = vpop.f32.mrf.mxu0 }
 0x1fe   : > { %v1043_v62 = vadd.f32 %v1419_v49, %v2385_v27  ;;  %v1475_v3 = vadd.f32 %v1474_v44, %v1473_v43  ;;  %v1173_v45 = vadd.f32 %v1579_v11, %v1143_v58 }
 0x1ff   : > { %v1476_v47 = vpop.f32.mrf.mxu1  ;;  %v1421_v48 = vpop.f32.mrf.mxu0 }
 0x200   : > { %v1148_v23 = vadd.f32 %v1475_v3, %v1043_v62  ;;  %v1422_v50 = vadd.f32 %v1421_v48, %v1420_v46  ;;  %1183 = vadd.xlane.f32.xlu1 %v1173_v45 }
 0x201   : > { %v1477_v9 = vpop.f32.mrf.mxu1  ;;  %v1423_v10 = vpop.f32.mrf.mxu0 }
 0x202   : > { %v1048_v19 = vadd.f32 %v1422_v50, %v2385_v27  ;;  %v1478_v24 = vadd.f32 %v1477_v9, %v1476_v47  ;;  %v1174_v21 = vadd.f32 %v1580_v36, %v1148_v23 }
 0x203   : > { %v1479_v26 = vpop.f32.mrf.mxu1  ;;  %v1424_v12 = vpop.f32.mrf.mxu0 }
 0x204   : > { %v1153_v35 = vadd.f32 %v1478_v24, %v1048_v19  ;;  %v1425_v39 = vadd.f32 %v1424_v12, %v1423_v10  ;;  %1185 = vadd.xlane.f32.xlu1 %v1174_v21 }
 0x205   : > { %v1480_v22 = vpop.f32.mrf.mxu1  ;;  %v1426_v25 = vpop.f32.mrf.mxu0 }
 0x206   : > { %v1053_v51 = vadd.f32 %v1425_v39, %v2385_v27  ;;  %v1481_v16 = vadd.f32 %v1480_v22, %v1479_v26  ;;  %v1175_v63 = vadd.f32 %v1581_v37, %v1153_v35 }
 0x207   : > { %v1482_v61 = vpop.f32.mrf.mxu1  ;;  %v1427_v7 = vpop.f32.mrf.mxu0 }
 0x208   : > { %v1158_v30 = vadd.f32 %v1481_v16, %v1053_v51  ;;  %v1428_v2 = vadd.f32 %v1427_v7, %v1426_v25  ;;  %1187 = vadd.xlane.f32.xlu0 %v1175_v63 }
 0x209   : > { %v1483_v40 = vpop.f32.mrf.mxu1  ;;  %v1429_v56 = vpop.f32.mrf.mxu0 }
 0x20a   : > { %v1058_v5 = vadd.f32 %v1428_v2, %v2385_v27  ;;  %v1484_v28 = vadd.f32 %v1483_v40, %v1482_v61  ;;  %v1176_v32 = vadd.f32 %v1582_v34, %v1158_v30  ;;  %v1373_v34 = vld [vmem:[%s2476_s6] ss:$0 sm:$0xff] }
 0x20b   : > { %v1485_v55 = vpop.f32.mrf.mxu1  ;;  %v1430_v41 = vpop.f32.mrf.mxu0 }
 0x20c   : > { %v1163_v15 = vadd.f32 %v1484_v28, %v1058_v5  ;;  %v1431_v54 = vadd.f32 %v1430_v41, %v1429_v56  ;;  %1189 = vadd.xlane.f32.xlu1 %v1176_v32  ;;  %v1372_v56 = vld [vmem:[%s2475_s5] ss:$0 sm:$0xff] }
 0x20d   : > { %v1486_v0 = vpop.f32.mrf.mxu1 }
 0x20e   : > { %v1063_v6 = vadd.f32 %v1431_v54, %v2385_v27  ;;  %v1487_v31 = vadd.f32 %v1486_v0, %v1485_v55  ;;  %v1177_v60 = vadd.f32 %v1583_v53, %v1163_v15 }
 0x210   : > { %v1168_v8 = vadd.f32 %v1487_v31, %v1063_v6  ;;  %1191 = vadd.xlane.f32.xlu0 %v1177_v60 }
 0x212   : > { %v1178_v14 = vadd.f32 %v1584_v20, %v1168_v8 }
 0x214   : > { %1193 = vadd.xlane.f32.xlu1 %v1178_v14 }
 0x281   : > { %v1180_v57 = vpop.xlane.xlu0 %1179 }
 0x282   : > { %v1196_v13 = vmul.f32 0.0078125, %v1180_v57 }
 0x284   : > { %v1204_v42 = vsub.f32 %v2390_v52, %v1196_v13 }
 0x285   : > { %v1182_v18 = vpop.xlane.xlu0 %1181 }
 0x286   : > { %v1197_v4 = vmul.f32 0.0078125, %v1182_v18  ;;  %v1212_v1 = vmul.f32 %v1204_v42, %v1204_v42 }
 0x288   : > { %v2411_v38 = vsub.f32 %v2395_v29, %v1197_v4  ;;  %1220 = vadd.xlane.f32.xlu0 %v1212_v1 }
 0x289   : > { %v1184_v27 = vpop.xlane.xlu1 %1183 }
 0x28a   : > { %v1198_v17 = vmul.f32 0.0078125, %v1184_v27  ;;  %v1213_v59 = vmul.f32 %v2411_v38, %v2411_v38 }
 0x28c   : > { %v2415_v43 = vsub.f32 %v1173_v45, %v1198_v17  ;;  %1222 = vadd.xlane.f32.xlu1 %v1213_v59 }
 0x28d   : > { %v1186_v33 = vpop.xlane.xlu1 %1185 }
 0x28e   : > { %v1199_v58 = vmul.f32 0.0078125, %v1186_v33  ;;  %v1214_v52 = vmul.f32 %v2415_v43, %v2415_v43 }
 0x290   : > { %v2419_v49 = vsub.f32 %v1174_v21, %v1199_v58  ;;  %1224 = vadd.xlane.f32.xlu0 %v1214_v52 }
 0x291   : > { %v1188_v44 = vpop.xlane.xlu0 %1187 }
 0x292   : > { %v1200_v29 = vmul.f32 0.0078125, %v1188_v44  ;;  %v1215_v46 = vmul.f32 %v2419_v49, %v2419_v49 }
 0x294   : > { %v2423_v62 = vsub.f32 %v1175_v63, %v1200_v29  ;;  %1226 = vadd.xlane.f32.xlu1 %v1215_v46 }
 0x295   : > { %v1190_v3 = vpop.xlane.xlu1 %1189 }
 0x296   : > { %v1201_v11 = vmul.f32 0.0078125, %v1190_v3  ;;  %v1216_v45 = vmul.f32 %v2423_v62, %v2423_v62 }
 0x298   : > { %v2427_v47 = vsub.f32 %v1176_v32, %v1201_v11  ;;  %1228 = vadd.xlane.f32.xlu0 %v1216_v45 }
 0x299   : > { %v1192_v48 = vpop.xlane.xlu0 %1191 }
 0x29a   : > { %v1202_v23 = vmul.f32 0.0078125, %v1192_v48  ;;  %v1217_v50 = vmul.f32 %v2427_v47, %v2427_v47 }
 0x29c   : > { %v2431_v9 = vsub.f32 %v1177_v60, %v1202_v23  ;;  %1230 = vadd.xlane.f32.xlu1 %v1217_v50 }
 0x29d   : > { %v1194_v10 = vpop.xlane.xlu1 %1193 }
 0x29e   : > { %v1203_v19 = vmul.f32 0.0078125, %v1194_v10  ;;  %v1218_v24 = vmul.f32 %v2431_v9, %v2431_v9 }
 0x2a0   : > { %v2435_v36 = vsub.f32 %v1178_v14, %v1203_v19  ;;  %1232 = vadd.xlane.f32.xlu0 %v1218_v24 }
 0x2a2   : > { %v1219_v21 = vmul.f32 %v2435_v36, %v2435_v36 }
 0x2a4   : > { %1234 = vadd.xlane.f32.xlu1 %v1219_v21 }
 0x311   : > { %v1221_v26 = vpop.xlane.xlu0 %1220 }
 0x312   : > { %v1236_v12 = vmul.f32 0.0078125, %v1221_v26 }
 0x314   : > { %v1244_v35 = vadd.f32 1e-05, %v1236_v12 }
 0x315   : > { %v1223_v39 = vpop.xlane.xlu1 %1222 }
 0x316   : > { %1561 = vrsqrt.f32 %v1244_v35  ;;  %v1237_v22 = vmul.f32 0.0078125, %v1223_v39 }
 0x318   : > { %v1245_v25 = vadd.f32 1e-05, %v1237_v22 }
 0x319   : > { %v1225_v51 = vpop.xlane.xlu0 %1224 }
 0x31a   : > { %1563 = vrsqrt.f32 %v1245_v25  ;;  %v1238_v16 = vmul.f32 0.0078125, %v1225_v51 }
 0x31c   : > { %v1246_v37 = vadd.f32 1e-05, %v1238_v16 }
 0x31d   : > { %v1227_v63 = vpop.xlane.xlu1 %1226 }
 0x31e   : > { %1565 = vrsqrt.f32 %v1246_v37  ;;  %v1239_v61 = vmul.f32 0.0078125, %v1227_v63 }
 0x320   : > { %v1247_v7 = vadd.f32 1e-05, %v1239_v61 }
 0x321   : > { %v1229_v30 = vpop.xlane.xlu0 %1228 }
 0x322   : > { %1567 = vrsqrt.f32 %v1247_v7  ;;  %v1240_v2 = vmul.f32 0.0078125, %v1229_v30 }
 0x323   : > { %v1562_v40 = vpop.eup %1561 }
 0x324   : > { %v1260_v5 = vmul.f32 %v1562_v40, %v1204_v42  ;;  %v1248_v28 = vadd.f32 1e-05, %v1240_v2 }
 0x325   : > { %v1231_v32 = vpop.xlane.xlu1 %1230 }
 0x326   : > { %v1275_v55 = vmul.f32 %v1372_v56, %v1260_v5  ;;  %1569 = vrsqrt.f32 %v1248_v28  ;;  %v1241_v41 = vmul.f32 0.0078125, %v1231_v32 }
 0x327   : > { %v1564_v15 = vpop.eup %1563 }
 0x328   : > { %v1290_v54 = vadd.f32 %v1373_v34, %v1275_v55  ;;  %v1261_v0 = vmul.f32 %v1564_v15, %v2411_v38  ;;  %v1249_v6 = vadd.f32 1e-05, %v1241_v41 }
 0x329   : > { %v1233_v31 = vpop.xlane.xlu0 %1232 }
 0x32a   : > { %1298 = vst [vmem:[%s2450_s15] sm:$0xff] %v1290_v54  ;;  %v1276_v53 = vmul.f32 %v1372_v56, %v1261_v0  ;;  %1571 = vrsqrt.f32 %v1249_v6  ;;  %v1242_v60 = vmul.f32 0.0078125, %v1233_v31 }
 0x32b   : > { %v1566_v8 = vpop.eup %1565 }
 0x32c   : > { %v1291_v20 = vadd.f32 %v1373_v34, %v1276_v53  ;;  %v1262_v14 = vmul.f32 %v1566_v8, %v2415_v43  ;;  %v1250_v57 = vadd.f32 1e-05, %v1242_v60 }
 0x32d   : > { %v1235_v13 = vpop.xlane.xlu1 %1234 }
 0x32e   : > { %1299 = vst [vmem:[%s2450_s15 + $0x8] sm:$0xff] %v1291_v20  ;;  %v1277_v42 = vmul.f32 %v1372_v56, %v1262_v14  ;;  %1573 = vrsqrt.f32 %v1250_v57  ;;  %v1243_v18 = vmul.f32 0.0078125, %v1235_v13 }
 0x32f   : > { %v1568_v4 = vpop.eup %1567 }
 0x330   : > { %v1292_v1 = vadd.f32 %v1373_v34, %v1277_v42  ;;  %v1263_v38 = vmul.f32 %v1568_v4, %v2419_v49  ;;  %v1251_v27 = vadd.f32 1e-05, %v1243_v18 }
 0x332   : > { %1300 = vst [vmem:[%s2450_s15 + $0x10] sm:$0xff] %v1292_v1  ;;  %v1278_v17 = vmul.f32 %v1372_v56, %v1263_v38  ;;  %1575 = vrsqrt.f32 %v1251_v27 }
 0x333   : > { %v1570_v59 = vpop.eup %1569 }
 0x334   : > { %v1293_v33 = vadd.f32 %v1373_v34, %v1278_v17  ;;  %v1264_v43 = vmul.f32 %v1570_v59, %v2423_v62 }
 0x336   : > { %1301 = vst [vmem:[%s2450_s15 + $0x18] sm:$0xff] %v1293_v33  ;;  %v1279_v58 = vmul.f32 %v1372_v56, %v1264_v43 }
 0x337   : > { %v1572_v52 = vpop.eup %1571 }
 0x338   : > { %v1294_v44 = vadd.f32 %v1373_v34, %v1279_v58  ;;  %v1265_v29 = vmul.f32 %v1572_v52, %v2427_v47 }
 0x33a   : > { %1302 = vst [vmem:[%s2450_s15 + $0x20] sm:$0xff] %v1294_v44  ;;  %v1280_v46 = vmul.f32 %v1372_v56, %v1265_v29 }
 0x33b   : > { %v1574_v49 = vpop.eup %1573 }
 0x33c   : > { %v1295_v3 = vadd.f32 %v1373_v34, %v1280_v46  ;;  %v1266_v11 = vmul.f32 %v1574_v49, %v2431_v9 }
 0x33e   : > { %1303 = vst [vmem:[%s2450_s15 + $0x28] sm:$0xff] %v1295_v3  ;;  %v1281_v45 = vmul.f32 %v1372_v56, %v1266_v11 }
 0x33f   : > { %v1576_v48 = vpop.eup %1575 }
 0x340   : > { %v1296_v23 = vadd.f32 %v1373_v34, %v1281_v45  ;;  %v1267_v62 = vmul.f32 %v1576_v48, %v2435_v36 }
 0x342   : > { %1304 = vst [vmem:[%s2450_s15 + $0x30] sm:$0xff] %v1296_v23  ;;  %v1282_v50 = vmul.f32 %v1372_v56, %v1267_v62 }
 0x344   : > { %v1297_v10 = vadd.f32 %v1373_v34, %v1282_v50 }
 0x346   : > { %1305 = vst [vmem:[%s2450_s15 + $0x38] sm:$0xff] %v1297_v10 }
 0x347 PF: > { %s17_s24 = sadd.s32 1, %s1591_s24  }
 0x348   : > { %p14_p4 = scmp.ge.s32.totalorder %s17_s24, 4  }
 0x34a   :  { %16 = sbr.rel (!%p14_p4) target bundleno = 1 (0x1), region = 78 }

</bundles_post_ra>
